<compile_context>
chip_gen: v7x
topology: tpu7x:2x2x1
jax: 0.10.0
libtpu: 0.0.40
codegen_flags: <defaults>
</compile_context>

<pallas_src>
import functools
import math

import jax
import jax.numpy as jnp
from jax import lax
from jax.experimental import pallas as pl
from jax.experimental.pallas import tpu as pltpu


# --------------------------- in-kernel helpers -------------------------------

def _ln(x, g, b, eps=1e-6):
    """Annotated-Transformer LayerNorm: unbiased std (ddof=1), eps added to std.

    The divide is routed to the EUP via pl.reciprocal (approx) -> ~1e-3 rel
    drift vs. the exact f32 PyTorch reference.
    """
    d = x.shape[-1]
    mean = jnp.mean(x, axis=-1, keepdims=True)
    diff = x - mean
    std = jnp.sqrt(jnp.sum(diff * diff, axis=-1, keepdims=True) / (d - 1))
    return g * diff * pl.reciprocal(std + eps, approx=True) + b


def _mm(a, b):
    """MXU matmul: bf16 operands, f32 accumulation."""
    return jnp.dot(a.astype(jnp.bfloat16), b.astype(jnp.bfloat16),
                   preferred_element_type=jnp.float32)


def _mm_t(a, b):
    """a @ b.T (contract last dims of both) without materializing a transpose."""
    return lax.dot_general(a.astype(jnp.bfloat16), b.astype(jnp.bfloat16),
                           (((1,), (1,)), ((), ())),
                           preferred_element_type=jnp.float32)


def _attend(q, k, v, mask2d, wo, bo, n_heads):
    """Multi-head attention on 2-D slabs; heads are static lane slices.

    q: (Sq, d), k/v: (Sk, d), mask2d: (1, Sk) or (Sq, Sk) 0/1 float mask.
    Scale and mask-bias are hoisted out of the head loop; per-head context
    vectors are concatenated and hit the output projection with ONE matmul.
    """
    d = q.shape[-1]
    d_k = d // n_heads
    qb = (q * (1.0 / math.sqrt(d_k))).astype(jnp.bfloat16)   # scale folded once
    kb = k.astype(jnp.bfloat16)
    vb = v.astype(jnp.bfloat16)
    bias = (mask2d - 1.0) * 1e9                              # additive mask, hoisted
    heads = []
    for hh in range(n_heads):
        sl = slice(hh * d_k, (hh + 1) * d_k)
        s = _mm_t(qb[:, sl], kb[:, sl]) + bias               # (Sq, Sk) f32
        s_max = jnp.max(s, axis=-1, keepdims=True)
        e = jnp.exp(s - s_max)
        p = e * pl.reciprocal(jnp.sum(e, axis=-1, keepdims=True), approx=True)
        heads.append(_mm(p, vb[:, sl]))                      # (Sq, d_k)
    cat = jnp.concatenate(heads, axis=-1)                    # (Sq, d) = concat(heads)
    return _mm(cat, wo) + bo


def _ffn(y, w1, b1, w2, b2):
    h = jnp.maximum(_mm(y, w1) + b1, 0.0)
    return _mm(h, w2) + b2


# --------------------------- fused stack kernels ------------------------------
# grid = (B, N): batch leading ("parallel", v7x megacore), layer axis last
# ("arbitrary"). The output block index_map ignores the layer axis, so the
# activation stays resident in VMEM across all layers of one batch element.

def _encoder_stack_kernel(x_ref, mask_ref,
                          ln0g_ref, ln0b_ref, wqkv_ref, bqkv_ref, wo_ref, bo_ref,
                          ln1g_ref, ln1b_ref, w1_ref, b1_ref, w2_ref, b2_ref,
                          fng_ref, fnb_ref,
                          o_ref, *, n_heads):
    l = pl.program_id(1)

    # Seed the resident activation block from HBM input only at layer 0.
    @pl.when(l == 0)
    def _():
        o_ref[...] = x_ref[...]

    x = o_ref[0]                                    # (S, d) f32, carried across l
    d = x.shape[-1]
    m = mask_ref[0]                                 # (1, S_src)

    # SublayerConnection 0: x + self_attn(LN(x))   (fused QKV projection)
    y = _ln(x, ln0g_ref[0], ln0b_ref[0])
    qkv = _mm(y, wqkv_ref[0]) + bqkv_ref[0]         # (S, 3d)
    q, k, v = qkv[:, :d], qkv[:, d:2 * d], qkv[:, 2 * d:]
    x = x + _attend(q, k, v, m, wo_ref[0], bo_ref[0], n_heads)

    # SublayerConnection 1: x + FFN(LN(x))
    y = _ln(x, ln1g_ref[0], ln1b_ref[0])
    x = x + _ffn(y, w1_ref[0], b1_ref[0], w2_ref[0], b2_ref[0])

    o_ref[0] = x

    # Fold the stack-final LayerNorm into the last layer (no standalone call).
    @pl.when(l == pl.num_programs(1) - 1)
    def _():
        o_ref[0] = _ln(o_ref[0], fng_ref[...], fnb_ref[...])


def _decoder_stack_kernel(x_ref, mem_ref, tmask_ref, smask_ref,
                          ln0g_ref, ln0b_ref, wqkv_ref, bqkv_ref, wos_ref, bos_ref,
                          ln1g_ref, ln1b_ref, wq_ref, bq_ref, wkv_ref, bkv_ref,
                          woc_ref, boc_ref,
                          ln2g_ref, ln2b_ref, w1_ref, b1_ref, w2_ref, b2_ref,
                          fng_ref, fnb_ref,
                          o_ref, *, n_heads):
    l = pl.program_id(1)

    @pl.when(l == 0)
    def _():
        o_ref[...] = x_ref[...]

    x = o_ref[0]                                    # (S_tgt, d)
    mem = mem_ref[0]                                # (S_src, d)
    d = x.shape[-1]
    tm = tmask_ref[0]                               # (S_tgt, S_tgt)
    sm = smask_ref[0]                               # (1, S_src)

    # SublayerConnection 0: x + self_attn(LN(x), tgt_mask)
    y = _ln(x, ln0g_ref[0], ln0b_ref[0])
    qkv = _mm(y, wqkv_ref[0]) + bqkv_ref[0]
    q, k, v = qkv[:, :d], qkv[:, d:2 * d], qkv[:, 2 * d:]
    x = x + _attend(q, k, v, tm, wos_ref[0], bos_ref[0], n_heads)

    # SublayerConnection 1: x + src_attn(LN(x), memory, src_mask)
    y = _ln(x, ln1g_ref[0], ln1b_ref[0])
    q = _mm(y, wq_ref[0]) + bq_ref[0]
    kv = _mm(mem, wkv_ref[0]) + bkv_ref[0]          # fused K|V projection
    k, v = kv[:, :d], kv[:, d:]
    x = x + _attend(q, k, v, sm, woc_ref[0], boc_ref[0], n_heads)

    # SublayerConnection 2: x + FFN(LN(x))
    y = _ln(x, ln2g_ref[0], ln2b_ref[0])
    x = x + _ffn(y, w1_ref[0], b1_ref[0], w2_ref[0], b2_ref[0])

    o_ref[0] = x

    @pl.when(l == pl.num_programs(1) - 1)
    def _():
        o_ref[0] = _ln(o_ref[0], fng_ref[...], fnb_ref[...])


# --------------------------- pallas_call wrappers -----------------------------

def _batched_spec(shape):
    """Block indexed by batch, constant across the layer axis."""
    nd = len(shape)
    return pl.BlockSpec((1,) + tuple(shape[1:]),
                        lambda b, l, _n=nd: (b,) + (0,) * (_n - 1))


def _layered_spec(shape):
    """Block indexed by layer (leading N axis of a stacked parameter)."""
    nd = len(shape)
    return pl.BlockSpec((1,) + tuple(shape[1:]),
                        lambda b, l, _n=nd: (l,) + (0,) * (_n - 1))


def _shared_spec(shape):
    """Full-array block, same for every grid step (final-norm params)."""
    nd = len(shape)
    return pl.BlockSpec(tuple(shape), lambda b, l, _n=nd: (0,) * _n)


_STACK_PARAMS = pltpu.CompilerParams(
    dimension_semantics=("parallel", "arbitrary"))


def encoder_stack_pallas(x, src_mask_c, enc, norm_g, norm_b, n_heads):
    B, S, d = x.shape
    N = enc['wqkv'].shape[0]
    operands = (x, src_mask_c,
                enc['ln0_g'], enc['ln0_b'], enc['wqkv'], enc['bqkv'],
                enc['wo'], enc['bo'],
                enc['ln1_g'], enc['ln1_b'], enc['w1'], enc['b1'],
                enc['w2'], enc['b2'],
                norm_g, norm_b)
    in_specs = ([_batched_spec(x.shape), _batched_spec(src_mask_c.shape)]
                + [_layered_spec(a.shape) for a in operands[2:14]]
                + [_shared_spec(norm_g.shape), _shared_spec(norm_b.shape)])
    return pl.pallas_call(
        functools.partial(_encoder_stack_kernel, n_heads=n_heads),
        out_shape=jax.ShapeDtypeStruct((B, S, d), jnp.float32),
        grid=(B, N),
        in_specs=in_specs,
        out_specs=pl.BlockSpec((1, S, d), lambda b, l: (b, 0, 0)),
        compiler_params=_STACK_PARAMS,
    )(*operands)


def decoder_stack_pallas(x, memory, tgt_mask_c, src_mask_c, dec,
                         norm_g, norm_b, n_heads):
    B, St, d = x.shape
    N = dec['wqkv'].shape[0]
    operands = (x, memory, tgt_mask_c, src_mask_c,
                dec['ln0_g'], dec['ln0_b'], dec['wqkv'], dec['bqkv'],
                dec['wos'], dec['bos'],
                dec['ln1_g'], dec['ln1_b'], dec['wq'], dec['bq'],
                dec['wkv'], dec['bkv'], dec['woc'], dec['boc'],
                dec['ln2_g'], dec['ln2_b'], dec['w1'], dec['b1'],
                dec['w2'], dec['b2'],
                norm_g, norm_b)
    in_specs = ([_batched_spec(x.shape), _batched_spec(memory.shape),
                 _batched_spec(tgt_mask_c.shape), _batched_spec(src_mask_c.shape)]
                + [_layered_spec(a.shape) for a in operands[4:24]]
                + [_shared_spec(norm_g.shape), _shared_spec(norm_b.shape)])
    return pl.pallas_call(
        functools.partial(_decoder_stack_kernel, n_heads=n_heads),
        out_shape=jax.ShapeDtypeStruct((B, St, d), jnp.float32),
        grid=(B, N),
        in_specs=in_specs,
        out_specs=pl.BlockSpec((1, St, d), lambda b, l: (b, 0, 0)),
        compiler_params=_STACK_PARAMS,
    )(*operands)


# --------------------------- model glue (plain JAX) ---------------------------

def positional_encoding(max_len, d_model):
    pos = jnp.arange(max_len, dtype=jnp.float32)[:, None]
    div = jnp.exp(jnp.arange(0, d_model, 2, dtype=jnp.float32) *
                  (-math.log(10000.0) / d_model))
    pe = jnp.zeros((max_len, d_model), jnp.float32)
    pe = pe.at[:, 0::2].set(jnp.sin(pos * div))
    pe = pe.at[:, 1::2].set(jnp.cos(pos * div))
    return pe


def embed(lut, tokens, pe, d_model):
    # TODO(synk): embedding gather + positional-encoding add kept as plain JAX glue.
    x = jnp.take(lut, tokens, axis=0) * math.sqrt(d_model)
    return x + pe[None, :tokens.shape[1], :]


@functools.partial(jax.jit, static_argnames=('h',))
def encoder_decoder_forward(params, src, tgt, src_mask_c, tgt_mask_c, h):
    d_model = params['src_lut'].shape[1]

    # ---- encode: ONE fused pallas_call for the whole encoder stack ----
    x = embed(params['src_lut'], src, params['pe'], d_model)
    memory = encoder_stack_pallas(x, src_mask_c, params['enc'],
                                  params['enc_norm_g'], params['enc_norm_b'], h)

    # ---- decode: ONE fused pallas_call for the whole decoder stack ----
    x = embed(params['tgt_lut'], tgt, params['pe'], d_model)
    return decoder_stack_pallas(x, memory, tgt_mask_c, src_mask_c, params['dec'],
                                params['dec_norm_g'], params['dec_norm_b'], h)


# --------------------------- deterministic parameter init ---------------------

def _stack_layers(layer_dicts):
    """Stack a list of per-layer param dicts along a new leading N axis."""
    return jax.tree_util.tree_map(lambda *xs: jnp.stack(xs, axis=0), *layer_dicts)


def init_params(key, src_vocab, tgt_vocab, N, d_model, d_ff, h, max_len=64):
    keys = iter(jax.random.split(key, 8 + N * 24))

    def w(d_in, d_out):
        return (jax.random.normal(next(keys), (d_in, d_out), jnp.float32)
                / jnp.sqrt(jnp.float32(d_in)))

    ones = lambda: jnp.ones((1, d_model), jnp.float32)
    zeros = lambda: jnp.zeros((1, d_model), jnp.float32)

    def enc_layer():
        return dict(
            ln0_g=ones(), ln0_b=zeros(),
            wqkv=jnp.concatenate([w(d_model, d_model) for _ in range(3)], axis=1),
            bqkv=jnp.zeros((1, 3 * d_model), jnp.float32),
            wo=w(d_model, d_model), bo=zeros(),
            ln1_g=ones(), ln1_b=zeros(),
            w1=w(d_model, d_ff), b1=jnp.zeros((1, d_ff), jnp.float32),
            w2=w(d_ff, d_model), b2=zeros())

    def dec_layer():
        return dict(
            ln0_g=ones(), ln0_b=zeros(),
            wqkv=jnp.concatenate([w(d_model, d_model) for _ in range(3)], axis=1),
            bqkv=jnp.zeros((1, 3 * d_model), jnp.float32),
            wos=w(d_model, d_model), bos=zeros(),
            ln1_g=ones(), ln1_b=zeros(),
            wq=w(d_model, d_model), bq=zeros(),
            wkv=jnp.concatenate([w(d_model, d_model) for _ in range(2)], axis=1),
            bkv=jnp.zeros((1, 2 * d_model), jnp.float32),
            woc=w(d_model, d_model), boc=zeros(),
            ln2_g=ones(), ln2_b=zeros(),
            w1=w(d_model, d_ff), b1=jnp.zeros((1, d_ff), jnp.float32),
            w2=w(d_ff, d_model), b2=zeros())

    enc = _stack_layers([enc_layer() for _ in range(N)])
    dec = _stack_layers([dec_layer() for _ in range(N)])

    return dict(
        src_lut=0.1 * jax.random.normal(next(keys), (src_vocab, d_model), jnp.float32),
        tgt_lut=0.1 * jax.random.normal(next(keys), (tgt_vocab, d_model), jnp.float32),
        pe=positional_encoding(max_len, d_model),
        enc=enc, dec=dec,
        enc_norm_g=ones(), enc_norm_b=zeros(),
        dec_norm_g=ones(), dec_norm_b=zeros())


# --------------------------- demo ---------------------------------------------

if __name__ == "__main__":
    B, S_src, S_tgt = 2, 8, 8
    vocab, d_model, d_ff, h, N = 16, 32, 64, 4, 2

    key = jax.random.PRNGKey(0)
    pk, sk, tk = jax.random.split(key, 3)
    params = init_params(pk, vocab, vocab, N, d_model, d_ff, h)

    src = jax.random.randint(sk, (B, S_src), 1, vocab, dtype=jnp.int32)
    tgt = jax.random.randint(tk, (B, S_tgt), 1, vocab, dtype=jnp.int32)
    src = src.at[1, -2:].set(0)  # pad a couple of source tokens to exercise masking

    # Compact masks (broadcast happens inside the kernels):
    #   src_mask: (B, 1, S_src) key-padding mask
    #   tgt_mask: (B, S_tgt, S_tgt) key-padding & causal mask
    src_mask_c = (src != 0).astype(jnp.float32)[:, None, :]
    sub = jnp.tril(jnp.ones((S_tgt, S_tgt), jnp.float32))
    tgt_mask_c = (tgt != 0).astype(jnp.float32)[:, None, :] * sub[None]

    out = encoder_decoder_forward(params, src, tgt, src_mask_c, tgt_mask_c, h=h)
    out = jax.block_until_ready(out)
    assert out.shape == (B, S_tgt, d_model)
    assert bool(jnp.all(jnp.isfinite(out)))
    print("KERNEL_OK")
</pallas_src>

<mosaic_0001>
module attributes {stable_mosaic.version = 11 : i64} {
  func.func @_decoder_stack_kernel(%arg0: i32, %arg1: i32, %arg2: memref<1x8x32xf32, #tpu.memory_space<vmem>>, %arg3: memref<1x8x32xf32, #tpu.memory_space<vmem>>, %arg4: memref<1x8x8xf32, #tpu.memory_space<vmem>>, %arg5: memref<1x1x8xf32, #tpu.memory_space<vmem>>, %arg6: memref<1x1x32xf32, #tpu.memory_space<vmem>>, %arg7: memref<1x1x32xf32, #tpu.memory_space<vmem>>, %arg8: memref<1x32x96xf32, #tpu.memory_space<vmem>>, %arg9: memref<1x1x96xf32, #tpu.memory_space<vmem>>, %arg10: memref<1x32x32xf32, #tpu.memory_space<vmem>>, %arg11: memref<1x1x32xf32, #tpu.memory_space<vmem>>, %arg12: memref<1x1x32xf32, #tpu.memory_space<vmem>>, %arg13: memref<1x1x32xf32, #tpu.memory_space<vmem>>, %arg14: memref<1x32x32xf32, #tpu.memory_space<vmem>>, %arg15: memref<1x1x32xf32, #tpu.memory_space<vmem>>, %arg16: memref<1x32x64xf32, #tpu.memory_space<vmem>>, %arg17: memref<1x1x64xf32, #tpu.memory_space<vmem>>, %arg18: memref<1x32x32xf32, #tpu.memory_space<vmem>>, %arg19: memref<1x1x32xf32, #tpu.memory_space<vmem>>, %arg20: memref<1x1x32xf32, #tpu.memory_space<vmem>>, %arg21: memref<1x1x32xf32, #tpu.memory_space<vmem>>, %arg22: memref<1x32x64xf32, #tpu.memory_space<vmem>>, %arg23: memref<1x1x64xf32, #tpu.memory_space<vmem>>, %arg24: memref<1x64x32xf32, #tpu.memory_space<vmem>>, %arg25: memref<1x1x32xf32, #tpu.memory_space<vmem>>, %arg26: memref<1x32xf32, #tpu.memory_space<vmem>>, %arg27: memref<1x32xf32, #tpu.memory_space<vmem>>, %arg28: memref<1x8x32xf32, #tpu.memory_space<vmem>>) attributes {dimension_semantics = [#tpu.dimension_semantics<parallel>, #tpu.dimension_semantics<arbitrary>], iteration_bounds = array<i64: 2, 2>, scalar_prefetch = 0 : i64, scratch_operands = 0 : i64, tpu.core_type = #tpu.core_type<tc>, window_params = [{transform_indices = @transform_0, window_bounds = array<i64: 1, 8, 32>}, {transform_indices = @transform_1, window_bounds = array<i64: 1, 8, 32>}, {transform_indices = @transform_2, window_bounds = array<i64: 1, 8, 8>}, {transform_indices = @transform_3, window_bounds = array<i64: 1, 1, 8>}, {transform_indices = @transform_4, window_bounds = array<i64: 1, 1, 32>}, {transform_indices = @transform_5, window_bounds = array<i64: 1, 1, 32>}, {transform_indices = @transform_6, window_bounds = array<i64: 1, 32, 96>}, {transform_indices = @transform_7, window_bounds = array<i64: 1, 1, 96>}, {transform_indices = @transform_8, window_bounds = array<i64: 1, 32, 32>}, {transform_indices = @transform_9, window_bounds = array<i64: 1, 1, 32>}, {transform_indices = @transform_10, window_bounds = array<i64: 1, 1, 32>}, {transform_indices = @transform_11, window_bounds = array<i64: 1, 1, 32>}, {transform_indices = @transform_12, window_bounds = array<i64: 1, 32, 32>}, {transform_indices = @transform_13, window_bounds = array<i64: 1, 1, 32>}, {transform_indices = @transform_14, window_bounds = array<i64: 1, 32, 64>}, {transform_indices = @transform_15, window_bounds = array<i64: 1, 1, 64>}, {transform_indices = @transform_16, window_bounds = array<i64: 1, 32, 32>}, {transform_indices = @transform_17, window_bounds = array<i64: 1, 1, 32>}, {transform_indices = @transform_18, window_bounds = array<i64: 1, 1, 32>}, {transform_indices = @transform_19, window_bounds = array<i64: 1, 1, 32>}, {transform_indices = @transform_20, window_bounds = array<i64: 1, 32, 64>}, {transform_indices = @transform_21, window_bounds = array<i64: 1, 1, 64>}, {transform_indices = @transform_22, window_bounds = array<i64: 1, 64, 32>}, {transform_indices = @transform_23, window_bounds = array<i64: 1, 1, 32>}, {pipeline_mode = #tpu.pipeline_mode<synchronous>, transform_indices = @transform_24, window_bounds = array<i64: 1, 32>}, {pipeline_mode = #tpu.pipeline_mode<synchronous>, transform_indices = @transform_25, window_bounds = array<i64: 1, 32>}, {transform_indices = @transform_26, window_bounds = array<i64: 1, 8, 32>}]} {
    %c0_i32 = arith.constant 0 : i32
    %0 = arith.cmpi eq, %arg1, %c0_i32 : i32
    %1 = arith.extui %0 : i1 to i32
    %c0_i32_0 = arith.constant 0 : i32
    %2 = arith.cmpi ne, %1, %c0_i32_0 : i32
    scf.if %2 {
      %c0_136 = arith.constant 0 : index
      %c0_137 = arith.constant 0 : index
      %c0_138 = arith.constant 0 : index
      %325 = vector.load %arg2[%c0_136, %c0_137, %c0_138] : memref<1x8x32xf32, #tpu.memory_space<vmem>>, vector<1x8x32xf32>
      %c0_139 = arith.constant 0 : index
      %c0_140 = arith.constant 0 : index
      %c0_141 = arith.constant 0 : index
      %326 = vector.load %arg28[%c0_139, %c0_140, %c0_141] : memref<1x8x32xf32, #tpu.memory_space<vmem>>, vector<1x8x32xf32>
      tpu.vector_store %arg28[%c0_139, %c0_140, %c0_141], %325 {strides = array<i32>} : memref<1x8x32xf32, #tpu.memory_space<vmem>>, vector<1x8x32xf32>,
    } else {
    }
    %c0 = arith.constant 0 : index
    %c0_1 = arith.constant 0 : index
    %c0_2 = arith.constant 0 : index
    %3 = vector.load %arg28[%c0, %c0_1, %c0_2] : memref<1x8x32xf32, #tpu.memory_space<vmem>>, vector<1x8x32xf32>
    %4 = vector.shape_cast %3 : vector<1x8x32xf32> to vector<8x32xf32>
    %c0_3 = arith.constant 0 : index
    %c0_4 = arith.constant 0 : index
    %c0_5 = arith.constant 0 : index
    %5 = vector.load %arg3[%c0_3, %c0_4, %c0_5] : memref<1x8x32xf32, #tpu.memory_space<vmem>>, vector<1x8x32xf32>
    %6 = vector.shape_cast %5 : vector<1x8x32xf32> to vector<8x32xf32>
    %c0_6 = arith.constant 0 : index
    %c0_7 = arith.constant 0 : index
    %c0_8 = arith.constant 0 : index
    %7 = vector.load %arg4[%c0_6, %c0_7, %c0_8] : memref<1x8x8xf32, #tpu.memory_space<vmem>>, vector<1x8x8xf32>
    %8 = vector.shape_cast %7 : vector<1x8x8xf32> to vector<8x8xf32>
    %c0_9 = arith.constant 0 : index
    %c0_10 = arith.constant 0 : index
    %c0_11 = arith.constant 0 : index
    %9 = vector.load %arg5[%c0_9, %c0_10, %c0_11] : memref<1x1x8xf32, #tpu.memory_space<vmem>>, vector<1x1x8xf32>
    %10 = vector.shape_cast %9 : vector<1x1x8xf32> to vector<1x8xf32>
    %c0_12 = arith.constant 0 : index
    %c0_13 = arith.constant 0 : index
    %c0_14 = arith.constant 0 : index
    %11 = vector.load %arg6[%c0_12, %c0_13, %c0_14] : memref<1x1x32xf32, #tpu.memory_space<vmem>>, vector<1x1x32xf32>
    %12 = vector.shape_cast %11 : vector<1x1x32xf32> to vector<1x32xf32>
    %c0_15 = arith.constant 0 : index
    %c0_16 = arith.constant 0 : index
    %c0_17 = arith.constant 0 : index
    %13 = vector.load %arg7[%c0_15, %c0_16, %c0_17] : memref<1x1x32xf32, #tpu.memory_space<vmem>>, vector<1x1x32xf32>
    %14 = vector.shape_cast %13 : vector<1x1x32xf32> to vector<1x32xf32>
    %cst = arith.constant dense<0.000000e+00> : vector<8xf32>
    %15 = vector.multi_reduction <add>, %4, %cst [1] : vector<8x32xf32> to vector<8xf32>
    %16 = vector.shape_cast %15 : vector<8xf32> to vector<8x1xf32>
    %cst_18 = arith.constant 3.200000e+01 : f32
    %17 = vector.broadcast %cst_18 : f32 to vector<8x1xf32>
    %18 = arith.divf %16, %17 : vector<8x1xf32>
    %19 = vector.broadcast %18 : vector<8x1xf32> to vector<8x32xf32>
    %20 = arith.subf %4, %19 : vector<8x32xf32>
    %21 = arith.mulf %20, %20 : vector<8x32xf32>
    %cst_19 = arith.constant dense<0.000000e+00> : vector<8xf32>
    %22 = vector.multi_reduction <add>, %21, %cst_19 [1] : vector<8x32xf32> to vector<8xf32>
    %23 = vector.shape_cast %22 : vector<8xf32> to vector<8x1xf32>
    %cst_20 = arith.constant 3.100000e+01 : f32
    %24 = vector.broadcast %cst_20 : f32 to vector<8x1xf32>
    %25 = arith.divf %23, %24 : vector<8x1xf32>
    %26 = math.sqrt %25 : vector<8x1xf32>
    %27 = vector.broadcast %12 : vector<1x32xf32> to vector<8x32xf32>
    %28 = arith.mulf %27, %20 : vector<8x32xf32>
    %cst_21 = arith.constant 9.99999997E-7 : f32
    %29 = vector.broadcast %cst_21 : f32 to vector<8x1xf32>
    %30 = arith.addf %26, %29 : vector<8x1xf32>
    %31 = tpu.reciprocal %30 {approx = true} : vector<8x1xf32> -> vector<8x1xf32>
    %32 = vector.broadcast %31 : vector<8x1xf32> to vector<8x32xf32>
    %33 = arith.mulf %28, %32 : vector<8x32xf32>
    %34 = vector.broadcast %14 : vector<1x32xf32> to vector<8x32xf32>
    %35 = arith.addf %33, %34 : vector<8x32xf32>
    %c0_22 = arith.constant 0 : index
    %c0_23 = arith.constant 0 : index
    %c0_24 = arith.constant 0 : index
    %36 = vector.load %arg8[%c0_22, %c0_23, %c0_24] : memref<1x32x96xf32, #tpu.memory_space<vmem>>, vector<1x32x96xf32>
    %37 = vector.shape_cast %36 : vector<1x32x96xf32> to vector<32x96xf32>
    %38 = arith.truncf %35 : vector<8x32xf32> to vector<8x32xbf16>
    %39 = arith.truncf %37 : vector<32x96xf32> to vector<32x96xbf16>
    %cst_25 = arith.constant dense<0.000000e+00> : vector<8x96xf32>
    %40 = tpu.matmul %38, %39, %cst_25 {dimension_numbers = #tpu.dot_dimension_numbers<[1], [0], [0], [1], [0, 0, 1, 1], [], []>} : vector<8x32xbf16>, vector<32x96xbf16>, vector<8x96xf32> -> vector<8x96xf32>
    %c0_26 = arith.constant 0 : index
    %c0_27 = arith.constant 0 : index
    %c0_28 = arith.constant 0 : index
    %41 = vector.load %arg9[%c0_26, %c0_27, %c0_28] : memref<1x1x96xf32, #tpu.memory_space<vmem>>, vector<1x1x96xf32>
    %42 = vector.shape_cast %41 : vector<1x1x96xf32> to vector<1x96xf32>
    %43 = vector.broadcast %42 : vector<1x96xf32> to vector<8x96xf32>
    %44 = arith.addf %40, %43 : vector<8x96xf32>
    %45 = vector.extract_strided_slice %44 {offsets = [0, 0], sizes = [8, 32], strides = [1, 1]} : vector<8x96xf32> to vector<8x32xf32>
    %46 = vector.extract_strided_slice %44 {offsets = [0, 32], sizes = [8, 32], strides = [1, 1]} : vector<8x96xf32> to vector<8x32xf32>
    %47 = vector.extract_strided_slice %44 {offsets = [0, 64], sizes = [8, 32], strides = [1, 1]} : vector<8x96xf32> to vector<8x32xf32>
    %c0_29 = arith.constant 0 : index
    %c0_30 = arith.constant 0 : index
    %c0_31 = arith.constant 0 : index
    %48 = vector.load %arg10[%c0_29, %c0_30, %c0_31] : memref<1x32x32xf32, #tpu.memory_space<vmem>>, vector<1x32x32xf32>
    %49 = vector.shape_cast %48 : vector<1x32x32xf32> to vector<32x32xf32>
    %c0_32 = arith.constant 0 : index
    %c0_33 = arith.constant 0 : index
    %c0_34 = arith.constant 0 : index
    %50 = vector.load %arg11[%c0_32, %c0_33, %c0_34] : memref<1x1x32xf32, #tpu.memory_space<vmem>>, vector<1x1x32xf32>
    %51 = vector.shape_cast %50 : vector<1x1x32xf32> to vector<1x32xf32>
    %cst_35 = arith.constant 0.353553385 : f32
    %52 = vector.broadcast %cst_35 : f32 to vector<8x32xf32>
    %53 = arith.mulf %45, %52 : vector<8x32xf32>
    %54 = arith.truncf %53 : vector<8x32xf32> to vector<8x32xbf16>
    %55 = arith.truncf %46 : vector<8x32xf32> to vector<8x32xbf16>
    %56 = arith.truncf %47 : vector<8x32xf32> to vector<8x32xbf16>
    %cst_36 = arith.constant 1.000000e+00 : f32
    %57 = vector.broadcast %cst_36 : f32 to vector<8x8xf32>
    %58 = arith.subf %8, %57 : vector<8x8xf32>
    %cst_37 = arith.constant 1.000000e+09 : f32
    %59 = vector.broadcast %cst_37 : f32 to vector<8x8xf32>
    %60 = arith.mulf %58, %59 : vector<8x8xf32>
    %61 = vector.extract_strided_slice %54 {offsets = [0, 0], sizes = [8, 8], strides = [1, 1]} : vector<8x32xbf16> to vector<8x8xbf16>
    %62 = vector.extract_strided_slice %55 {offsets = [0, 0], sizes = [8, 8], strides = [1, 1]} : vector<8x32xbf16> to vector<8x8xbf16>
    %cst_38 = arith.constant dense<0.000000e+00> : vector<8x8xf32>
    %63 = tpu.matmul %61, %62, %cst_38 {dimension_numbers = #tpu.dot_dimension_numbers<[1], [1], [0], [0], [0, 0, 1, 0], [], []>} : vector<8x8xbf16>, vector<8x8xbf16>, vector<8x8xf32> -> vector<8x8xf32>
    %64 = arith.addf %63, %60 : vector<8x8xf32>
    %cst_39 = arith.constant dense<0xFF800000> : vector<8xf32>
    %65 = vector.multi_reduction <maximumf>, %64, %cst_39 [1] : vector<8x8xf32> to vector<8xf32>
    %66 = vector.shape_cast %65 : vector<8xf32> to vector<8x1xf32>
    %67 = vector.broadcast %66 : vector<8x1xf32> to vector<8x8xf32>
    %68 = arith.subf %64, %67 : vector<8x8xf32>
    %69 = math.exp %68 : vector<8x8xf32>
    %cst_40 = arith.constant dense<0.000000e+00> : vector<8xf32>
    %70 = vector.multi_reduction <add>, %69, %cst_40 [1] : vector<8x8xf32> to vector<8xf32>
    %71 = vector.shape_cast %70 : vector<8xf32> to vector<8x1xf32>
    %72 = tpu.reciprocal %71 {approx = true} : vector<8x1xf32> -> vector<8x1xf32>
    %73 = vector.broadcast %72 : vector<8x1xf32> to vector<8x8xf32>
    %74 = arith.mulf %69, %73 : vector<8x8xf32>
    %75 = vector.extract_strided_slice %56 {offsets = [0, 0], sizes = [8, 8], strides = [1, 1]} : vector<8x32xbf16> to vector<8x8xbf16>
    %76 = arith.truncf %74 : vector<8x8xf32> to vector<8x8xbf16>
    %cst_41 = arith.constant dense<0.000000e+00> : vector<8x8xf32>
    %77 = tpu.matmul %76, %75, %cst_41 {dimension_numbers = #tpu.dot_dimension_numbers<[1], [0], [0], [1], [0, 0, 1, 1], [], []>} : vector<8x8xbf16>, vector<8x8xbf16>, vector<8x8xf32> -> vector<8x8xf32>
    %78 = vector.extract_strided_slice %54 {offsets = [0, 8], sizes = [8, 8], strides = [1, 1]} : vector<8x32xbf16> to vector<8x8xbf16>
    %79 = vector.extract_strided_slice %55 {offsets = [0, 8], sizes = [8, 8], strides = [1, 1]} : vector<8x32xbf16> to vector<8x8xbf16>
    %cst_42 = arith.constant dense<0.000000e+00> : vector<8x8xf32>
    %80 = tpu.matmul %78, %79, %cst_42 {dimension_numbers = #tpu.dot_dimension_numbers<[1], [1], [0], [0], [0, 0, 1, 0], [], []>} : vector<8x8xbf16>, vector<8x8xbf16>, vector<8x8xf32> -> vector<8x8xf32>
    %81 = arith.addf %80, %60 : vector<8x8xf32>
    %cst_43 = arith.constant dense<0xFF800000> : vector<8xf32>
    %82 = vector.multi_reduction <maximumf>, %81, %cst_43 [1] : vector<8x8xf32> to vector<8xf32>
    %83 = vector.shape_cast %82 : vector<8xf32> to vector<8x1xf32>
    %84 = vector.broadcast %83 : vector<8x1xf32> to vector<8x8xf32>
    %85 = arith.subf %81, %84 : vector<8x8xf32>
    %86 = math.exp %85 : vector<8x8xf32>
    %cst_44 = arith.constant dense<0.000000e+00> : vector<8xf32>
    %87 = vector.multi_reduction <add>, %86, %cst_44 [1] : vector<8x8xf32> to vector<8xf32>
    %88 = vector.shape_cast %87 : vector<8xf32> to vector<8x1xf32>
    %89 = tpu.reciprocal %88 {approx = true} : vector<8x1xf32> -> vector<8x1xf32>
    %90 = vector.broadcast %89 : vector<8x1xf32> to vector<8x8xf32>
    %91 = arith.mulf %86, %90 : vector<8x8xf32>
    %92 = vector.extract_strided_slice %56 {offsets = [0, 8], sizes = [8, 8], strides = [1, 1]} : vector<8x32xbf16> to vector<8x8xbf16>
    %93 = arith.truncf %91 : vector<8x8xf32> to vector<8x8xbf16>
    %cst_45 = arith.constant dense<0.000000e+00> : vector<8x8xf32>
    %94 = tpu.matmul %93, %92, %cst_45 {dimension_numbers = #tpu.dot_dimension_numbers<[1], [0], [0], [1], [0, 0, 1, 1], [], []>} : vector<8x8xbf16>, vector<8x8xbf16>, vector<8x8xf32> -> vector<8x8xf32>
    %95 = vector.extract_strided_slice %54 {offsets = [0, 16], sizes = [8, 8], strides = [1, 1]} : vector<8x32xbf16> to vector<8x8xbf16>
    %96 = vector.extract_strided_slice %55 {offsets = [0, 16], sizes = [8, 8], strides = [1, 1]} : vector<8x32xbf16> to vector<8x8xbf16>
    %cst_46 = arith.constant dense<0.000000e+00> : vector<8x8xf32>
    %97 = tpu.matmul %95, %96, %cst_46 {dimension_numbers = #tpu.dot_dimension_numbers<[1], [1], [0], [0], [0, 0, 1, 0], [], []>} : vector<8x8xbf16>, vector<8x8xbf16>, vector<8x8xf32> -> vector<8x8xf32>
    %98 = arith.addf %97, %60 : vector<8x8xf32>
    %cst_47 = arith.constant dense<0xFF800000> : vector<8xf32>
    %99 = vector.multi_reduction <maximumf>, %98, %cst_47 [1] : vector<8x8xf32> to vector<8xf32>
    %100 = vector.shape_cast %99 : vector<8xf32> to vector<8x1xf32>
    %101 = vector.broadcast %100 : vector<8x1xf32> to vector<8x8xf32>
    %102 = arith.subf %98, %101 : vector<8x8xf32>
    %103 = math.exp %102 : vector<8x8xf32>
    %cst_48 = arith.constant dense<0.000000e+00> : vector<8xf32>
    %104 = vector.multi_reduction <add>, %103, %cst_48 [1] : vector<8x8xf32> to vector<8xf32>
    %105 = vector.shape_cast %104 : vector<8xf32> to vector<8x1xf32>
    %106 = tpu.reciprocal %105 {approx = true} : vector<8x1xf32> -> vector<8x1xf32>
    %107 = vector.broadcast %106 : vector<8x1xf32> to vector<8x8xf32>
    %108 = arith.mulf %103, %107 : vector<8x8xf32>
    %109 = vector.extract_strided_slice %56 {offsets = [0, 16], sizes = [8, 8], strides = [1, 1]} : vector<8x32xbf16> to vector<8x8xbf16>
    %110 = arith.truncf %108 : vector<8x8xf32> to vector<8x8xbf16>
    %cst_49 = arith.constant dense<0.000000e+00> : vector<8x8xf32>
    %111 = tpu.matmul %110, %109, %cst_49 {dimension_numbers = #tpu.dot_dimension_numbers<[1], [0], [0], [1], [0, 0, 1, 1], [], []>} : vector<8x8xbf16>, vector<8x8xbf16>, vector<8x8xf32> -> vector<8x8xf32>
    %112 = vector.extract_strided_slice %54 {offsets = [0, 24], sizes = [8, 8], strides = [1, 1]} : vector<8x32xbf16> to vector<8x8xbf16>
    %113 = vector.extract_strided_slice %55 {offsets = [0, 24], sizes = [8, 8], strides = [1, 1]} : vector<8x32xbf16> to vector<8x8xbf16>
    %cst_50 = arith.constant dense<0.000000e+00> : vector<8x8xf32>
    %114 = tpu.matmul %112, %113, %cst_50 {dimension_numbers = #tpu.dot_dimension_numbers<[1], [1], [0], [0], [0, 0, 1, 0], [], []>} : vector<8x8xbf16>, vector<8x8xbf16>, vector<8x8xf32> -> vector<8x8xf32>
    %115 = arith.addf %114, %60 : vector<8x8xf32>
    %cst_51 = arith.constant dense<0xFF800000> : vector<8xf32>
    %116 = vector.multi_reduction <maximumf>, %115, %cst_51 [1] : vector<8x8xf32> to vector<8xf32>
    %117 = vector.shape_cast %116 : vector<8xf32> to vector<8x1xf32>
    %118 = vector.broadcast %117 : vector<8x1xf32> to vector<8x8xf32>
    %119 = arith.subf %115, %118 : vector<8x8xf32>
    %120 = math.exp %119 : vector<8x8xf32>
    %cst_52 = arith.constant dense<0.000000e+00> : vector<8xf32>
    %121 = vector.multi_reduction <add>, %120, %cst_52 [1] : vector<8x8xf32> to vector<8xf32>
    %122 = vector.shape_cast %121 : vector<8xf32> to vector<8x1xf32>
    %123 = tpu.reciprocal %122 {approx = true} : vector<8x1xf32> -> vector<8x1xf32>
    %124 = vector.broadcast %123 : vector<8x1xf32> to vector<8x8xf32>
    %125 = arith.mulf %120, %124 : vector<8x8xf32>
    %126 = vector.extract_strided_slice %56 {offsets = [0, 24], sizes = [8, 8], strides = [1, 1]} : vector<8x32xbf16> to vector<8x8xbf16>
    %127 = arith.truncf %125 : vector<8x8xf32> to vector<8x8xbf16>
    %cst_53 = arith.constant dense<0.000000e+00> : vector<8x8xf32>
    %128 = tpu.matmul %127, %126, %cst_53 {dimension_numbers = #tpu.dot_dimension_numbers<[1], [0], [0], [1], [0, 0, 1, 1], [], []>} : vector<8x8xbf16>, vector<8x8xbf16>, vector<8x8xf32> -> vector<8x8xf32>
    %129 = tpu.concatenate %77, %94, %111, %128 in 1 : vector<8x8xf32>, vector<8x8xf32>, vector<8x8xf32>, vector<8x8xf32> -> vector<8x32xf32>
    %130 = arith.truncf %129 : vector<8x32xf32> to vector<8x32xbf16>
    %131 = arith.truncf %49 : vector<32x32xf32> to vector<32x32xbf16>
    %cst_54 = arith.constant dense<0.000000e+00> : vector<8x32xf32>
    %132 = tpu.matmul %130, %131, %cst_54 {dimension_numbers = #tpu.dot_dimension_numbers<[1], [0], [0], [1], [0, 0, 1, 1], [], []>} : vector<8x32xbf16>, vector<32x32xbf16>, vector<8x32xf32> -> vector<8x32xf32>
    %133 = vector.broadcast %51 : vector<1x32xf32> to vector<8x32xf32>
    %134 = arith.addf %132, %133 : vector<8x32xf32>
    %135 = arith.addf %4, %134 : vector<8x32xf32>
    %c0_55 = arith.constant 0 : index
    %c0_56 = arith.constant 0 : index
    %c0_57 = arith.constant 0 : index
    %136 = vector.load %arg12[%c0_55, %c0_56, %c0_57] : memref<1x1x32xf32, #tpu.memory_space<vmem>>, vector<1x1x32xf32>
    %137 = vector.shape_cast %136 : vector<1x1x32xf32> to vector<1x32xf32>
    %c0_58 = arith.constant 0 : index
    %c0_59 = arith.constant 0 : index
    %c0_60 = arith.constant 0 : index
    %138 = vector.load %arg13[%c0_58, %c0_59, %c0_60] : memref<1x1x32xf32, #tpu.memory_space<vmem>>, vector<1x1x32xf32>
    %139 = vector.shape_cast %138 : vector<1x1x32xf32> to vector<1x32xf32>
    %cst_61 = arith.constant dense<0.000000e+00> : vector<8xf32>
    %140 = vector.multi_reduction <add>, %135, %cst_61 [1] : vector<8x32xf32> to vector<8xf32>
    %141 = vector.shape_cast %140 : vector<8xf32> to vector<8x1xf32>
    %cst_62 = arith.constant 3.200000e+01 : f32
    %142 = vector.broadcast %cst_62 : f32 to vector<8x1xf32>
    %143 = arith.divf %141, %142 : vector<8x1xf32>
    %144 = vector.broadcast %143 : vector<8x1xf32> to vector<8x32xf32>
    %145 = arith.subf %135, %144 : vector<8x32xf32>
    %146 = arith.mulf %145, %145 : vector<8x32xf32>
    %cst_63 = arith.constant dense<0.000000e+00> : vector<8xf32>
    %147 = vector.multi_reduction <add>, %146, %cst_63 [1] : vector<8x32xf32> to vector<8xf32>
    %148 = vector.shape_cast %147 : vector<8xf32> to vector<8x1xf32>
    %cst_64 = arith.constant 3.100000e+01 : f32
    %149 = vector.broadcast %cst_64 : f32 to vector<8x1xf32>
    %150 = arith.divf %148, %149 : vector<8x1xf32>
    %151 = math.sqrt %150 : vector<8x1xf32>
    %152 = vector.broadcast %137 : vector<1x32xf32> to vector<8x32xf32>
    %153 = arith.mulf %152, %145 : vector<8x32xf32>
    %cst_65 = arith.constant 9.99999997E-7 : f32
    %154 = vector.broadcast %cst_65 : f32 to vector<8x1xf32>
    %155 = arith.addf %151, %154 : vector<8x1xf32>
    %156 = tpu.reciprocal %155 {approx = true} : vector<8x1xf32> -> vector<8x1xf32>
    %157 = vector.broadcast %156 : vector<8x1xf32> to vector<8x32xf32>
    %158 = arith.mulf %153, %157 : vector<8x32xf32>
    %159 = vector.broadcast %139 : vector<1x32xf32> to vector<8x32xf32>
    %160 = arith.addf %158, %159 : vector<8x32xf32>
    %c0_66 = arith.constant 0 : index
    %c0_67 = arith.constant 0 : index
    %c0_68 = arith.constant 0 : index
    %161 = vector.load %arg14[%c0_66, %c0_67, %c0_68] : memref<1x32x32xf32, #tpu.memory_space<vmem>>, vector<1x32x32xf32>
    %162 = vector.shape_cast %161 : vector<1x32x32xf32> to vector<32x32xf32>
    %163 = arith.truncf %160 : vector<8x32xf32> to vector<8x32xbf16>
    %164 = arith.truncf %162 : vector<32x32xf32> to vector<32x32xbf16>
    %cst_69 = arith.constant dense<0.000000e+00> : vector<8x32xf32>
    %165 = tpu.matmul %163, %164, %cst_69 {dimension_numbers = #tpu.dot_dimension_numbers<[1], [0], [0], [1], [0, 0, 1, 1], [], []>} : vector<8x32xbf16>, vector<32x32xbf16>, vector<8x32xf32> -> vector<8x32xf32>
    %c0_70 = arith.constant 0 : index
    %c0_71 = arith.constant 0 : index
    %c0_72 = arith.constant 0 : index
    %166 = vector.load %arg15[%c0_70, %c0_71, %c0_72] : memref<1x1x32xf32, #tpu.memory_space<vmem>>, vector<1x1x32xf32>
    %167 = vector.shape_cast %166 : vector<1x1x32xf32> to vector<1x32xf32>
    %168 = vector.broadcast %167 : vector<1x32xf32> to vector<8x32xf32>
    %169 = arith.addf %165, %168 : vector<8x32xf32>
    %c0_73 = arith.constant 0 : index
    %c0_74 = arith.constant 0 : index
    %c0_75 = arith.constant 0 : index
    %170 = vector.load %arg16[%c0_73, %c0_74, %c0_75] : memref<1x32x64xf32, #tpu.memory_space<vmem>>, vector<1x32x64xf32>
    %171 = vector.shape_cast %170 : vector<1x32x64xf32> to vector<32x64xf32>
    %172 = arith.truncf %6 : vector<8x32xf32> to vector<8x32xbf16>
    %173 = arith.truncf %171 : vector<32x64xf32> to vector<32x64xbf16>
    %cst_76 = arith.constant dense<0.000000e+00> : vector<8x64xf32>
    %174 = tpu.matmul %172, %173, %cst_76 {dimension_numbers = #tpu.dot_dimension_numbers<[1], [0], [0], [1], [0, 0, 1, 1], [], []>} : vector<8x32xbf16>, vector<32x64xbf16>, vector<8x64xf32> -> vector<8x64xf32>
    %c0_77 = arith.constant 0 : index
    %c0_78 = arith.constant 0 : index
    %c0_79 = arith.constant 0 : index
    %175 = vector.load %arg17[%c0_77, %c0_78, %c0_79] : memref<1x1x64xf32, #tpu.memory_space<vmem>>, vector<1x1x64xf32>
    %176 = vector.shape_cast %175 : vector<1x1x64xf32> to vector<1x64xf32>
    %177 = vector.broadcast %176 : vector<1x64xf32> to vector<8x64xf32>
    %178 = arith.addf %174, %177 : vector<8x64xf32>
    %179 = vector.extract_strided_slice %178 {offsets = [0, 0], sizes = [8, 32], strides = [1, 1]} : vector<8x64xf32> to vector<8x32xf32>
    %180 = vector.extract_strided_slice %178 {offsets = [0, 32], sizes = [8, 32], strides = [1, 1]} : vector<8x64xf32> to vector<8x32xf32>
    %c0_80 = arith.constant 0 : index
    %c0_81 = arith.constant 0 : index
    %c0_82 = arith.constant 0 : index
    %181 = vector.load %arg18[%c0_80, %c0_81, %c0_82] : memref<1x32x32xf32, #tpu.memory_space<vmem>>, vector<1x32x32xf32>
    %182 = vector.shape_cast %181 : vector<1x32x32xf32> to vector<32x32xf32>
    %c0_83 = arith.constant 0 : index
    %c0_84 = arith.constant 0 : index
    %c0_85 = arith.constant 0 : index
    %183 = vector.load %arg19[%c0_83, %c0_84, %c0_85] : memref<1x1x32xf32, #tpu.memory_space<vmem>>, vector<1x1x32xf32>
    %184 = vector.shape_cast %183 : vector<1x1x32xf32> to vector<1x32xf32>
    %cst_86 = arith.constant 0.353553385 : f32
    %185 = vector.broadcast %cst_86 : f32 to vector<8x32xf32>
    %186 = arith.mulf %169, %185 : vector<8x32xf32>
    %187 = arith.truncf %186 : vector<8x32xf32> to vector<8x32xbf16>
    %188 = arith.truncf %179 : vector<8x32xf32> to vector<8x32xbf16>
    %189 = arith.truncf %180 : vector<8x32xf32> to vector<8x32xbf16>
    %cst_87 = arith.constant 1.000000e+00 : f32
    %190 = vector.broadcast %cst_87 : f32 to vector<1x8xf32>
    %191 = arith.subf %10, %190 : vector<1x8xf32>
    %cst_88 = arith.constant 1.000000e+09 : f32
    %192 = vector.broadcast %cst_88 : f32 to vector<1x8xf32>
    %193 = arith.mulf %191, %192 : vector<1x8xf32>
    %194 = vector.extract_strided_slice %187 {offsets = [0, 0], sizes = [8, 8], strides = [1, 1]} : vector<8x32xbf16> to vector<8x8xbf16>
    %195 = vector.extract_strided_slice %188 {offsets = [0, 0], sizes = [8, 8], strides = [1, 1]} : vector<8x32xbf16> to vector<8x8xbf16>
    %cst_89 = arith.constant dense<0.000000e+00> : vector<8x8xf32>
    %196 = tpu.matmul %194, %195, %cst_89 {dimension_numbers = #tpu.dot_dimension_numbers<[1], [1], [0], [0], [0, 0, 1, 0], [], []>} : vector<8x8xbf16>, vector<8x8xbf16>, vector<8x8xf32> -> vector<8x8xf32>
    %197 = vector.broadcast %193 : vector<1x8xf32> to vector<8x8xf32>
    %198 = arith.addf %196, %197 : vector<8x8xf32>
    %cst_90 = arith.constant dense<0xFF800000> : vector<8xf32>
    %199 = vector.multi_reduction <maximumf>, %198, %cst_90 [1] : vector<8x8xf32> to vector<8xf32>
    %200 = vector.shape_cast %199 : vector<8xf32> to vector<8x1xf32>
    %201 = vector.broadcast %200 : vector<8x1xf32> to vector<8x8xf32>
    %202 = arith.subf %198, %201 : vector<8x8xf32>
    %203 = math.exp %202 : vector<8x8xf32>
    %cst_91 = arith.constant dense<0.000000e+00> : vector<8xf32>
    %204 = vector.multi_reduction <add>, %203, %cst_91 [1] : vector<8x8xf32> to vector<8xf32>
    %205 = vector.shape_cast %204 : vector<8xf32> to vector<8x1xf32>
    %206 = tpu.reciprocal %205 {approx = true} : vector<8x1xf32> -> vector<8x1xf32>
    %207 = vector.broadcast %206 : vector<8x1xf32> to vector<8x8xf32>
    %208 = arith.mulf %203, %207 : vector<8x8xf32>
    %209 = vector.extract_strided_slice %189 {offsets = [0, 0], sizes = [8, 8], strides = [1, 1]} : vector<8x32xbf16> to vector<8x8xbf16>
    %210 = arith.truncf %208 : vector<8x8xf32> to vector<8x8xbf16>
    %cst_92 = arith.constant dense<0.000000e+00> : vector<8x8xf32>
    %211 = tpu.matmul %210, %209, %cst_92 {dimension_numbers = #tpu.dot_dimension_numbers<[1], [0], [0], [1], [0, 0, 1, 1], [], []>} : vector<8x8xbf16>, vector<8x8xbf16>, vector<8x8xf32> -> vector<8x8xf32>
    %212 = vector.extract_strided_slice %187 {offsets = [0, 8], sizes = [8, 8], strides = [1, 1]} : vector<8x32xbf16> to vector<8x8xbf16>
    %213 = vector.extract_strided_slice %188 {offsets = [0, 8], sizes = [8, 8], strides = [1, 1]} : vector<8x32xbf16> to vector<8x8xbf16>
    %cst_93 = arith.constant dense<0.000000e+00> : vector<8x8xf32>
    %214 = tpu.matmul %212, %213, %cst_93 {dimension_numbers = #tpu.dot_dimension_numbers<[1], [1], [0], [0], [0, 0, 1, 0], [], []>} : vector<8x8xbf16>, vector<8x8xbf16>, vector<8x8xf32> -> vector<8x8xf32>
    %215 = vector.broadcast %193 : vector<1x8xf32> to vector<8x8xf32>
    %216 = arith.addf %214, %215 : vector<8x8xf32>
    %cst_94 = arith.constant dense<0xFF800000> : vector<8xf32>
    %217 = vector.multi_reduction <maximumf>, %216, %cst_94 [1] : vector<8x8xf32> to vector<8xf32>
    %218 = vector.shape_cast %217 : vector<8xf32> to vector<8x1xf32>
    %219 = vector.broadcast %218 : vector<8x1xf32> to vector<8x8xf32>
    %220 = arith.subf %216, %219 : vector<8x8xf32>
    %221 = math.exp %220 : vector<8x8xf32>
    %cst_95 = arith.constant dense<0.000000e+00> : vector<8xf32>
    %222 = vector.multi_reduction <add>, %221, %cst_95 [1] : vector<8x8xf32> to vector<8xf32>
    %223 = vector.shape_cast %222 : vector<8xf32> to vector<8x1xf32>
    %224 = tpu.reciprocal %223 {approx = true} : vector<8x1xf32> -> vector<8x1xf32>
    %225 = vector.broadcast %224 : vector<8x1xf32> to vector<8x8xf32>
    %226 = arith.mulf %221, %225 : vector<8x8xf32>
    %227 = vector.extract_strided_slice %189 {offsets = [0, 8], sizes = [8, 8], strides = [1, 1]} : vector<8x32xbf16> to vector<8x8xbf16>
    %228 = arith.truncf %226 : vector<8x8xf32> to vector<8x8xbf16>
    %cst_96 = arith.constant dense<0.000000e+00> : vector<8x8xf32>
    %229 = tpu.matmul %228, %227, %cst_96 {dimension_numbers = #tpu.dot_dimension_numbers<[1], [0], [0], [1], [0, 0, 1, 1], [], []>} : vector<8x8xbf16>, vector<8x8xbf16>, vector<8x8xf32> -> vector<8x8xf32>
    %230 = vector.extract_strided_slice %187 {offsets = [0, 16], sizes = [8, 8], strides = [1, 1]} : vector<8x32xbf16> to vector<8x8xbf16>
    %231 = vector.extract_strided_slice %188 {offsets = [0, 16], sizes = [8, 8], strides = [1, 1]} : vector<8x32xbf16> to vector<8x8xbf16>
    %cst_97 = arith.constant dense<0.000000e+00> : vector<8x8xf32>
    %232 = tpu.matmul %230, %231, %cst_97 {dimension_numbers = #tpu.dot_dimension_numbers<[1], [1], [0], [0], [0, 0, 1, 0], [], []>} : vector<8x8xbf16>, vector<8x8xbf16>, vector<8x8xf32> -> vector<8x8xf32>
    %233 = vector.broadcast %193 : vector<1x8xf32> to vector<8x8xf32>
    %234 = arith.addf %232, %233 : vector<8x8xf32>
    %cst_98 = arith.constant dense<0xFF800000> : vector<8xf32>
    %235 = vector.multi_reduction <maximumf>, %234, %cst_98 [1] : vector<8x8xf32> to vector<8xf32>
    %236 = vector.shape_cast %235 : vector<8xf32> to vector<8x1xf32>
    %237 = vector.broadcast %236 : vector<8x1xf32> to vector<8x8xf32>
    %238 = arith.subf %234, %237 : vector<8x8xf32>
    %239 = math.exp %238 : vector<8x8xf32>
    %cst_99 = arith.constant dense<0.000000e+00> : vector<8xf32>
    %240 = vector.multi_reduction <add>, %239, %cst_99 [1] : vector<8x8xf32> to vector<8xf32>
    %241 = vector.shape_cast %240 : vector<8xf32> to vector<8x1xf32>
    %242 = tpu.reciprocal %241 {approx = true} : vector<8x1xf32> -> vector<8x1xf32>
    %243 = vector.broadcast %242 : vector<8x1xf32> to vector<8x8xf32>
    %244 = arith.mulf %239, %243 : vector<8x8xf32>
    %245 = vector.extract_strided_slice %189 {offsets = [0, 16], sizes = [8, 8], strides = [1, 1]} : vector<8x32xbf16> to vector<8x8xbf16>
    %246 = arith.truncf %244 : vector<8x8xf32> to vector<8x8xbf16>
    %cst_100 = arith.constant dense<0.000000e+00> : vector<8x8xf32>
    %247 = tpu.matmul %246, %245, %cst_100 {dimension_numbers = #tpu.dot_dimension_numbers<[1], [0], [0], [1], [0, 0, 1, 1], [], []>} : vector<8x8xbf16>, vector<8x8xbf16>, vector<8x8xf32> -> vector<8x8xf32>
    %248 = vector.extract_strided_slice %187 {offsets = [0, 24], sizes = [8, 8], strides = [1, 1]} : vector<8x32xbf16> to vector<8x8xbf16>
    %249 = vector.extract_strided_slice %188 {offsets = [0, 24], sizes = [8, 8], strides = [1, 1]} : vector<8x32xbf16> to vector<8x8xbf16>
    %cst_101 = arith.constant dense<0.000000e+00> : vector<8x8xf32>
    %250 = tpu.matmul %248, %249, %cst_101 {dimension_numbers = #tpu.dot_dimension_numbers<[1], [1], [0], [0], [0, 0, 1, 0], [], []>} : vector<8x8xbf16>, vector<8x8xbf16>, vector<8x8xf32> -> vector<8x8xf32>
    %251 = vector.broadcast %193 : vector<1x8xf32> to vector<8x8xf32>
    %252 = arith.addf %250, %251 : vector<8x8xf32>
    %cst_102 = arith.constant dense<0xFF800000> : vector<8xf32>
    %253 = vector.multi_reduction <maximumf>, %252, %cst_102 [1] : vector<8x8xf32> to vector<8xf32>
    %254 = vector.shape_cast %253 : vector<8xf32> to vector<8x1xf32>
    %255 = vector.broadcast %254 : vector<8x1xf32> to vector<8x8xf32>
    %256 = arith.subf %252, %255 : vector<8x8xf32>
    %257 = math.exp %256 : vector<8x8xf32>
    %cst_103 = arith.constant dense<0.000000e+00> : vector<8xf32>
    %258 = vector.multi_reduction <add>, %257, %cst_103 [1] : vector<8x8xf32> to vector<8xf32>
    %259 = vector.shape_cast %258 : vector<8xf32> to vector<8x1xf32>
    %260 = tpu.reciprocal %259 {approx = true} : vector<8x1xf32> -> vector<8x1xf32>
    %261 = vector.broadcast %260 : vector<8x1xf32> to vector<8x8xf32>
    %262 = arith.mulf %257, %261 : vector<8x8xf32>
    %263 = vector.extract_strided_slice %189 {offsets = [0, 24], sizes = [8, 8], strides = [1, 1]} : vector<8x32xbf16> to vector<8x8xbf16>
    %264 = arith.truncf %262 : vector<8x8xf32> to vector<8x8xbf16>
    %cst_104 = arith.constant dense<0.000000e+00> : vector<8x8xf32>
    %265 = tpu.matmul %264, %263, %cst_104 {dimension_numbers = #tpu.dot_dimension_numbers<[1], [0], [0], [1], [0, 0, 1, 1], [], []>} : vector<8x8xbf16>, vector<8x8xbf16>, vector<8x8xf32> -> vector<8x8xf32>
    %266 = tpu.concatenate %211, %229, %247, %265 in 1 : vector<8x8xf32>, vector<8x8xf32>, vector<8x8xf32>, vector<8x8xf32> -> vector<8x32xf32>
    %267 = arith.truncf %266 : vector<8x32xf32> to vector<8x32xbf16>
    %268 = arith.truncf %182 : vector<32x32xf32> to vector<32x32xbf16>
    %cst_105 = arith.constant dense<0.000000e+00> : vector<8x32xf32>
    %269 = tpu.matmul %267, %268, %cst_105 {dimension_numbers = #tpu.dot_dimension_numbers<[1], [0], [0], [1], [0, 0, 1, 1], [], []>} : vector<8x32xbf16>, vector<32x32xbf16>, vector<8x32xf32> -> vector<8x32xf32>
    %270 = vector.broadcast %184 : vector<1x32xf32> to vector<8x32xf32>
    %271 = arith.addf %269, %270 : vector<8x32xf32>
    %272 = arith.addf %135, %271 : vector<8x32xf32>
    %c0_106 = arith.constant 0 : index
    %c0_107 = arith.constant 0 : index
    %c0_108 = arith.constant 0 : index
    %273 = vector.load %arg20[%c0_106, %c0_107, %c0_108] : memref<1x1x32xf32, #tpu.memory_space<vmem>>, vector<1x1x32xf32>
    %274 = vector.shape_cast %273 : vector<1x1x32xf32> to vector<1x32xf32>
    %c0_109 = arith.constant 0 : index
    %c0_110 = arith.constant 0 : index
    %c0_111 = arith.constant 0 : index
    %275 = vector.load %arg21[%c0_109, %c0_110, %c0_111] : memref<1x1x32xf32, #tpu.memory_space<vmem>>, vector<1x1x32xf32>
    %276 = vector.shape_cast %275 : vector<1x1x32xf32> to vector<1x32xf32>
    %cst_112 = arith.constant dense<0.000000e+00> : vector<8xf32>
    %277 = vector.multi_reduction <add>, %272, %cst_112 [1] : vector<8x32xf32> to vector<8xf32>
    %278 = vector.shape_cast %277 : vector<8xf32> to vector<8x1xf32>
    %cst_113 = arith.constant 3.200000e+01 : f32
    %279 = vector.broadcast %cst_113 : f32 to vector<8x1xf32>
    %280 = arith.divf %278, %279 : vector<8x1xf32>
    %281 = vector.broadcast %280 : vector<8x1xf32> to vector<8x32xf32>
    %282 = arith.subf %272, %281 : vector<8x32xf32>
    %283 = arith.mulf %282, %282 : vector<8x32xf32>
    %cst_114 = arith.constant dense<0.000000e+00> : vector<8xf32>
    %284 = vector.multi_reduction <add>, %283, %cst_114 [1] : vector<8x32xf32> to vector<8xf32>
    %285 = vector.shape_cast %284 : vector<8xf32> to vector<8x1xf32>
    %cst_115 = arith.constant 3.100000e+01 : f32
    %286 = vector.broadcast %cst_115 : f32 to vector<8x1xf32>
    %287 = arith.divf %285, %286 : vector<8x1xf32>
    %288 = math.sqrt %287 : vector<8x1xf32>
    %289 = vector.broadcast %274 : vector<1x32xf32> to vector<8x32xf32>
    %290 = arith.mulf %289, %282 : vector<8x32xf32>
    %cst_116 = arith.constant 9.99999997E-7 : f32
    %291 = vector.broadcast %cst_116 : f32 to vector<8x1xf32>
    %292 = arith.addf %288, %291 : vector<8x1xf32>
    %293 = tpu.reciprocal %292 {approx = true} : vector<8x1xf32> -> vector<8x1xf32>
    %294 = vector.broadcast %293 : vector<8x1xf32> to vector<8x32xf32>
    %295 = arith.mulf %290, %294 : vector<8x32xf32>
    %296 = vector.broadcast %276 : vector<1x32xf32> to vector<8x32xf32>
    %297 = arith.addf %295, %296 : vector<8x32xf32>
    %c0_117 = arith.constant 0 : index
    %c0_118 = arith.constant 0 : index
    %c0_119 = arith.constant 0 : index
    %298 = vector.load %arg22[%c0_117, %c0_118, %c0_119] : memref<1x32x64xf32, #tpu.memory_space<vmem>>, vector<1x32x64xf32>
    %299 = vector.shape_cast %298 : vector<1x32x64xf32> to vector<32x64xf32>
    %c0_120 = arith.constant 0 : index
    %c0_121 = arith.constant 0 : index
    %c0_122 = arith.constant 0 : index
    %300 = vector.load %arg23[%c0_120, %c0_121, %c0_122] : memref<1x1x64xf32, #tpu.memory_space<vmem>>, vector<1x1x64xf32>
    %301 = vector.shape_cast %300 : vector<1x1x64xf32> to vector<1x64xf32>
    %c0_123 = arith.constant 0 : index
    %c0_124 = arith.constant 0 : index
    %c0_125 = arith.constant 0 : index
    %302 = vector.load %arg24[%c0_123, %c0_124, %c0_125] : memref<1x64x32xf32, #tpu.memory_space<vmem>>, vector<1x64x32xf32>
    %303 = vector.shape_cast %302 : vector<1x64x32xf32> to vector<64x32xf32>
    %c0_126 = arith.constant 0 : index
    %c0_127 = arith.constant 0 : index
    %c0_128 = arith.constant 0 : index
    %304 = vector.load %arg25[%c0_126, %c0_127, %c0_128] : memref<1x1x32xf32, #tpu.memory_space<vmem>>, vector<1x1x32xf32>
    %305 = vector.shape_cast %304 : vector<1x1x32xf32> to vector<1x32xf32>
    %306 = arith.truncf %297 : vector<8x32xf32> to vector<8x32xbf16>
    %307 = arith.truncf %299 : vector<32x64xf32> to vector<32x64xbf16>
    %cst_129 = arith.constant dense<0.000000e+00> : vector<8x64xf32>
    %308 = tpu.matmul %306, %307, %cst_129 {dimension_numbers = #tpu.dot_dimension_numbers<[1], [0], [0], [1], [0, 0, 1, 1], [], []>} : vector<8x32xbf16>, vector<32x64xbf16>, vector<8x64xf32> -> vector<8x64xf32>
    %309 = vector.broadcast %301 : vector<1x64xf32> to vector<8x64xf32>
    %310 = arith.addf %308, %309 : vector<8x64xf32>
    %cst_130 = arith.constant 0.000000e+00 : f32
    %311 = vector.broadcast %cst_130 : f32 to vector<8x64xf32>
    %312 = arith.maximumf %310, %311 : vector<8x64xf32>
    %313 = arith.truncf %312 : vector<8x64xf32> to vector<8x64xbf16>
    %314 = arith.truncf %303 : vector<64x32xf32> to vector<64x32xbf16>
    %cst_131 = arith.constant dense<0.000000e+00> : vector<8x32xf32>
    %315 = tpu.matmul %313, %314, %cst_131 {dimension_numbers = #tpu.dot_dimension_numbers<[1], [0], [0], [1], [0, 0, 1, 1], [], []>} : vector<8x64xbf16>, vector<64x32xbf16>, vector<8x32xf32> -> vector<8x32xf32>
    %316 = vector.broadcast %305 : vector<1x32xf32> to vector<8x32xf32>
    %317 = arith.addf %315, %316 : vector<8x32xf32>
    %318 = arith.addf %272, %317 : vector<8x32xf32>
    %c0_132 = arith.constant 0 : index
    %c0_133 = arith.constant 0 : index
    %c0_134 = arith.constant 0 : index
    %319 = vector.load %arg28[%c0_132, %c0_133, %c0_134] : memref<1x8x32xf32, #tpu.memory_space<vmem>>, vector<1x8x32xf32>
    %320 = vector.shape_cast %319 : vector<1x8x32xf32> to vector<8x32xf32>
    %321 = vector.shape_cast %318 : vector<8x32xf32> to vector<1x8x32xf32>
    tpu.vector_store %arg28[%c0_132, %c0_133, %c0_134], %321 {strides = array<i32>} : memref<1x8x32xf32, #tpu.memory_space<vmem>>, vector<1x8x32xf32>,
    %c1_i32 = arith.constant 1 : i32
    %322 = arith.cmpi eq, %arg1, %c1_i32 : i32
    %323 = arith.extui %322 : i1 to i32
    %c0_i32_135 = arith.constant 0 : i32
    %324 = arith.cmpi ne, %323, %c0_i32_135 : i32
    scf.if %324 {
      %c0_136 = arith.constant 0 : index
      %c0_137 = arith.constant 0 : index
      %c0_138 = arith.constant 0 : index
      %325 = vector.load %arg28[%c0_136, %c0_137, %c0_138] : memref<1x8x32xf32, #tpu.memory_space<vmem>>, vector<1x8x32xf32>
      %326 = vector.shape_cast %325 : vector<1x8x32xf32> to vector<8x32xf32>
      %c0_139 = arith.constant 0 : index
      %c0_140 = arith.constant 0 : index
      %327 = vector.load %arg26[%c0_139, %c0_140] : memref<1x32xf32, #tpu.memory_space<vmem>>, vector<1x32xf32>
      %c0_141 = arith.constant 0 : index
      %c0_142 = arith.constant 0 : index
      %328 = vector.load %arg27[%c0_141, %c0_142] : memref<1x32xf32, #tpu.memory_space<vmem>>, vector<1x32xf32>
      %cst_143 = arith.constant dense<0.000000e+00> : vector<8xf32>
      %329 = vector.multi_reduction <add>, %326, %cst_143 [1] : vector<8x32xf32> to vector<8xf32>
      %330 = vector.shape_cast %329 : vector<8xf32> to vector<8x1xf32>
      %cst_144 = arith.constant 3.200000e+01 : f32
      %331 = vector.broadcast %cst_144 : f32 to vector<8x1xf32>
      %332 = arith.divf %330, %331 : vector<8x1xf32>
      %333 = vector.broadcast %332 : vector<8x1xf32> to vector<8x32xf32>
      %334 = arith.subf %326, %333 : vector<8x32xf32>
      %335 = arith.mulf %334, %334 : vector<8x32xf32>
      %cst_145 = arith.constant dense<0.000000e+00> : vector<8xf32>
      %336 = vector.multi_reduction <add>, %335, %cst_145 [1] : vector<8x32xf32> to vector<8xf32>
      %337 = vector.shape_cast %336 : vector<8xf32> to vector<8x1xf32>
      %cst_146 = arith.constant 3.100000e+01 : f32
      %338 = vector.broadcast %cst_146 : f32 to vector<8x1xf32>
      %339 = arith.divf %337, %338 : vector<8x1xf32>
      %340 = math.sqrt %339 : vector<8x1xf32>
      %341 = vector.broadcast %327 : vector<1x32xf32> to vector<8x32xf32>
      %342 = arith.mulf %341, %334 : vector<8x32xf32>
      %cst_147 = arith.constant 9.99999997E-7 : f32
      %343 = vector.broadcast %cst_147 : f32 to vector<8x1xf32>
      %344 = arith.addf %340, %343 : vector<8x1xf32>
      %345 = tpu.reciprocal %344 {approx = true} : vector<8x1xf32> -> vector<8x1xf32>
      %346 = vector.broadcast %345 : vector<8x1xf32> to vector<8x32xf32>
      %347 = arith.mulf %342, %346 : vector<8x32xf32>
      %348 = vector.broadcast %328 : vector<1x32xf32> to vector<8x32xf32>
      %349 = arith.addf %347, %348 : vector<8x32xf32>
      %c0_148 = arith.constant 0 : index
      %c0_149 = arith.constant 0 : index
      %c0_150 = arith.constant 0 : index
      %350 = vector.load %arg28[%c0_148, %c0_149, %c0_150] : memref<1x8x32xf32, #tpu.memory_space<vmem>>, vector<1x8x32xf32>
      %351 = vector.shape_cast %350 : vector<1x8x32xf32> to vector<8x32xf32>
      %352 = vector.shape_cast %349 : vector<8x32xf32> to vector<1x8x32xf32>
      tpu.vector_store %arg28[%c0_148, %c0_149, %c0_150], %352 {strides = array<i32>} : memref<1x8x32xf32, #tpu.memory_space<vmem>>, vector<1x8x32xf32>,
    } else {
    }
    return
  }
  func.func @transform_0(%arg0: i32, %arg1: i32) -> (i32, i32, i32) {
    %c0_i32 = arith.constant 0 : i32
    %c0_i32_0 = arith.constant 0 : i32
    %c0_i32_1 = arith.constant 0 : i32
    return %arg0, %c0_i32, %c0_i32_0 : i32, i32, i32
  }
  func.func @transform_1(%arg0: i32, %arg1: i32) -> (i32, i32, i32) {
    %c0_i32 = arith.constant 0 : i32
    %c0_i32_0 = arith.constant 0 : i32
    %c0_i32_1 = arith.constant 0 : i32
    return %arg0, %c0_i32, %c0_i32_0 : i32, i32, i32
  }
  func.func @transform_2(%arg0: i32, %arg1: i32) -> (i32, i32, i32) {
    %c0_i32 = arith.constant 0 : i32
    %c0_i32_0 = arith.constant 0 : i32
    %c0_i32_1 = arith.constant 0 : i32
    return %arg0, %c0_i32, %c0_i32_0 : i32, i32, i32
  }
  func.func @transform_3(%arg0: i32, %arg1: i32) -> (i32, i32, i32) {
    %c0_i32 = arith.constant 0 : i32
    %c0_i32_0 = arith.constant 0 : i32
    %c0_i32_1 = arith.constant 0 : i32
    return %arg0, %c0_i32, %c0_i32_0 : i32, i32, i32
  }
  func.func @transform_4(%arg0: i32, %arg1: i32) -> (i32, i32, i32) {
    %c0_i32 = arith.constant 0 : i32
    %c0_i32_0 = arith.constant 0 : i32
    %c0_i32_1 = arith.constant 0 : i32
    return %arg1, %c0_i32, %c0_i32_0 : i32, i32, i32
  }
  func.func @transform_5(%arg0: i32, %arg1: i32) -> (i32, i32, i32) {
    %c0_i32 = arith.constant 0 : i32
    %c0_i32_0 = arith.constant 0 : i32
    %c0_i32_1 = arith.constant 0 : i32
    return %arg1, %c0_i32, %c0_i32_0 : i32, i32, i32
  }
  func.func @transform_6(%arg0: i32, %arg1: i32) -> (i32, i32, i32) {
    %c0_i32 = arith.constant 0 : i32
    %c0_i32_0 = arith.constant 0 : i32
    %c0_i32_1 = arith.constant 0 : i32
    return %arg1, %c0_i32, %c0_i32_0 : i32, i32, i32
  }
  func.func @transform_7(%arg0: i32, %arg1: i32) -> (i32, i32, i32) {
    %c0_i32 = arith.constant 0 : i32
    %c0_i32_0 = arith.constant 0 : i32
    %c0_i32_1 = arith.constant 0 : i32
    return %arg1, %c0_i32, %c0_i32_0 : i32, i32, i32
  }
  func.func @transform_8(%arg0: i32, %arg1: i32) -> (i32, i32, i32) {
    %c0_i32 = arith.constant 0 : i32
    %c0_i32_0 = arith.constant 0 : i32
    %c0_i32_1 = arith.constant 0 : i32
    return %arg1, %c0_i32, %c0_i32_0 : i32, i32, i32
  }
  func.func @transform_9(%arg0: i32, %arg1: i32) -> (i32, i32, i32) {
    %c0_i32 = arith.constant 0 : i32
    %c0_i32_0 = arith.constant 0 : i32
    %c0_i32_1 = arith.constant 0 : i32
    return %arg1, %c0_i32, %c0_i32_0 : i32, i32, i32
  }
  func.func @transform_10(%arg0: i32, %arg1: i32) -> (i32, i32, i32) {
    %c0_i32 = arith.constant 0 : i32
    %c0_i32_0 = arith.constant 0 : i32
    %c0_i32_1 = arith.constant 0 : i32
    return %arg1, %c0_i32, %c0_i32_0 : i32, i32, i32
  }
  func.func @transform_11(%arg0: i32, %arg1: i32) -> (i32, i32, i32) {
    %c0_i32 = arith.constant 0 : i32
    %c0_i32_0 = arith.constant 0 : i32
    %c0_i32_1 = arith.constant 0 : i32
    return %arg1, %c0_i32, %c0_i32_0 : i32, i32, i32
  }
  func.func @transform_12(%arg0: i32, %arg1: i32) -> (i32, i32, i32) {
    %c0_i32 = arith.constant 0 : i32
    %c0_i32_0 = arith.constant 0 : i32
    %c0_i32_1 = arith.constant 0 : i32
    return %arg1, %c0_i32, %c0_i32_0 : i32, i32, i32
  }
  func.func @transform_13(%arg0: i32, %arg1: i32) -> (i32, i32, i32) {
    %c0_i32 = arith.constant 0 : i32
    %c0_i32_0 = arith.constant 0 : i32
    %c0_i32_1 = arith.constant 0 : i32
    return %arg1, %c0_i32, %c0_i32_0 : i32, i32, i32
  }
  func.func @transform_14(%arg0: i32, %arg1: i32) -> (i32, i32, i32) {
    %c0_i32 = arith.constant 0 : i32
    %c0_i32_0 = arith.constant 0 : i32
    %c0_i32_1 = arith.constant 0 : i32
    return %arg1, %c0_i32, %c0_i32_0 : i32, i32, i32
  }
  func.func @transform_15(%arg0: i32, %arg1: i32) -> (i32, i32, i32) {
    %c0_i32 = arith.constant 0 : i32
    %c0_i32_0 = arith.constant 0 : i32
    %c0_i32_1 = arith.constant 0 : i32
    return %arg1, %c0_i32, %c0_i32_0 : i32, i32, i32
  }
  func.func @transform_16(%arg0: i32, %arg1: i32) -> (i32, i32, i32) {
    %c0_i32 = arith.constant 0 : i32
    %c0_i32_0 = arith.constant 0 : i32
    %c0_i32_1 = arith.constant 0 : i32
    return %arg1, %c0_i32, %c0_i32_0 : i32, i32, i32
  }
  func.func @transform_17(%arg0: i32, %arg1: i32) -> (i32, i32, i32) {
    %c0_i32 = arith.constant 0 : i32
    %c0_i32_0 = arith.constant 0 : i32
    %c0_i32_1 = arith.constant 0 : i32
    return %arg1, %c0_i32, %c0_i32_0 : i32, i32, i32
  }
  func.func @transform_18(%arg0: i32, %arg1: i32) -> (i32, i32, i32) {
    %c0_i32 = arith.constant 0 : i32
    %c0_i32_0 = arith.constant 0 : i32
    %c0_i32_1 = arith.constant 0 : i32
    return %arg1, %c0_i32, %c0_i32_0 : i32, i32, i32
  }
  func.func @transform_19(%arg0: i32, %arg1: i32) -> (i32, i32, i32) {
    %c0_i32 = arith.constant 0 : i32
    %c0_i32_0 = arith.constant 0 : i32
    %c0_i32_1 = arith.constant 0 : i32
    return %arg1, %c0_i32, %c0_i32_0 : i32, i32, i32
  }
  func.func @transform_20(%arg0: i32, %arg1: i32) -> (i32, i32, i32) {
    %c0_i32 = arith.constant 0 : i32
    %c0_i32_0 = arith.constant 0 : i32
    %c0_i32_1 = arith.constant 0 : i32
    return %arg1, %c0_i32, %c0_i32_0 : i32, i32, i32
  }
  func.func @transform_21(%arg0: i32, %arg1: i32) -> (i32, i32, i32) {
    %c0_i32 = arith.constant 0 : i32
    %c0_i32_0 = arith.constant 0 : i32
    %c0_i32_1 = arith.constant 0 : i32
    return %arg1, %c0_i32, %c0_i32_0 : i32, i32, i32
  }
  func.func @transform_22(%arg0: i32, %arg1: i32) -> (i32, i32, i32) {
    %c0_i32 = arith.constant 0 : i32
    %c0_i32_0 = arith.constant 0 : i32
    %c0_i32_1 = arith.constant 0 : i32
    return %arg1, %c0_i32, %c0_i32_0 : i32, i32, i32
  }
  func.func @transform_23(%arg0: i32, %arg1: i32) -> (i32, i32, i32) {
    %c0_i32 = arith.constant 0 : i32
    %c0_i32_0 = arith.constant 0 : i32
    %c0_i32_1 = arith.constant 0 : i32
    return %arg1, %c0_i32, %c0_i32_0 : i32, i32, i32
  }
  func.func @transform_24(%arg0: i32, %arg1: i32) -> (i32, i32) {
    %c0_i32 = arith.constant 0 : i32
    %c0_i32_0 = arith.constant 0 : i32
    %c0_i32_1 = arith.constant 0 : i32
    return %c0_i32, %c0_i32_0 : i32, i32
  }
  func.func @transform_25(%arg0: i32, %arg1: i32) -> (i32, i32) {
    %c0_i32 = arith.constant 0 : i32
    %c0_i32_0 = arith.constant 0 : i32
    %c0_i32_1 = arith.constant 0 : i32
    return %c0_i32, %c0_i32_0 : i32, i32
  }
  func.func @transform_26(%arg0: i32, %arg1: i32) -> (i32, i32, i32) {
    %c0_i32 = arith.constant 0 : i32
    %c0_i32_0 = arith.constant 0 : i32
    %c0_i32_1 = arith.constant 0 : i32
    return %arg0, %c0_i32, %c0_i32_0 : i32, i32, i32
  }
}

module attributes {stable_mosaic.version = 11 : i64} {
  func.func @_encoder_stack_kernel(%arg0: i32, %arg1: i32, %arg2: memref<1x8x32xf32, #tpu.memory_space<vmem>>, %arg3: memref<1x1x8xf32, #tpu.memory_space<vmem>>, %arg4: memref<1x1x32xf32, #tpu.memory_space<vmem>>, %arg5: memref<1x1x32xf32, #tpu.memory_space<vmem>>, %arg6: memref<1x32x96xf32, #tpu.memory_space<vmem>>, %arg7: memref<1x1x96xf32, #tpu.memory_space<vmem>>, %arg8: memref<1x32x32xf32, #tpu.memory_space<vmem>>, %arg9: memref<1x1x32xf32, #tpu.memory_space<vmem>>, %arg10: memref<1x1x32xf32, #tpu.memory_space<vmem>>, %arg11: memref<1x1x32xf32, #tpu.memory_space<vmem>>, %arg12: memref<1x32x64xf32, #tpu.memory_space<vmem>>, %arg13: memref<1x1x64xf32, #tpu.memory_space<vmem>>, %arg14: memref<1x64x32xf32, #tpu.memory_space<vmem>>, %arg15: memref<1x1x32xf32, #tpu.memory_space<vmem>>, %arg16: memref<1x32xf32, #tpu.memory_space<vmem>>, %arg17: memref<1x32xf32, #tpu.memory_space<vmem>>, %arg18: memref<1x8x32xf32, #tpu.memory_space<vmem>>) attributes {dimension_semantics = [#tpu.dimension_semantics<parallel>, #tpu.dimension_semantics<arbitrary>], iteration_bounds = array<i64: 2, 2>, scalar_prefetch = 0 : i64, scratch_operands = 0 : i64, tpu.core_type = #tpu.core_type<tc>, window_params = [{transform_indices = @transform_0, window_bounds = array<i64: 1, 8, 32>}, {transform_indices = @transform_1, window_bounds = array<i64: 1, 1, 8>}, {transform_indices = @transform_2, window_bounds = array<i64: 1, 1, 32>}, {transform_indices = @transform_3, window_bounds = array<i64: 1, 1, 32>}, {transform_indices = @transform_4, window_bounds = array<i64: 1, 32, 96>}, {transform_indices = @transform_5, window_bounds = array<i64: 1, 1, 96>}, {transform_indices = @transform_6, window_bounds = array<i64: 1, 32, 32>}, {transform_indices = @transform_7, window_bounds = array<i64: 1, 1, 32>}, {transform_indices = @transform_8, window_bounds = array<i64: 1, 1, 32>}, {transform_indices = @transform_9, window_bounds = array<i64: 1, 1, 32>}, {transform_indices = @transform_10, window_bounds = array<i64: 1, 32, 64>}, {transform_indices = @transform_11, window_bounds = array<i64: 1, 1, 64>}, {transform_indices = @transform_12, window_bounds = array<i64: 1, 64, 32>}, {transform_indices = @transform_13, window_bounds = array<i64: 1, 1, 32>}, {pipeline_mode = #tpu.pipeline_mode<synchronous>, transform_indices = @transform_14, window_bounds = array<i64: 1, 32>}, {pipeline_mode = #tpu.pipeline_mode<synchronous>, transform_indices = @transform_15, window_bounds = array<i64: 1, 32>}, {transform_indices = @transform_16, window_bounds = array<i64: 1, 8, 32>}]} {
    %c0_i32 = arith.constant 0 : i32
    %0 = arith.cmpi eq, %arg1, %c0_i32 : i32
    %1 = arith.extui %0 : i1 to i32
    %c0_i32_0 = arith.constant 0 : i32
    %2 = arith.cmpi ne, %1, %c0_i32_0 : i32
    scf.if %2 {
      %c0_79 = arith.constant 0 : index
      %c0_80 = arith.constant 0 : index
      %c0_81 = arith.constant 0 : index
      %188 = vector.load %arg2[%c0_79, %c0_80, %c0_81] : memref<1x8x32xf32, #tpu.memory_space<vmem>>, vector<1x8x32xf32>
      %c0_82 = arith.constant 0 : index
      %c0_83 = arith.constant 0 : index
      %c0_84 = arith.constant 0 : index
      %189 = vector.load %arg18[%c0_82, %c0_83, %c0_84] : memref<1x8x32xf32, #tpu.memory_space<vmem>>, vector<1x8x32xf32>
      tpu.vector_store %arg18[%c0_82, %c0_83, %c0_84], %188 {strides = array<i32>} : memref<1x8x32xf32, #tpu.memory_space<vmem>>, vector<1x8x32xf32>,
    } else {
    }
    %c0 = arith.constant 0 : index
    %c0_1 = arith.constant 0 : index
    %c0_2 = arith.constant 0 : index
    %3 = vector.load %arg18[%c0, %c0_1, %c0_2] : memref<1x8x32xf32, #tpu.memory_space<vmem>>, vector<1x8x32xf32>
    %4 = vector.shape_cast %3 : vector<1x8x32xf32> to vector<8x32xf32>
    %c0_3 = arith.constant 0 : index
    %c0_4 = arith.constant 0 : index
    %c0_5 = arith.constant 0 : index
    %5 = vector.load %arg3[%c0_3, %c0_4, %c0_5] : memref<1x1x8xf32, #tpu.memory_space<vmem>>, vector<1x1x8xf32>
    %6 = vector.shape_cast %5 : vector<1x1x8xf32> to vector<1x8xf32>
    %c0_6 = arith.constant 0 : index
    %c0_7 = arith.constant 0 : index
    %c0_8 = arith.constant 0 : index
    %7 = vector.load %arg4[%c0_6, %c0_7, %c0_8] : memref<1x1x32xf32, #tpu.memory_space<vmem>>, vector<1x1x32xf32>
    %8 = vector.shape_cast %7 : vector<1x1x32xf32> to vector<1x32xf32>
    %c0_9 = arith.constant 0 : index
    %c0_10 = arith.constant 0 : index
    %c0_11 = arith.constant 0 : index
    %9 = vector.load %arg5[%c0_9, %c0_10, %c0_11] : memref<1x1x32xf32, #tpu.memory_space<vmem>>, vector<1x1x32xf32>
    %10 = vector.shape_cast %9 : vector<1x1x32xf32> to vector<1x32xf32>
    %cst = arith.constant dense<0.000000e+00> : vector<8xf32>
    %11 = vector.multi_reduction <add>, %4, %cst [1] : vector<8x32xf32> to vector<8xf32>
    %12 = vector.shape_cast %11 : vector<8xf32> to vector<8x1xf32>
    %cst_12 = arith.constant 3.200000e+01 : f32
    %13 = vector.broadcast %cst_12 : f32 to vector<8x1xf32>
    %14 = arith.divf %12, %13 : vector<8x1xf32>
    %15 = vector.broadcast %14 : vector<8x1xf32> to vector<8x32xf32>
    %16 = arith.subf %4, %15 : vector<8x32xf32>
    %17 = arith.mulf %16, %16 : vector<8x32xf32>
    %cst_13 = arith.constant dense<0.000000e+00> : vector<8xf32>
    %18 = vector.multi_reduction <add>, %17, %cst_13 [1] : vector<8x32xf32> to vector<8xf32>
    %19 = vector.shape_cast %18 : vector<8xf32> to vector<8x1xf32>
    %cst_14 = arith.constant 3.100000e+01 : f32
    %20 = vector.broadcast %cst_14 : f32 to vector<8x1xf32>
    %21 = arith.divf %19, %20 : vector<8x1xf32>
    %22 = math.sqrt %21 : vector<8x1xf32>
    %23 = vector.broadcast %8 : vector<1x32xf32> to vector<8x32xf32>
    %24 = arith.mulf %23, %16 : vector<8x32xf32>
    %cst_15 = arith.constant 9.99999997E-7 : f32
    %25 = vector.broadcast %cst_15 : f32 to vector<8x1xf32>
    %26 = arith.addf %22, %25 : vector<8x1xf32>
    %27 = tpu.reciprocal %26 {approx = true} : vector<8x1xf32> -> vector<8x1xf32>
    %28 = vector.broadcast %27 : vector<8x1xf32> to vector<8x32xf32>
    %29 = arith.mulf %24, %28 : vector<8x32xf32>
    %30 = vector.broadcast %10 : vector<1x32xf32> to vector<8x32xf32>
    %31 = arith.addf %29, %30 : vector<8x32xf32>
    %c0_16 = arith.constant 0 : index
    %c0_17 = arith.constant 0 : index
    %c0_18 = arith.constant 0 : index
    %32 = vector.load %arg6[%c0_16, %c0_17, %c0_18] : memref<1x32x96xf32, #tpu.memory_space<vmem>>, vector<1x32x96xf32>
    %33 = vector.shape_cast %32 : vector<1x32x96xf32> to vector<32x96xf32>
    %34 = arith.truncf %31 : vector<8x32xf32> to vector<8x32xbf16>
    %35 = arith.truncf %33 : vector<32x96xf32> to vector<32x96xbf16>
    %cst_19 = arith.constant dense<0.000000e+00> : vector<8x96xf32>
    %36 = tpu.matmul %34, %35, %cst_19 {dimension_numbers = #tpu.dot_dimension_numbers<[1], [0], [0], [1], [0, 0, 1, 1], [], []>} : vector<8x32xbf16>, vector<32x96xbf16>, vector<8x96xf32> -> vector<8x96xf32>
    %c0_20 = arith.constant 0 : index
    %c0_21 = arith.constant 0 : index
    %c0_22 = arith.constant 0 : index
    %37 = vector.load %arg7[%c0_20, %c0_21, %c0_22] : memref<1x1x96xf32, #tpu.memory_space<vmem>>, vector<1x1x96xf32>
    %38 = vector.shape_cast %37 : vector<1x1x96xf32> to vector<1x96xf32>
    %39 = vector.broadcast %38 : vector<1x96xf32> to vector<8x96xf32>
    %40 = arith.addf %36, %39 : vector<8x96xf32>
    %41 = vector.extract_strided_slice %40 {offsets = [0, 0], sizes = [8, 32], strides = [1, 1]} : vector<8x96xf32> to vector<8x32xf32>
    %42 = vector.extract_strided_slice %40 {offsets = [0, 32], sizes = [8, 32], strides = [1, 1]} : vector<8x96xf32> to vector<8x32xf32>
    %43 = vector.extract_strided_slice %40 {offsets = [0, 64], sizes = [8, 32], strides = [1, 1]} : vector<8x96xf32> to vector<8x32xf32>
    %c0_23 = arith.constant 0 : index
    %c0_24 = arith.constant 0 : index
    %c0_25 = arith.constant 0 : index
    %44 = vector.load %arg8[%c0_23, %c0_24, %c0_25] : memref<1x32x32xf32, #tpu.memory_space<vmem>>, vector<1x32x32xf32>
    %45 = vector.shape_cast %44 : vector<1x32x32xf32> to vector<32x32xf32>
    %c0_26 = arith.constant 0 : index
    %c0_27 = arith.constant 0 : index
    %c0_28 = arith.constant 0 : index
    %46 = vector.load %arg9[%c0_26, %c0_27, %c0_28] : memref<1x1x32xf32, #tpu.memory_space<vmem>>, vector<1x1x32xf32>
    %47 = vector.shape_cast %46 : vector<1x1x32xf32> to vector<1x32xf32>
    %cst_29 = arith.constant 0.353553385 : f32
    %48 = vector.broadcast %cst_29 : f32 to vector<8x32xf32>
    %49 = arith.mulf %41, %48 : vector<8x32xf32>
    %50 = arith.truncf %49 : vector<8x32xf32> to vector<8x32xbf16>
    %51 = arith.truncf %42 : vector<8x32xf32> to vector<8x32xbf16>
    %52 = arith.truncf %43 : vector<8x32xf32> to vector<8x32xbf16>
    %cst_30 = arith.constant 1.000000e+00 : f32
    %53 = vector.broadcast %cst_30 : f32 to vector<1x8xf32>
    %54 = arith.subf %6, %53 : vector<1x8xf32>
    %cst_31 = arith.constant 1.000000e+09 : f32
    %55 = vector.broadcast %cst_31 : f32 to vector<1x8xf32>
    %56 = arith.mulf %54, %55 : vector<1x8xf32>
    %57 = vector.extract_strided_slice %50 {offsets = [0, 0], sizes = [8, 8], strides = [1, 1]} : vector<8x32xbf16> to vector<8x8xbf16>
    %58 = vector.extract_strided_slice %51 {offsets = [0, 0], sizes = [8, 8], strides = [1, 1]} : vector<8x32xbf16> to vector<8x8xbf16>
    %cst_32 = arith.constant dense<0.000000e+00> : vector<8x8xf32>
    %59 = tpu.matmul %57, %58, %cst_32 {dimension_numbers = #tpu.dot_dimension_numbers<[1], [1], [0], [0], [0, 0, 1, 0], [], []>} : vector<8x8xbf16>, vector<8x8xbf16>, vector<8x8xf32> -> vector<8x8xf32>
    %60 = vector.broadcast %56 : vector<1x8xf32> to vector<8x8xf32>
    %61 = arith.addf %59, %60 : vector<8x8xf32>
    %cst_33 = arith.constant dense<0xFF800000> : vector<8xf32>
    %62 = vector.multi_reduction <maximumf>, %61, %cst_33 [1] : vector<8x8xf32> to vector<8xf32>
    %63 = vector.shape_cast %62 : vector<8xf32> to vector<8x1xf32>
    %64 = vector.broadcast %63 : vector<8x1xf32> to vector<8x8xf32>
    %65 = arith.subf %61, %64 : vector<8x8xf32>
    %66 = math.exp %65 : vector<8x8xf32>
    %cst_34 = arith.constant dense<0.000000e+00> : vector<8xf32>
    %67 = vector.multi_reduction <add>, %66, %cst_34 [1] : vector<8x8xf32> to vector<8xf32>
    %68 = vector.shape_cast %67 : vector<8xf32> to vector<8x1xf32>
    %69 = tpu.reciprocal %68 {approx = true} : vector<8x1xf32> -> vector<8x1xf32>
    %70 = vector.broadcast %69 : vector<8x1xf32> to vector<8x8xf32>
    %71 = arith.mulf %66, %70 : vector<8x8xf32>
    %72 = vector.extract_strided_slice %52 {offsets = [0, 0], sizes = [8, 8], strides = [1, 1]} : vector<8x32xbf16> to vector<8x8xbf16>
    %73 = arith.truncf %71 : vector<8x8xf32> to vector<8x8xbf16>
    %cst_35 = arith.constant dense<0.000000e+00> : vector<8x8xf32>
    %74 = tpu.matmul %73, %72, %cst_35 {dimension_numbers = #tpu.dot_dimension_numbers<[1], [0], [0], [1], [0, 0, 1, 1], [], []>} : vector<8x8xbf16>, vector<8x8xbf16>, vector<8x8xf32> -> vector<8x8xf32>
    %75 = vector.extract_strided_slice %50 {offsets = [0, 8], sizes = [8, 8], strides = [1, 1]} : vector<8x32xbf16> to vector<8x8xbf16>
    %76 = vector.extract_strided_slice %51 {offsets = [0, 8], sizes = [8, 8], strides = [1, 1]} : vector<8x32xbf16> to vector<8x8xbf16>
    %cst_36 = arith.constant dense<0.000000e+00> : vector<8x8xf32>
    %77 = tpu.matmul %75, %76, %cst_36 {dimension_numbers = #tpu.dot_dimension_numbers<[1], [1], [0], [0], [0, 0, 1, 0], [], []>} : vector<8x8xbf16>, vector<8x8xbf16>, vector<8x8xf32> -> vector<8x8xf32>
    %78 = vector.broadcast %56 : vector<1x8xf32> to vector<8x8xf32>
    %79 = arith.addf %77, %78 : vector<8x8xf32>
    %cst_37 = arith.constant dense<0xFF800000> : vector<8xf32>
    %80 = vector.multi_reduction <maximumf>, %79, %cst_37 [1] : vector<8x8xf32> to vector<8xf32>
    %81 = vector.shape_cast %80 : vector<8xf32> to vector<8x1xf32>
    %82 = vector.broadcast %81 : vector<8x1xf32> to vector<8x8xf32>
    %83 = arith.subf %79, %82 : vector<8x8xf32>
    %84 = math.exp %83 : vector<8x8xf32>
    %cst_38 = arith.constant dense<0.000000e+00> : vector<8xf32>
    %85 = vector.multi_reduction <add>, %84, %cst_38 [1] : vector<8x8xf32> to vector<8xf32>
    %86 = vector.shape_cast %85 : vector<8xf32> to vector<8x1xf32>
    %87 = tpu.reciprocal %86 {approx = true} : vector<8x1xf32> -> vector<8x1xf32>
    %88 = vector.broadcast %87 : vector<8x1xf32> to vector<8x8xf32>
    %89 = arith.mulf %84, %88 : vector<8x8xf32>
    %90 = vector.extract_strided_slice %52 {offsets = [0, 8], sizes = [8, 8], strides = [1, 1]} : vector<8x32xbf16> to vector<8x8xbf16>
    %91 = arith.truncf %89 : vector<8x8xf32> to vector<8x8xbf16>
    %cst_39 = arith.constant dense<0.000000e+00> : vector<8x8xf32>
    %92 = tpu.matmul %91, %90, %cst_39 {dimension_numbers = #tpu.dot_dimension_numbers<[1], [0], [0], [1], [0, 0, 1, 1], [], []>} : vector<8x8xbf16>, vector<8x8xbf16>, vector<8x8xf32> -> vector<8x8xf32>
    %93 = vector.extract_strided_slice %50 {offsets = [0, 16], sizes = [8, 8], strides = [1, 1]} : vector<8x32xbf16> to vector<8x8xbf16>
    %94 = vector.extract_strided_slice %51 {offsets = [0, 16], sizes = [8, 8], strides = [1, 1]} : vector<8x32xbf16> to vector<8x8xbf16>
    %cst_40 = arith.constant dense<0.000000e+00> : vector<8x8xf32>
    %95 = tpu.matmul %93, %94, %cst_40 {dimension_numbers = #tpu.dot_dimension_numbers<[1], [1], [0], [0], [0, 0, 1, 0], [], []>} : vector<8x8xbf16>, vector<8x8xbf16>, vector<8x8xf32> -> vector<8x8xf32>
    %96 = vector.broadcast %56 : vector<1x8xf32> to vector<8x8xf32>
    %97 = arith.addf %95, %96 : vector<8x8xf32>
    %cst_41 = arith.constant dense<0xFF800000> : vector<8xf32>
    %98 = vector.multi_reduction <maximumf>, %97, %cst_41 [1] : vector<8x8xf32> to vector<8xf32>
    %99 = vector.shape_cast %98 : vector<8xf32> to vector<8x1xf32>
    %100 = vector.broadcast %99 : vector<8x1xf32> to vector<8x8xf32>
    %101 = arith.subf %97, %100 : vector<8x8xf32>
    %102 = math.exp %101 : vector<8x8xf32>
    %cst_42 = arith.constant dense<0.000000e+00> : vector<8xf32>
    %103 = vector.multi_reduction <add>, %102, %cst_42 [1] : vector<8x8xf32> to vector<8xf32>
    %104 = vector.shape_cast %103 : vector<8xf32> to vector<8x1xf32>
    %105 = tpu.reciprocal %104 {approx = true} : vector<8x1xf32> -> vector<8x1xf32>
    %106 = vector.broadcast %105 : vector<8x1xf32> to vector<8x8xf32>
    %107 = arith.mulf %102, %106 : vector<8x8xf32>
    %108 = vector.extract_strided_slice %52 {offsets = [0, 16], sizes = [8, 8], strides = [1, 1]} : vector<8x32xbf16> to vector<8x8xbf16>
    %109 = arith.truncf %107 : vector<8x8xf32> to vector<8x8xbf16>
    %cst_43 = arith.constant dense<0.000000e+00> : vector<8x8xf32>
    %110 = tpu.matmul %109, %108, %cst_43 {dimension_numbers = #tpu.dot_dimension_numbers<[1], [0], [0], [1], [0, 0, 1, 1], [], []>} : vector<8x8xbf16>, vector<8x8xbf16>, vector<8x8xf32> -> vector<8x8xf32>
    %111 = vector.extract_strided_slice %50 {offsets = [0, 24], sizes = [8, 8], strides = [1, 1]} : vector<8x32xbf16> to vector<8x8xbf16>
    %112 = vector.extract_strided_slice %51 {offsets = [0, 24], sizes = [8, 8], strides = [1, 1]} : vector<8x32xbf16> to vector<8x8xbf16>
    %cst_44 = arith.constant dense<0.000000e+00> : vector<8x8xf32>
    %113 = tpu.matmul %111, %112, %cst_44 {dimension_numbers = #tpu.dot_dimension_numbers<[1], [1], [0], [0], [0, 0, 1, 0], [], []>} : vector<8x8xbf16>, vector<8x8xbf16>, vector<8x8xf32> -> vector<8x8xf32>
    %114 = vector.broadcast %56 : vector<1x8xf32> to vector<8x8xf32>
    %115 = arith.addf %113, %114 : vector<8x8xf32>
    %cst_45 = arith.constant dense<0xFF800000> : vector<8xf32>
    %116 = vector.multi_reduction <maximumf>, %115, %cst_45 [1] : vector<8x8xf32> to vector<8xf32>
    %117 = vector.shape_cast %116 : vector<8xf32> to vector<8x1xf32>
    %118 = vector.broadcast %117 : vector<8x1xf32> to vector<8x8xf32>
    %119 = arith.subf %115, %118 : vector<8x8xf32>
    %120 = math.exp %119 : vector<8x8xf32>
    %cst_46 = arith.constant dense<0.000000e+00> : vector<8xf32>
    %121 = vector.multi_reduction <add>, %120, %cst_46 [1] : vector<8x8xf32> to vector<8xf32>
    %122 = vector.shape_cast %121 : vector<8xf32> to vector<8x1xf32>
    %123 = tpu.reciprocal %122 {approx = true} : vector<8x1xf32> -> vector<8x1xf32>
    %124 = vector.broadcast %123 : vector<8x1xf32> to vector<8x8xf32>
    %125 = arith.mulf %120, %124 : vector<8x8xf32>
    %126 = vector.extract_strided_slice %52 {offsets = [0, 24], sizes = [8, 8], strides = [1, 1]} : vector<8x32xbf16> to vector<8x8xbf16>
    %127 = arith.truncf %125 : vector<8x8xf32> to vector<8x8xbf16>
    %cst_47 = arith.constant dense<0.000000e+00> : vector<8x8xf32>
    %128 = tpu.matmul %127, %126, %cst_47 {dimension_numbers = #tpu.dot_dimension_numbers<[1], [0], [0], [1], [0, 0, 1, 1], [], []>} : vector<8x8xbf16>, vector<8x8xbf16>, vector<8x8xf32> -> vector<8x8xf32>
    %129 = tpu.concatenate %74, %92, %110, %128 in 1 : vector<8x8xf32>, vector<8x8xf32>, vector<8x8xf32>, vector<8x8xf32> -> vector<8x32xf32>
    %130 = arith.truncf %129 : vector<8x32xf32> to vector<8x32xbf16>
    %131 = arith.truncf %45 : vector<32x32xf32> to vector<32x32xbf16>
    %cst_48 = arith.constant dense<0.000000e+00> : vector<8x32xf32>
    %132 = tpu.matmul %130, %131, %cst_48 {dimension_numbers = #tpu.dot_dimension_numbers<[1], [0], [0], [1], [0, 0, 1, 1], [], []>} : vector<8x32xbf16>, vector<32x32xbf16>, vector<8x32xf32> -> vector<8x32xf32>
    %133 = vector.broadcast %47 : vector<1x32xf32> to vector<8x32xf32>
    %134 = arith.addf %132, %133 : vector<8x32xf32>
    %135 = arith.addf %4, %134 : vector<8x32xf32>
    %c0_49 = arith.constant 0 : index
    %c0_50 = arith.constant 0 : index
    %c0_51 = arith.constant 0 : index
    %136 = vector.load %arg10[%c0_49, %c0_50, %c0_51] : memref<1x1x32xf32, #tpu.memory_space<vmem>>, vector<1x1x32xf32>
    %137 = vector.shape_cast %136 : vector<1x1x32xf32> to vector<1x32xf32>
    %c0_52 = arith.constant 0 : index
    %c0_53 = arith.constant 0 : index
    %c0_54 = arith.constant 0 : index
    %138 = vector.load %arg11[%c0_52, %c0_53, %c0_54] : memref<1x1x32xf32, #tpu.memory_space<vmem>>, vector<1x1x32xf32>
    %139 = vector.shape_cast %138 : vector<1x1x32xf32> to vector<1x32xf32>
    %cst_55 = arith.constant dense<0.000000e+00> : vector<8xf32>
    %140 = vector.multi_reduction <add>, %135, %cst_55 [1] : vector<8x32xf32> to vector<8xf32>
    %141 = vector.shape_cast %140 : vector<8xf32> to vector<8x1xf32>
    %cst_56 = arith.constant 3.200000e+01 : f32
    %142 = vector.broadcast %cst_56 : f32 to vector<8x1xf32>
    %143 = arith.divf %141, %142 : vector<8x1xf32>
    %144 = vector.broadcast %143 : vector<8x1xf32> to vector<8x32xf32>
    %145 = arith.subf %135, %144 : vector<8x32xf32>
    %146 = arith.mulf %145, %145 : vector<8x32xf32>
    %cst_57 = arith.constant dense<0.000000e+00> : vector<8xf32>
    %147 = vector.multi_reduction <add>, %146, %cst_57 [1] : vector<8x32xf32> to vector<8xf32>
    %148 = vector.shape_cast %147 : vector<8xf32> to vector<8x1xf32>
    %cst_58 = arith.constant 3.100000e+01 : f32
    %149 = vector.broadcast %cst_58 : f32 to vector<8x1xf32>
    %150 = arith.divf %148, %149 : vector<8x1xf32>
    %151 = math.sqrt %150 : vector<8x1xf32>
    %152 = vector.broadcast %137 : vector<1x32xf32> to vector<8x32xf32>
    %153 = arith.mulf %152, %145 : vector<8x32xf32>
    %cst_59 = arith.constant 9.99999997E-7 : f32
    %154 = vector.broadcast %cst_59 : f32 to vector<8x1xf32>
    %155 = arith.addf %151, %154 : vector<8x1xf32>
    %156 = tpu.reciprocal %155 {approx = true} : vector<8x1xf32> -> vector<8x1xf32>
    %157 = vector.broadcast %156 : vector<8x1xf32> to vector<8x32xf32>
    %158 = arith.mulf %153, %157 : vector<8x32xf32>
    %159 = vector.broadcast %139 : vector<1x32xf32> to vector<8x32xf32>
    %160 = arith.addf %158, %159 : vector<8x32xf32>
    %c0_60 = arith.constant 0 : index
    %c0_61 = arith.constant 0 : index
    %c0_62 = arith.constant 0 : index
    %161 = vector.load %arg12[%c0_60, %c0_61, %c0_62] : memref<1x32x64xf32, #tpu.memory_space<vmem>>, vector<1x32x64xf32>
    %162 = vector.shape_cast %161 : vector<1x32x64xf32> to vector<32x64xf32>
    %c0_63 = arith.constant 0 : index
    %c0_64 = arith.constant 0 : index
    %c0_65 = arith.constant 0 : index
    %163 = vector.load %arg13[%c0_63, %c0_64, %c0_65] : memref<1x1x64xf32, #tpu.memory_space<vmem>>, vector<1x1x64xf32>
    %164 = vector.shape_cast %163 : vector<1x1x64xf32> to vector<1x64xf32>
    %c0_66 = arith.constant 0 : index
    %c0_67 = arith.constant 0 : index
    %c0_68 = arith.constant 0 : index
    %165 = vector.load %arg14[%c0_66, %c0_67, %c0_68] : memref<1x64x32xf32, #tpu.memory_space<vmem>>, vector<1x64x32xf32>
    %166 = vector.shape_cast %165 : vector<1x64x32xf32> to vector<64x32xf32>
    %c0_69 = arith.constant 0 : index
    %c0_70 = arith.constant 0 : index
    %c0_71 = arith.constant 0 : index
    %167 = vector.load %arg15[%c0_69, %c0_70, %c0_71] : memref<1x1x32xf32, #tpu.memory_space<vmem>>, vector<1x1x32xf32>
    %168 = vector.shape_cast %167 : vector<1x1x32xf32> to vector<1x32xf32>
    %169 = arith.truncf %160 : vector<8x32xf32> to vector<8x32xbf16>
    %170 = arith.truncf %162 : vector<32x64xf32> to vector<32x64xbf16>
    %cst_72 = arith.constant dense<0.000000e+00> : vector<8x64xf32>
    %171 = tpu.matmul %169, %170, %cst_72 {dimension_numbers = #tpu.dot_dimension_numbers<[1], [0], [0], [1], [0, 0, 1, 1], [], []>} : vector<8x32xbf16>, vector<32x64xbf16>, vector<8x64xf32> -> vector<8x64xf32>
    %172 = vector.broadcast %164 : vector<1x64xf32> to vector<8x64xf32>
    %173 = arith.addf %171, %172 : vector<8x64xf32>
    %cst_73 = arith.constant 0.000000e+00 : f32
    %174 = vector.broadcast %cst_73 : f32 to vector<8x64xf32>
    %175 = arith.maximumf %173, %174 : vector<8x64xf32>
    %176 = arith.truncf %175 : vector<8x64xf32> to vector<8x64xbf16>
    %177 = arith.truncf %166 : vector<64x32xf32> to vector<64x32xbf16>
    %cst_74 = arith.constant dense<0.000000e+00> : vector<8x32xf32>
    %178 = tpu.matmul %176, %177, %cst_74 {dimension_numbers = #tpu.dot_dimension_numbers<[1], [0], [0], [1], [0, 0, 1, 1], [], []>} : vector<8x64xbf16>, vector<64x32xbf16>, vector<8x32xf32> -> vector<8x32xf32>
    %179 = vector.broadcast %168 : vector<1x32xf32> to vector<8x32xf32>
    %180 = arith.addf %178, %179 : vector<8x32xf32>
    %181 = arith.addf %135, %180 : vector<8x32xf32>
    %c0_75 = arith.constant 0 : index
    %c0_76 = arith.constant 0 : index
    %c0_77 = arith.constant 0 : index
    %182 = vector.load %arg18[%c0_75, %c0_76, %c0_77] : memref<1x8x32xf32, #tpu.memory_space<vmem>>, vector<1x8x32xf32>
    %183 = vector.shape_cast %182 : vector<1x8x32xf32> to vector<8x32xf32>
    %184 = vector.shape_cast %181 : vector<8x32xf32> to vector<1x8x32xf32>
    tpu.vector_store %arg18[%c0_75, %c0_76, %c0_77], %184 {strides = array<i32>} : memref<1x8x32xf32, #tpu.memory_space<vmem>>, vector<1x8x32xf32>,
    %c1_i32 = arith.constant 1 : i32
    %185 = arith.cmpi eq, %arg1, %c1_i32 : i32
    %186 = arith.extui %185 : i1 to i32
    %c0_i32_78 = arith.constant 0 : i32
    %187 = arith.cmpi ne, %186, %c0_i32_78 : i32
    scf.if %187 {
      %c0_79 = arith.constant 0 : index
      %c0_80 = arith.constant 0 : index
      %c0_81 = arith.constant 0 : index
      %188 = vector.load %arg18[%c0_79, %c0_80, %c0_81] : memref<1x8x32xf32, #tpu.memory_space<vmem>>, vector<1x8x32xf32>
      %189 = vector.shape_cast %188 : vector<1x8x32xf32> to vector<8x32xf32>
      %c0_82 = arith.constant 0 : index
      %c0_83 = arith.constant 0 : index
      %190 = vector.load %arg16[%c0_82, %c0_83] : memref<1x32xf32, #tpu.memory_space<vmem>>, vector<1x32xf32>
      %c0_84 = arith.constant 0 : index
      %c0_85 = arith.constant 0 : index
      %191 = vector.load %arg17[%c0_84, %c0_85] : memref<1x32xf32, #tpu.memory_space<vmem>>, vector<1x32xf32>
      %cst_86 = arith.constant dense<0.000000e+00> : vector<8xf32>
      %192 = vector.multi_reduction <add>, %189, %cst_86 [1] : vector<8x32xf32> to vector<8xf32>
      %193 = vector.shape_cast %192 : vector<8xf32> to vector<8x1xf32>
      %cst_87 = arith.constant 3.200000e+01 : f32
      %194 = vector.broadcast %cst_87 : f32 to vector<8x1xf32>
      %195 = arith.divf %193, %194 : vector<8x1xf32>
      %196 = vector.broadcast %195 : vector<8x1xf32> to vector<8x32xf32>
      %197 = arith.subf %189, %196 : vector<8x32xf32>
      %198 = arith.mulf %197, %197 : vector<8x32xf32>
      %cst_88 = arith.constant dense<0.000000e+00> : vector<8xf32>
      %199 = vector.multi_reduction <add>, %198, %cst_88 [1] : vector<8x32xf32> to vector<8xf32>
      %200 = vector.shape_cast %199 : vector<8xf32> to vector<8x1xf32>
      %cst_89 = arith.constant 3.100000e+01 : f32
      %201 = vector.broadcast %cst_89 : f32 to vector<8x1xf32>
      %202 = arith.divf %200, %201 : vector<8x1xf32>
      %203 = math.sqrt %202 : vector<8x1xf32>
      %204 = vector.broadcast %190 : vector<1x32xf32> to vector<8x32xf32>
      %205 = arith.mulf %204, %197 : vector<8x32xf32>
      %cst_90 = arith.constant 9.99999997E-7 : f32
      %206 = vector.broadcast %cst_90 : f32 to vector<8x1xf32>
      %207 = arith.addf %203, %206 : vector<8x1xf32>
      %208 = tpu.reciprocal %207 {approx = true} : vector<8x1xf32> -> vector<8x1xf32>
      %209 = vector.broadcast %208 : vector<8x1xf32> to vector<8x32xf32>
      %210 = arith.mulf %205, %209 : vector<8x32xf32>
      %211 = vector.broadcast %191 : vector<1x32xf32> to vector<8x32xf32>
      %212 = arith.addf %210, %211 : vector<8x32xf32>
      %c0_91 = arith.constant 0 : index
      %c0_92 = arith.constant 0 : index
      %c0_93 = arith.constant 0 : index
      %213 = vector.load %arg18[%c0_91, %c0_92, %c0_93] : memref<1x8x32xf32, #tpu.memory_space<vmem>>, vector<1x8x32xf32>
      %214 = vector.shape_cast %213 : vector<1x8x32xf32> to vector<8x32xf32>
      %215 = vector.shape_cast %212 : vector<8x32xf32> to vector<1x8x32xf32>
      tpu.vector_store %arg18[%c0_91, %c0_92, %c0_93], %215 {strides = array<i32>} : memref<1x8x32xf32, #tpu.memory_space<vmem>>, vector<1x8x32xf32>,
    } else {
    }
    return
  }
  func.func @transform_0(%arg0: i32, %arg1: i32) -> (i32, i32, i32) {
    %c0_i32 = arith.constant 0 : i32
    %c0_i32_0 = arith.constant 0 : i32
    %c0_i32_1 = arith.constant 0 : i32
    return %arg0, %c0_i32, %c0_i32_0 : i32, i32, i32
  }
  func.func @transform_1(%arg0: i32, %arg1: i32) -> (i32, i32, i32) {
    %c0_i32 = arith.constant 0 : i32
    %c0_i32_0 = arith.constant 0 : i32
    %c0_i32_1 = arith.constant 0 : i32
    return %arg0, %c0_i32, %c0_i32_0 : i32, i32, i32
  }
  func.func @transform_2(%arg0: i32, %arg1: i32) -> (i32, i32, i32) {
    %c0_i32 = arith.constant 0 : i32
    %c0_i32_0 = arith.constant 0 : i32
    %c0_i32_1 = arith.constant 0 : i32
    return %arg1, %c0_i32, %c0_i32_0 : i32, i32, i32
  }
  func.func @transform_3(%arg0: i32, %arg1: i32) -> (i32, i32, i32) {
    %c0_i32 = arith.constant 0 : i32
    %c0_i32_0 = arith.constant 0 : i32
    %c0_i32_1 = arith.constant 0 : i32
    return %arg1, %c0_i32, %c0_i32_0 : i32, i32, i32
  }
  func.func @transform_4(%arg0: i32, %arg1: i32) -> (i32, i32, i32) {
    %c0_i32 = arith.constant 0 : i32
    %c0_i32_0 = arith.constant 0 : i32
    %c0_i32_1 = arith.constant 0 : i32
    return %arg1, %c0_i32, %c0_i32_0 : i32, i32, i32
  }
  func.func @transform_5(%arg0: i32, %arg1: i32) -> (i32, i32, i32) {
    %c0_i32 = arith.constant 0 : i32
    %c0_i32_0 = arith.constant 0 : i32
    %c0_i32_1 = arith.constant 0 : i32
    return %arg1, %c0_i32, %c0_i32_0 : i32, i32, i32
  }
  func.func @transform_6(%arg0: i32, %arg1: i32) -> (i32, i32, i32) {
    %c0_i32 = arith.constant 0 : i32
    %c0_i32_0 = arith.constant 0 : i32
    %c0_i32_1 = arith.constant 0 : i32
    return %arg1, %c0_i32, %c0_i32_0 : i32, i32, i32
  }
  func.func @transform_7(%arg0: i32, %arg1: i32) -> (i32, i32, i32) {
    %c0_i32 = arith.constant 0 : i32
    %c0_i32_0 = arith.constant 0 : i32
    %c0_i32_1 = arith.constant 0 : i32
    return %arg1, %c0_i32, %c0_i32_0 : i32, i32, i32
  }
  func.func @transform_8(%arg0: i32, %arg1: i32) -> (i32, i32, i32) {
    %c0_i32 = arith.constant 0 : i32
    %c0_i32_0 = arith.constant 0 : i32
    %c0_i32_1 = arith.constant 0 : i32
    return %arg1, %c0_i32, %c0_i32_0 : i32, i32, i32
  }
  func.func @transform_9(%arg0: i32, %arg1: i32) -> (i32, i32, i32) {
    %c0_i32 = arith.constant 0 : i32
    %c0_i32_0 = arith.constant 0 : i32
    %c0_i32_1 = arith.constant 0 : i32
    return %arg1, %c0_i32, %c0_i32_0 : i32, i32, i32
  }
  func.func @transform_10(%arg0: i32, %arg1: i32) -> (i32, i32, i32) {
    %c0_i32 = arith.constant 0 : i32
    %c0_i32_0 = arith.constant 0 : i32
    %c0_i32_1 = arith.constant 0 : i32
    return %arg1, %c0_i32, %c0_i32_0 : i32, i32, i32
  }
  func.func @transform_11(%arg0: i32, %arg1: i32) -> (i32, i32, i32) {
    %c0_i32 = arith.constant 0 : i32
    %c0_i32_0 = arith.constant 0 : i32
    %c0_i32_1 = arith.constant 0 : i32
    return %arg1, %c0_i32, %c0_i32_0 : i32, i32, i32
  }
  func.func @transform_12(%arg0: i32, %arg1: i32) -> (i32, i32, i32) {
    %c0_i32 = arith.constant 0 : i32
    %c0_i32_0 = arith.constant 0 : i32
    %c0_i32_1 = arith.constant 0 : i32
    return %arg1, %c0_i32, %c0_i32_0 : i32, i32, i32
  }
  func.func @transform_13(%arg0: i32, %arg1: i32) -> (i32, i32, i32) {
    %c0_i32 = arith.constant 0 : i32
    %c0_i32_0 = arith.constant 0 : i32
    %c0_i32_1 = arith.constant 0 : i32
    return %arg1, %c0_i32, %c0_i32_0 : i32, i32, i32
  }
  func.func @transform_14(%arg0: i32, %arg1: i32) -> (i32, i32) {
    %c0_i32 = arith.constant 0 : i32
    %c0_i32_0 = arith.constant 0 : i32
    %c0_i32_1 = arith.constant 0 : i32
    return %c0_i32, %c0_i32_0 : i32, i32
  }
  func.func @transform_15(%arg0: i32, %arg1: i32) -> (i32, i32) {
    %c0_i32 = arith.constant 0 : i32
    %c0_i32_0 = arith.constant 0 : i32
    %c0_i32_1 = arith.constant 0 : i32
    return %c0_i32, %c0_i32_0 : i32, i32
  }
  func.func @transform_16(%arg0: i32, %arg1: i32) -> (i32, i32, i32) {
    %c0_i32 = arith.constant 0 : i32
    %c0_i32_0 = arith.constant 0 : i32
    %c0_i32_1 = arith.constant 0 : i32
    return %arg0, %c0_i32, %c0_i32_0 : i32, i32, i32
  }
}

</mosaic_0001>

<bundles_post_ra>
// kernel: encoder_decoder_forward.2
= control target key start
LH: loop header
LB: loop body
LE: loop exit
PB: predicated region body
PF: predicated region fallthrough
CT: control target
= control target key end

     0   :  { %s2149_s21 = smov 0   ;;  %s2151_s22 = smov 0   ;;  %s2445_s0 = inlined_call_operand.vmem [shape: f32[2,8,32], index: 0, kind: input, shape index: {}]   ;;  %s2446_s1 = inlined_call_operand.vmem [shape: f32[2,1,8], index: 1, kind: input, shape index: {}]   ;;  %s2447_s2 = inlined_call_operand.vmem [shape: f32[2,1,32], index: 2, kind: input, shape index: {}]   ;;  %s2448_s3 = inlined_call_operand.vmem [shape: f32[2,1,32], index: 3, kind: input, shape index: {}]   ;;  %s2449_s4 = inlined_call_operand.vmem [shape: f32[2,32,96], index: 4, kind: input, shape index: {}]   ;;  %s2450_s5 = inlined_call_operand.vmem [shape: f32[2,1,96], index: 5, kind: input, shape index: {}]   ;;  %s2451_s6 = inlined_call_operand.vmem [shape: f32[2,32,32], index: 6, kind: input, shape index: {}]   ;;  %s2452_s7 = inlined_call_operand.vmem [shape: f32[2,1,32], index: 7, kind: input, shape index: {}]   ;;  %s2453_s8 = inlined_call_operand.vmem [shape: f32[2,1,32], index: 8, kind: input, shape index: {}]   ;;  %s2454_s9 = inlined_call_operand.vmem [shape: f32[2,1,32], index: 9, kind: input, shape index: {}]   ;;  %s2455_s10 = inlined_call_operand.vmem [shape: f32[2,32,64], index: 10, kind: input, shape index: {}]   ;;  %s2456_s11 = inlined_call_operand.vmem [shape: f32[2,1,64], index: 11, kind: input, shape index: {}]   ;;  %s2457_s12 = inlined_call_operand.vmem [shape: f32[2,64,32], index: 12, kind: input, shape index: {}]   ;;  %s2458_s13 = inlined_call_operand.vmem [shape: f32[2,1,32], index: 13, kind: input, shape index: {}]   ;;  %s2459_s14 = inlined_call_operand.vmem [shape: f32[1,32], index: 14, kind: input, shape index: {}]   ;;  %s2460_s15 = inlined_call_operand.vmem [shape: f32[1,32], index: 15, kind: input, shape index: {}]   ;;  %s2461_s16 = inlined_call_operand.vmem [shape: f32[2,8,32], index: 16, kind: output, shape index: {}]  }
   0x1   :  { %2466 = sst [smem:[#allocation8_spill]] %s2445_s0  ;;  %s2153_s23 = smov 0  }
   0x2   :  { %2467 = sst [smem:[#allocation9_spill]] %s2446_s1  ;;  %s2155_s24 = smov 0  }
   0x3   :  { %2468 = sst [smem:[#allocation10_spill]] %s2449_s4  ;;  %s2157_s25 = smov 0  }
   0x4   :  { %2469 = sst [smem:[#allocation11_spill]] %s2451_s6 }
   0x5   :  { %2470 = sst [smem:[#allocation12_spill]] %s2452_s7 }
   0x6   :  { %2471 = sst [smem:[#allocation13_spill]] %s2453_s8 }
   0x7   :  { %2472 = sst [smem:[#allocation14_spill]] %s2457_s12 }
   0x8   :  { %2473 = sst [smem:[#allocation15_spill]] %s2458_s13 }
   0x9   :  { %2474 = sst [smem:[#allocation16_spill]] %s2459_s14 }
   0xa   :  { %2475 = sst [smem:[#allocation17_spill]] %s2460_s15 }
   0xb   :  { %2476 = sst [smem:[#allocation18_spill]] %s2461_s16 }
   0xc LB: > { %2477 = sst [smem:[#allocation2_spill]] %s2030_s21  ;;  %s35_s26 = sadd.s32 1, %s2038_s23  ;;  %s2046_s25 = sphi %s2157_s25, %s26_s25   ;;  %s2042_s24 = sphi %s2155_s24, %s2511_s24   ;;  %s2038_s23 = sphi %s2153_s23, %s2510_s23   ;;  %s2034_s22 = sphi %s2151_s22, %s2509_s22   ;;  %s2030_s21 = sphi %s2149_s21, %s2508_s21  }
   0xd   : > { %2478 = sst [smem:[#allocation3_spill]] %s2038_s23  ;;  %s38_s27 = sadd.s32 1, %s2042_s24 }
   0xe   : > { %2479 = sst [smem:[#allocation4_spill]] %s2042_s24  ;;  %p36_p0 = scmp.ge.s32.totalorder %s35_s26, 2 }
   0xf   : > { %2480 = sst [smem:[#allocation5_spill]] %s2046_s25  ;;  %p1768_p1 = scmp.ge.s32.totalorder %s2046_s25, 1 }
  0x10   : > { %p585_p2 = scmp.lt.s32.totalorder %s2046_s25, 5  ;;  %s2513_s26 = smov (%p36_p0, %s35_s26), 0 }
  0x11   : > { %2481 = sst [smem:[#allocation6_spill]] %s2513_s26  ;;  %s2515_s27 = smov (!%p36_p0, %s38_s27), %s2042_s24 }
  0x12   : > { %p586_p3 = pnand %p1768_p1, %p585_p2  ;;  %p40_p4 = scmp.ge.s32.totalorder %s2515_s27, 2 }
  0x13   : > { %p680_p5 = scmp.lt.s32.totalorder (!%p586_p3), %s2034_s22, 1  ;;  %p687_p6 = scmp.lt.s32.totalorder (!%p586_p3), %s2030_s21, 1 }
  0x14   : > { %s2517_s27 = smov (%p40_p4, %s2515_s27), 0  ;;  %589 = sbr.rel (%p586_p3) target bundleno = 2952 (0xb88), region = 84 }
  0x15   : > { %2482 = sst [smem:[#allocation7_spill]] %s2517_s27  ;;  %s2484_s20 = sld [smem:[#allocation8_spill]] (!%p586_p3) }
  0x16   : > { %s2485_s4 = sld [smem:[#allocation10_spill]] (!%p586_p3)  ;;  %s2486_s6 = sld [smem:[#allocation11_spill]] (!%p586_p3) }
  0x17   : > { %s2489_s15 = sld [smem:[#allocation15_spill]] (!%p586_p3)  ;;  %s2490_s23 = sld [smem:[#allocation14_spill]] (!%p586_p3) }
  0x1b   : > { %s2519_s22 = smov (!%p680_p5, %s2034_s22), 1 }
  0x1c   : > { %s2185_s28 = scalar_select %p687_p6, %s2030_s21, 1 }
  0x1d   : > { %s1769_s29 = sshll.u32 %s2519_s22, 3 }
  0x1e   : > { %s683_s27 = scalar_lea.vmem %s2484_s20, %s1769_s29  ;;  %s1806_s21 = sshll.u32 %s2185_s28, 5 }
  0x1f   : > { %s2207_s13 = scalar_lea.vmem %s2485_s4, %s1806_s21  ;;  %s2216_s20 = scalar_lea.vmem %s2486_s6, %s1806_s21 }
  0x20   : > { %s2233_s0 = scalar_lea.vmem %s2455_s10, %s1806_s21  ;;  %s722_s17 = scalar_lea.vmem %s2456_s11, %s2185_s28 }
  0x21   : > { %s1809_s6 = sshll.u32 %s2185_s28, 6  ;;  %s730_s7 = scalar_lea.vmem %s2489_s15, %s2185_s28 }
  0x22   : > { %s2247_s8 = scalar_lea.vmem %s2490_s23, %s1809_s6  ;;  %s2491_s4 = sld [smem:[#allocation18_spill]] }
  0x23   : > { %s2492_s21 = sld [smem:[#allocation2_spill]] }
  0x28   : > { %s2252_s1 = scalar_lea.vmem %s2491_s4, %s1769_s29 }
  0x29   : > { %p1779_p7 = scmp.ne.s32.totalorder %s2492_s21, 0 }
  0x2a   : > { %v740_v0 = vld [vmem:[%s683_s27] sm:$0xff] (!%p1779_p7)  ;;  %vm741_vm0 = vcmask (!%p1779_p7), 261120  }
  0x2b   : > { %739 = sbr.rel (%p1779_p7) target bundleno = 50 (0x32), region = 88  ;;  %742 = vst.msk [vmem:[%s2252_s1] sm:$0xff] (!%p1779_p7), %vm741_vm0, %v740_v0 }
  0x32 PF: > { %v2257_v1 = vld [vmem:[%s2252_s1] sm:$0xff]  ;;  %vm747_vm1 = vcmask 261120   ;;  %v785_v9 = vld [vmem:[%s2207_s13 + $0x8] sm:$0xff]  ;;  %v786_v10 = vld [vmem:[%s2207_s13 + $0x10] sm:$0xff]  ;;  %v2048_v11 = vmov 0.0   ;;  %vm2049_vm2 = vmmov 0   ;;  %s2494_s29 = scalar_lea.vmem %s2448_s3, %s2185_s28  ;;  %s2495_s18 = scalar_lea.vmem %s2450_s5, %s2185_s28  ;;  %v852_v50 = vlaneseq }
  0x33   : > { %v748_v2 = vsel %vm747_vm1, %v2257_v1, 0.0  ;;  %v784_v8 = vld [vmem:[%s2207_s13] sm:$0xff]  ;;  %1840 = vmatprep.subr.bf16.mxu0 %v2048_v11  ;;  %v787_v13 = vld [vmem:[%s2207_s13 + $0x18] sm:$0xff]  ;;  %1844 = vmatprep.mubr.msk.bf16.mxu0 %vm2049_vm2, %v2048_v11  ;;  %s2493_s13 = scalar_lea.vmem %s2447_s2, %s2185_s28  ;;  %s2050_s19 = smov 96   ;;  %vm860_vm5 = vcmask 64512   ;;  %vm924_vm6 = vcmask 1043456  }
  0x34   : > { %749 = vadd.xlane.f32.xlu0 %v748_v2  ;;  %v789_v12 = vpack.c.bf16 %v785_v9, %v784_v8  ;;  %1848 = vmatprep.subr.bf16.mxu1 %v2048_v11  ;;  %v790_v14 = vpack.c.bf16 %v787_v13, %v786_v10  ;;  %v1780_v23 = vld [vmem:[%s2493_s13] ss:$0 sm:$0xff]  ;;  %s2051_s24 = smov 120   ;;  %s2052_s26 = smov 88   ;;  %v853_v53 = vshrl.u32 %v852_v50, 7  ;;  %vm1312_vm7 = vcmask 130048  }
  0x35   : > { %1850 = vmatprep.mubr.msk.bf16.mxu1 %vm2049_vm2, %v2048_v11  ;;  %v1781_v26 = vld [vmem:[%s2494_s29] ss:$0 sm:$0xff]  ;;  %s2053_s14 = smov 80   ;;  %s2054_s25 = smov 112   ;;  %vm1314_vm8 = vcmask 195584   ;;  %vm1483_vm11 = vcmask 523264  }
  0x36   : > { %1841 = vmatpush3.bf16.msra.mxu0 %v789_v12  ;;  %v1782_v30 = vld [vmem:[%s2495_s18] ss:$0 sm:$0xff]  ;;  %s2055_s12 = smov 72   ;;  %s2056_s16 = smov 104   ;;  %v854_v55 = vsub.s32 0, %v853_v53 }
  0x37   : > { %1842 = vmatprep.subr.bf16.mxu0 %v2048_v11  ;;  %s2496_s6 = sld [smem:[#allocation9_spill]]  ;;  %s2058_s23 = smov 56  }
  0x38   : > { %s2059_s27 = smov 48   ;;  %s2060_s29 = smov 40  }
  0x39   : > { %s2061_s15 = smov 8   ;;  %s2062_s30 = smov 16  }
  0x3a   : > { %1843 = vmatpush3.bf16.msra.mxu0 %v790_v14  ;;  %s2063_s18 = smov 24   ;;  %s2502_s4 = scalar_lea.vmem %s2454_s9, %s2185_s28 }
  0x3b   : > { %1854 = vmatprep.subr.bf16.mxu0 %v2048_v11 }
  0x3d   : > { %s2497_s13 = scalar_lea.vmem %s2496_s6, %s2519_s22  ;;  %s2057_s22 = smov 64  }
  0x3e   : > { %v744_v51 = vld [vmem:[%s2497_s13] sm:$0x1] }
  0x3f   : > { %v1784_v52 = vadd.f32 -1.0, %v744_v51 }
  0x41   : > { %v850_v54 = vmul.f32 1e+09, %v1784_v52 }
  0x43   : > { %v855_v56 = vrot.slane %v850_v54, %v854_v55 }
  0xc1   : > { %v750_v3 = vpop.xlane.xlu0 %749 }
  0xc2   : > { %v752_v4 = vmul.f32 0.03125, %v750_v3 }
  0xc4   : > { %v753_v5 = vsub.f32 %v2257_v1, %v752_v4 }
  0xc6   : > { %v754_v6 = vmul.f32 %v753_v5, %v753_v5  ;;  %v773_v24 = vmul.f32 %v1780_v23, %v753_v5 }
  0xc8   : > { %v755_v7 = vsel %vm747_vm1, %v754_v6, 0.0 }
  0xc9   : > { %756 = vadd.xlane.f32.xlu0 %v755_v7 }
 0x156   : > { %v757_v15 = vpop.xlane.xlu0 %756 }
 0x157   : > { %v759_v16 = vmul.f32 0.032258064, %v757_v15 }
 0x159   : > { %1980 = vrsqrt.f32 %v759_v16  ;;  %vm762_vm3 = vcmp.eq.f32.partialorder %v759_v16, inf  ;;  %v765_v19 = vand.u32 2147483648, %v759_v16  ;;  %vm764_vm4 = vcmp.eq.f32.partialorder %v759_v16, 0.0 }
 0x163   : > { %v1981_v17 = vpop.eup %1980 }
 0x164   : > { %v761_v18 = vmul.f32 %v1981_v17, %v759_v16 }
 0x166   : > { %v763_v20 = vsel %vm762_vm3, %v759_v16, %v761_v18 }
 0x167   : > { %v766_v21 = vsel %vm764_vm4, %v765_v19, %v763_v20 }
 0x168   : > { %v774_v22 = vadd.f32 1e-06, %v766_v21 }
 0x16a   : > { %1982 = vrcp.f32 %v774_v22 }
 0x174   : > { %v1983_v25 = vpop.eup %1982 }
 0x175   : > { %v776_v27 = vmul.f32 %v1983_v25, %v773_v24 }
 0x177   : > { %v783_v28 = vadd.f32 %v1781_v26, %v776_v27 }
 0x179   : > { %v788_v29 = vpack.c.bf16 %v783_v28, %v783_v28 }
 0x17b   : > { %1845 = vmatmul.mubr.msk.bf16.vlgmr.msra.gmra.mrb[0].mxu0 %vm747_vm1, %v788_v29 }
 0x17c   : > { %1856 = vmatprep.mubr.msk.bf16.mxu0 %vm2049_vm2, %v2048_v11 }
 0x24e   : > { %v835_v31 = vpop.f32.mrb[0].mxu0 }
 0x24f   : > { %v836_v32 = vadd.f32 %v1782_v30, %v835_v31  ;;  %v1846_v33 = vpop.f32.mrb[1].mxu0 }
 0x250   : > { %v838_v34 = vpop.f32.mrb[2].mxu0 }
 0x251   : > { %v846_v35 = vmul.f32 0.35355338, %v836_v32  ;;  %v2293_v36 = vpack.c.bf16 %v836_v32, %v836_v32  ;;  %v1847_v37 = vpop.f32.mrb[3].mxu0 }
 0x253   : > { %v847_v38 = vpack.c.bf16 %v846_v35, %v846_v35  ;;  %858 = vrot.lane.b32.xlu1 %v2293_v36, %s2050_s19 }
 0x255   : > { %969 = vrot.lane.b32.xlu0 %v847_v38, %s2051_s24  ;;  %s2498_s24 = sld [smem:[#allocation12_spill]] }
 0x257   : > { %971 = vrot.lane.b32.xlu1 %v2293_v36, %s2052_s26 }
 0x25b   : > { %1081 = vrot.lane.b32.xlu1 %v2293_v36, %s2053_s14  ;;  %s2499_s26 = scalar_lea.vmem %s2498_s24, %s2185_s28 }
 0x25f   : > { %1079 = vrot.lane.b32.xlu1 %v847_v38, %s2054_s25  ;;  %s2500_s25 = sld [smem:[#allocation13_spill]] }
 0x263   : > { %1191 = vrot.lane.b32.xlu1 %v2293_v36, %s2055_s12 }
 0x265   : > { %s2501_s12 = scalar_lea.vmem %s2500_s25, %s2185_s28 }
 0x267   : > { %1189 = vrot.lane.b32.xlu1 %v847_v38, %s2056_s16 }
 0x2c5   : > { %v859_v39 = vpop.permute.xlu1 %858 }
 0x2c6   : > { %v865_v40 = vsel %vm860_vm5, %v859_v39, 0 }
 0x2c7   : > { %1849 = vmatpush3.bf16.xpose.msra.mxu1 %v865_v40  ;;  %v970_v44 = vpop.permute.xlu0 %969 }
 0x2c8   : > { %1860 = vmatprep.subr.bf16.mxu1 %v2048_v11 }
 0x2c9   : > { %v972_v41 = vpop.permute.xlu1 %971 }
 0x2ca   : > { %v977_v42 = vsel %vm860_vm5, %v972_v41, 0 }
 0x2cd   : > { %v1082_v43 = vpop.permute.xlu1 %1081 }
 0x2ce   : > { %1851 = vmatmul.mubr.msk.bf16.vlgmr.msra.gmra.mrb[0].mxu1 %vm860_vm5, %v847_v38  ;;  %v1087_v46 = vsel %vm860_vm5, %v1082_v43, 0 }
 0x2cf   : > { %1861 = vmatpush3.bf16.xpose.msra.mxu1 %v977_v42  ;;  %1862 = vmatprep.mubr.msk.bf16.mxu1 %vm2049_vm2, %v2048_v11 }
 0x2d0   : > { %1872 = vmatprep.subr.bf16.mxu1 %v2048_v11 }
 0x2d1   : > { %v1080_v45 = vpop.permute.xlu1 %1079 }
 0x2d5   : > { %v1192_v47 = vpop.permute.xlu1 %1191 }
 0x2d6   : > { %1863 = vmatmul.mubr.msk.bf16.vlgmr.msra.gmra.mrb[4].mxu1 %vm860_vm5, %v970_v44  ;;  %v1197_v48 = vsel %vm860_vm5, %v1192_v47, 0 }
 0x2d7   : > { %1873 = vmatpush3.bf16.xpose.msra.mxu1 %v1087_v46  ;;  %1874 = vmatprep.mubr.msk.bf16.mxu1 %vm2049_vm2, %v2048_v11 }
 0x2d8   : > { %1884 = vmatprep.subr.bf16.mxu1 %v2048_v11 }
 0x2d9   : > { %v1190_v49 = vpop.permute.xlu1 %1189 }
 0x2de   : > { %1875 = vmatmul.mubr.msk.bf16.vlgmr.msra.gmra.mrb[8].mxu1 %vm860_vm5, %v1080_v45 }
 0x2df   : > { %1885 = vmatpush3.bf16.xpose.msra.mxu1 %v1197_v48  ;;  %1886 = vmatprep.mubr.msk.bf16.mxu1 %vm2049_vm2, %v2048_v11 }
 0x2e0   : > { %1896 = vmatprep.subr.bf16.mxu1 %v2048_v11 }
 0x2e6   : > { %1887 = vmatmul.mubr.msk.bf16.vlgmr.msra.gmra.mrb[12].mxu1 %vm860_vm5, %v1190_v49 }
 0x2e7   : > { %1900 = vmatprep.mubr.msk.bf16.mxu1 %vm2049_vm2, %v2048_v11 }
 0x3a1   : > { %v901_v57 = vpop.f32.mrb[0].mxu1 }
 0x3a2   : > { %v902_v58 = vadd.f32 %v901_v57, %v855_v56  ;;  %v1852_v59 = vpop.f32.mrb[1].mxu1 }
 0x3a3   : > { %v904_v60 = vpop.f32.mrb[2].mxu1 }
 0x3a4   : > { %v1853_v61 = vpop.f32.mrb[3].mxu1  ;;  %v907_v62 = vsel %vm860_vm5, %v902_v58, -inf }
 0x3a5   : > { %908 = vmax.xlane.f32.xlu1 %v907_v62 }
 0x3a9   : > { %v1013_v63 = vpop.f32.mrb[4].mxu1 }
 0x3aa   : > { %v1014_v0 = vadd.f32 %v1013_v63, %v855_v56  ;;  %v1864_v2 = vpop.f32.mrb[5].mxu1 }
 0x3ab   : > { %v1016_v3 = vpop.f32.mrb[6].mxu1 }
 0x3ac   : > { %v1865_v4 = vpop.f32.mrb[7].mxu1  ;;  %v1019_v5 = vsel %vm860_vm5, %v1014_v0, -inf }
 0x3ad   : > { %1020 = vmax.xlane.f32.xlu0 %v1019_v5 }
 0x3b1   : > { %v1123_v6 = vpop.f32.mrb[8].mxu1 }
 0x3b2   : > { %v1124_v7 = vadd.f32 %v1123_v6, %v855_v56  ;;  %v1876_v8 = vpop.f32.mrb[9].mxu1 }
 0x3b3   : > { %v1126_v9 = vpop.f32.mrb[10].mxu1  ;;  %v841_v8 = vld [vmem:[%s2216_s20] sm:$0xff] }
 0x3b4   : > { %v1877_v10 = vpop.f32.mrb[11].mxu1  ;;  %v1129_v12 = vsel %vm860_vm5, %v1124_v7, -inf  ;;  %v842_v9 = vld [vmem:[%s2216_s20 + $0x8] sm:$0xff] }
 0x3b5   : > { %1130 = vmax.xlane.f32.xlu1 %v1129_v12  ;;  %v843_v10 = vld [vmem:[%s2216_s20 + $0x10] sm:$0xff]  ;;  %v1317_v12 = vpack.c.bf16 %v842_v9, %v841_v8 }
 0x3b6   : > { %v1416_v9 = vld [vmem:[%s2247_s8 + $0x30] sm:$0xff] }
 0x3b7   : > { %1897 = vmatpush3.bf16.msra.mxu1 %v1317_v12 }
 0x3b8   : > { %1898 = vmatprep.subr.bf16.mxu1 %v2048_v11 }
 0x3b9   : > { %v1233_v13 = vpop.f32.mrb[12].mxu1 }
 0x3ba   : > { %v1234_v14 = vadd.f32 %v1233_v13, %v855_v56  ;;  %v1888_v15 = vpop.f32.mrb[13].mxu1  ;;  %v844_v13 = vld [vmem:[%s2216_s20 + $0x18] sm:$0xff] }
 0x3bb   : > { %v1236_v16 = vpop.f32.mrb[14].mxu1 }
 0x3bc   : > { %v1889_v17 = vpop.f32.mrb[15].mxu1  ;;  %v1239_v18 = vsel %vm860_vm5, %v1234_v14, -inf }
 0x3bd   : > { %1240 = vmax.xlane.f32.xlu0 %v1239_v18 }
 0x432   : > { %v909_v19 = vpop.xlane.xlu1 %908 }
 0x433   : > { %v910_v20 = vsub.f32 %v902_v58, %v909_v19 }
 0x435   : > { %v911_v21 = vmul.f32 1.442695, %v910_v20 }
 0x437   : > { %1984 = vpow2.f32 %v911_v21 }
 0x43a   : > { %v1021_v22 = vpop.xlane.xlu0 %1020 }
 0x43b   : > { %v1022_v23 = vsub.f32 %v1014_v0, %v1021_v22 }
 0x43d   : > { %v1023_v24 = vmul.f32 1.442695, %v1022_v23 }
 0x43f   : > { %1986 = vpow2.f32 %v1023_v24 }
 0x441   : > { %v1985_v25 = vpop.eup %1984 }
 0x442   : > { %v913_v26 = vsel %vm860_vm5, %v1985_v25, 0.0  ;;  %v1131_v34 = vpop.xlane.xlu1 %1130 }
 0x443   : > { %914 = vadd.xlane.f32.xlu1 %v913_v26  ;;  %v1132_v35 = vsub.f32 %v1124_v7, %v1131_v34 }
 0x445   : > { %v1133_v37 = vmul.f32 1.442695, %v1132_v35 }
 0x449   : > { %v1987_v27 = vpop.eup %1986 }
 0x44a   : > { %v1241_v28 = vpop.xlane.xlu0 %1240  ;;  %v1025_v29 = vsel %vm860_vm5, %v1987_v27, 0.0 }
 0x44b   : > { %v1242_v30 = vsub.f32 %v1234_v14, %v1241_v28  ;;  %1026 = vadd.xlane.f32.xlu0 %v1025_v29  ;;  %v1318_v14 = vpack.c.bf16 %v844_v13, %v843_v10  ;;  %v1417_v10 = vld [vmem:[%s2247_s8 + $0x38] sm:$0xff]  ;;  %v1797_v13 = vld [vmem:[%s722_s17] ss:$0 sm:$0xff]  ;;  %s2504_s17 = sld [smem:[#allocation2_spill]] }
 0x44c   : > { %v1476_v12 = vpack.c.bf16 %v1417_v10, %v1416_v9 }
 0x44d   : > { %v1243_v31 = vmul.f32 1.442695, %v1242_v30  ;;  %1899 = vmatpush3.bf16.msra.mxu1 %v1318_v14  ;;  %v1793_v30 = vld [vmem:[%s2499_s26] ss:$0 sm:$0xff] }
 0x44e   : > { %1912 = vmatprep.subr.bf16.mxu1 %v2048_v11 }
 0x44f   : > { %1988 = vpow2.f32 %v1243_v31 }
 0x450   : > { %1990 = vpow2.f32 %v1133_v37 }
 0x451   : > { %p1801_p8 = scmp.ne.s32.totalorder %s2504_s17, 1 }
 0x454   : > { %919 = vrot.lane.b32.xlu1 %v2293_v36, %s2057_s22 }
 0x459   : > { %v1989_v32 = vpop.eup %1988 }
 0x45a   : > { %v1245_v33 = vsel %vm860_vm5, %v1989_v32, 0.0  ;;  %v1991_v38 = vpop.eup %1990 }
 0x45b   : > { %1246 = vadd.xlane.f32.xlu0 %v1245_v33  ;;  %v1135_v39 = vsel %vm860_vm5, %v1991_v38, 0.0 }
 0x471   : > { %1031 = vrot.lane.b32.xlu0 %v2293_v36, %s2058_s23 }
 0x478   : > { %1136 = vadd.xlane.f32.xlu1 %v1135_v39 }
 0x489   : > { %1141 = vrot.lane.b32.xlu1 %v2293_v36, %s2059_s27  ;;  %s2505_s27 = sld [smem:[#allocation16_spill]] (!%p1801_p8) }
 0x48d   : > { %1251 = vrot.lane.b32.xlu1 %v2293_v36, %s2060_s29 }
 0x4d0   : > { %v915_v40 = vpop.xlane.xlu1 %914 }
 0x4d1   : > { %1992 = vrcp.f32 %v915_v40 }
 0x4d4   : > { %v920_v41 = vpop.permute.xlu1 %919 }
 0x4d5   : > { %v926_v42 = vsel %vm924_vm6, %v920_v41, 0 }
 0x4d6   : > { %1855 = vmatpush3.bf16.msra.mxu0 %v926_v42 }
 0x4d7   : > { %1866 = vmatprep.subr.bf16.mxu0 %v2048_v11 }
 0x4d8   : > { %v1027_v44 = vpop.xlane.xlu0 %1026 }
 0x4d9   : > { %1994 = vrcp.f32 %v1027_v44  ;;  %v1405_v44 = vld [vmem:[%s2233_s0] sm:$0xff] }
 0x4db   : > { %v1993_v43 = vpop.eup %1992 }
 0x4dc   : > { %v917_v45 = vmul.f32 %v1993_v43, %v1985_v25 }
 0x4de   : > { %v918_v46 = vpack.c.bf16 %v917_v45, %v917_v45  ;;  %v1407_v45 = vld [vmem:[%s2233_s0 + $0x10] sm:$0xff] }
 0x4e0   : > { %1857 = vmatmul.mubr.msk.bf16.vlgmr.msra.gmra.mrb[4].mxu0 %vm860_vm5, %v918_v46 }
 0x4e1   : > { %1868 = vmatprep.mubr.msk.bf16.mxu0 %vm2049_vm2, %v2048_v11 }
 0x4e3   : > { %v1995_v36 = vpop.eup %1994 }
 0x4e4   : > { %v1029_v48 = vmul.f32 %v1995_v36, %v1987_v27  ;;  %v1408_v36 = vld [vmem:[%s2233_s0 + $0x18] sm:$0xff] }
 0x4e6   : > { %v1030_v51 = vpack.c.bf16 %v1029_v48, %v1029_v48  ;;  %v1410_v48 = vld [vmem:[%s2247_s8] sm:$0xff] }
 0x4e8   : > { %v1247_v47 = vpop.xlane.xlu0 %1246 }
 0x4ec   : > { %v1032_v49 = vpop.permute.xlu0 %1031 }
 0x4ed   : > { %v1037_v50 = vsel %vm924_vm6, %v1032_v49, 0  ;;  %v1411_v49 = vld [vmem:[%s2247_s8 + $0x8] sm:$0xff] }
 0x4ee   : > { %1867 = vmatpush3.bf16.msra.mxu0 %v1037_v50  ;;  %v1412_v50 = vld [vmem:[%s2247_s8 + $0x10] sm:$0xff] }
 0x4ef   : > { %1878 = vmatprep.subr.bf16.mxu0 %v2048_v11 }
 0x4f1   : > { %1869 = vmatmul.mubr.msk.bf16.vlgmr.msra.gmra.mrb[8].mxu0 %vm860_vm5, %v1030_v51  ;;  %v1473_v51 = vpack.c.bf16 %v1411_v49, %v1410_v48 }
 0x4f2   : > { %1880 = vmatprep.mubr.msk.bf16.mxu0 %vm2049_vm2, %v2048_v11 }
 0x505   : > { %v1137_v52 = vpop.xlane.xlu1 %1136 }
 0x506   : > { %1996 = vrcp.f32 %v1137_v52  ;;  %v1413_v52 = vld [vmem:[%s2247_s8 + $0x18] sm:$0xff] }
 0x507   : > { %1998 = vrcp.f32 %v1247_v47  ;;  %v1421_v47 = vpack.c.bf16 %v1408_v36, %v1407_v45 }
 0x509   : > { %v1142_v53 = vpop.permute.xlu1 %1141 }
 0x50a   : > { %v1147_v54 = vsel %vm924_vm6, %v1142_v53, 0  ;;  %v1474_v53 = vpack.c.bf16 %v1413_v52, %v1412_v50 }
 0x50b   : > { %1879 = vmatpush3.bf16.msra.mxu0 %v1147_v54 }
 0x50c   : > { %1890 = vmatprep.subr.bf16.mxu0 %v2048_v11 }
 0x50d   : > { %v1252_v57 = vpop.permute.xlu1 %1251 }
 0x50e   : > { %v1257_v60 = vsel %vm924_vm6, %v1252_v57, 0 }
 0x510   : > { %v1997_v55 = vpop.eup %1996 }
 0x511   : > { %v1139_v56 = vmul.f32 %v1997_v55, %v1991_v38  ;;  %v1999_v59 = vpop.eup %1998 }
 0x512   : > { %v1249_v61 = vmul.f32 %v1999_v59, %v1989_v32 }
 0x513   : > { %v1140_v58 = vpack.c.bf16 %v1139_v56, %v1139_v56 }
 0x514   : > { %v1250_v62 = vpack.c.bf16 %v1249_v61, %v1249_v61 }
 0x515   : > { %1881 = vmatmul.mubr.msk.bf16.vlgmr.msra.gmra.mrb[12].mxu0 %vm860_vm5, %v1140_v58 }
 0x516   : > { %1891 = vmatpush3.bf16.msra.mxu0 %v1257_v60  ;;  %1892 = vmatprep.mubr.msk.bf16.mxu0 %vm2049_vm2, %v2048_v11 }
 0x517   : > { %1904 = vmatprep.subr.bf16.mxu0 %v2048_v11 }
 0x51d   : > { %1893 = vmatmul.mubr.msk.bf16.vlgmr.msra.gmra.mrb[16].mxu0 %vm860_vm5, %v1250_v62  ;;  %v1795_v62 = vld [vmem:[%s2501_s12] ss:$0 sm:$0xff] }
 0x51e   : > { %1908 = vmatprep.mubr.msk.bf16.mxu0 %vm2049_vm2, %v2048_v11 }
 0x5b3   : > { %v962_v63 = vpop.f32.mrb[4].mxu0 }
 0x5b4   : > { %v1858_v0 = vpop.f32.mrb[5].mxu0 }
 0x5b5   : > { %v965_v2 = vpop.f32.mrb[6].mxu0 }
 0x5b6   : > { %v1859_v3 = vpop.f32.mrb[7].mxu0  ;;  %v1796_v2 = vld [vmem:[%s2502_s4] ss:$0 sm:$0xff] }
 0x5c4   : > { %v1073_v4 = vpop.f32.mrb[8].mxu0 }
 0x5c5   : > { %1300 = vrot.lane.b32.xlu0 %v1073_v4, %s2061_s15  ;;  %v1870_v5 = vpop.f32.mrb[9].mxu0 }
 0x5c6   : > { %v1076_v6 = vpop.f32.mrb[10].mxu0 }
 0x5c7   : > { %v1871_v7 = vpop.f32.mrb[11].mxu0  ;;  %v1414_v6 = vld [vmem:[%s2247_s8 + $0x20] sm:$0xff] }
 0x5c8   : > { %v1415_v7 = vld [vmem:[%s2247_s8 + $0x28] sm:$0xff] }
 0x5c9   : > { %v1475_v8 = vpack.c.bf16 %v1415_v7, %v1414_v6 }
 0x5e8   : > { %v1183_v15 = vpop.f32.mrb[12].mxu0 }
 0x5e9   : > { %1304 = vrot.lane.b32.xlu1 %v1183_v15, %s2062_s30  ;;  %v1882_v16 = vpop.f32.mrb[13].mxu0  ;;  %s2506_s30 = sld [smem:[#allocation17_spill]] (!%p1801_p8) }
 0x5ea   : > { %v1186_v17 = vpop.f32.mrb[14].mxu0 }
 0x5eb   : > { %v1883_v18 = vpop.f32.mrb[15].mxu0 }
 0x5ef   : > { %v1803_v45 = vld [vmem:[%s2506_s30] ss:$0 sm:$0xff] (!%p1801_p8) }
 0x5f0   : > { %v1293_v19 = vpop.f32.mrb[16].mxu0 }
 0x5f1   : > { %1308 = vrot.lane.b32.xlu0 %v1293_v19, %s2063_s18  ;;  %v1894_v20 = vpop.f32.mrb[17].mxu0 }
 0x5f2   : > { %v1296_v21 = vpop.f32.mrb[18].mxu0 }
 0x5f3   : > { %v1895_v22 = vpop.f32.mrb[19].mxu0 }
 0x637   : > { %v1301_v23 = vpop.permute.xlu0 %1300 }
 0x638   : > { %v1311_v25 = vsel %vm860_vm5, %v962_v63, %v1301_v23 }
 0x65b   : > { %v1305_v24 = vpop.permute.xlu1 %1304 }
 0x65c   : > { %v1313_v26 = vsel %vm1312_vm7, %v1311_v25, %v1305_v24 }
 0x663   : > { %v1309_v27 = vpop.permute.xlu0 %1308 }
 0x664   : > { %v1315_v28 = vsel %vm1314_vm8, %v1313_v26, %v1309_v27 }
 0x665   : > { %v1316_v29 = vpack.c.bf16 %v1315_v28, %v1315_v28 }
 0x667   : > { %1901 = vmatmul.mubr.msk.bf16.vlgmr.msra.gmra.mrb[16].mxu1 %vm747_vm1, %v1316_v29 }
 0x668   : > { %1920 = vmatprep.mubr.msk.bf16.mxu1 %vm2049_vm2, %v2048_v11  ;;  %1913 = vmatpush3.bf16.msra.mxu1 %v1473_v51 }
 0x669   : > { %1914 = vmatprep.subr.bf16.mxu1 %v2048_v11 }
 0x66c   : > { %1915 = vmatpush3.bf16.msra.mxu1 %v1474_v53 }
 0x66d   : > { %1916 = vmatprep.subr.bf16.mxu1 %v2048_v11 }
 0x670   : > { %1917 = vmatpush3.bf16.msra.mxu1 %v1475_v8 }
 0x671   : > { %1918 = vmatprep.subr.bf16.mxu1 %v2048_v11 }
 0x674   : > { %1919 = vmatpush3.bf16.msra.mxu1 %v1476_v12 }
 0x73a   : > { %v1362_v31 = vpop.f32.mrb[16].mxu1 }
 0x73b   : > { %v1363_v32 = vadd.f32 %v1793_v30, %v1362_v31  ;;  %v1902_v33 = vpop.f32.mrb[17].mxu1 }
 0x73c   : > { %v1365_v34 = vpop.f32.mrb[18].mxu1 }
 0x73d   : > { %v2372_v35 = vadd.f32 %v1363_v32, %v2257_v1  ;;  %v1903_v37 = vpop.f32.mrb[19].mxu1  ;;  %v1406_v1 = vld [vmem:[%s2233_s0 + $0x8] sm:$0xff] }
 0x73e   : > { %v1420_v46 = vpack.c.bf16 %v1406_v1, %v1405_v44 }
 0x73f   : > { %v1371_v38 = vsel %vm747_vm1, %v2372_v35, 0.0 }
 0x740   : > { %1372 = vadd.xlane.f32.xlu1 %v1371_v38  ;;  %1905 = vmatpush3.bf16.msra.mxu0 %v1420_v46 }
 0x741   : > { %1906 = vmatprep.subr.bf16.mxu0 %v2048_v11  ;;  %v1799_v11 = vld [vmem:[%s730_s7] ss:$0 sm:$0xff] }
 0x744   : > { %1907 = vmatpush3.bf16.msra.mxu0 %v1421_v47 }
 0x7cd   : > { %v1373_v39 = vpop.xlane.xlu1 %1372 }
 0x7ce   : > { %v1374_v40 = vmul.f32 0.03125, %v1373_v39 }
 0x7d0   : > { %v1375_v41 = vsub.f32 %v2372_v35, %v1374_v40 }
 0x7d2   : > { %v1376_v42 = vmul.f32 %v1375_v41, %v1375_v41  ;;  %v1394_v63 = vmul.f32 %v1795_v62, %v1375_v41 }
 0x7d4   : > { %v1377_v43 = vsel %vm747_vm1, %v1376_v42, 0.0 }
 0x7d5   : > { %1378 = vadd.xlane.f32.xlu0 %v1377_v43  ;;  %v1802_v43 = vld [vmem:[%s2505_s27] ss:$0 sm:$0xff] (!%p1801_p8) }
 0x862   : > { %v1379_v54 = vpop.xlane.xlu0 %1378 }
 0x863   : > { %v1380_v55 = vmul.f32 0.032258064, %v1379_v54 }
 0x865   : > { %2000 = vrsqrt.f32 %v1380_v55  ;;  %vm1383_vm9 = vcmp.eq.f32.partialorder %v1380_v55, inf  ;;  %v1386_v58 = vand.u32 2147483648, %v1380_v55  ;;  %vm1385_vm10 = vcmp.eq.f32.partialorder %v1380_v55, 0.0 }
 0x86f   : > { %v2001_v56 = vpop.eup %2000 }
 0x870   : > { %v1382_v57 = vmul.f32 %v2001_v56, %v1380_v55 }
 0x872   : > { %v1384_v59 = vsel %vm1383_vm9, %v1380_v55, %v1382_v57 }
 0x873   : > { %v1387_v60 = vsel %vm1385_vm10, %v1386_v58, %v1384_v59 }
 0x874   : > { %v1395_v61 = vadd.f32 1e-06, %v1387_v60 }
 0x876   : > { %2002 = vrcp.f32 %v1395_v61 }
 0x880   : > { %v2003_v0 = vpop.eup %2002 }
 0x881   : > { %v1397_v3 = vmul.f32 %v2003_v0, %v1394_v63 }
 0x883   : > { %v1404_v4 = vadd.f32 %v1796_v2, %v1397_v3 }
 0x885   : > { %v1419_v5 = vpack.c.bf16 %v1404_v4, %v1404_v4 }
 0x887   : > { %1909 = vmatmul.mubr.msk.bf16.vlgmr.msra.gmra.mrb[20].mxu0 %vm747_vm1, %v1419_v5 }
 0x95a   : > { %v1465_v14 = vpop.f32.mrb[20].mxu0 }
 0x95b   : > { %v1466_v15 = vadd.f32 %v1797_v13, %v1465_v14  ;;  %v1910_v16 = vpop.f32.mrb[21].mxu0 }
 0x95c   : > { %v1468_v17 = vpop.f32.mrb[22].mxu0 }
 0x95d   : > { %v1471_v18 = vmax.f32 %v1466_v15, 0.0  ;;  %v1911_v19 = vpop.f32.mrb[23].mxu0 }
 0x95f   : > { %v1472_v20 = vpack.c.bf16 %v1471_v18, %v1471_v18 }
 0x961   : > { %1921 = vmatmul.mubr.msk.bf16.vlgmr.msra.gmra.mrb[20].mxu1 %vm1483_vm11, %v1472_v20 }
 0xa33   : > { %1532 = sbr.rel (%p1801_p8) target bundleno = 2952 (0xb88), region = 92 }
 0xa34   : > { %v1521_v21 = vpop.f32.mrb[20].mxu1 }
 0xa35   : > { %v1522_v22 = vadd.f32 %v1799_v11, %v1521_v21  ;;  %v1922_v23 = vpop.f32.mrb[21].mxu1 }
 0xa36   : > { %v1524_v24 = vpop.f32.mrb[22].mxu1 }
 0xa37   : > { %v1527_v25 = vadd.f32 %v1522_v22, %v2372_v35  ;;  %v1923_v26 = vpop.f32.mrb[23].mxu1 }
 0xa39   : > { %1528 = vst.msk [vmem:[%s2252_s1] sm:$0xff] %vm747_vm1, %v1527_v25 }
 0xa40   : > { %v1533_v27 = vld [vmem:[%s2252_s1] sm:$0xff] }
 0xa41   : > { %v1536_v28 = vsel %vm747_vm1, %v1533_v27, 0.0 }
 0xa42   : > { %1537 = vadd.xlane.f32.xlu0 %v1536_v28 }
 0xacf   : > { %v1538_v29 = vpop.xlane.xlu0 %1537 }
 0xad0   : > { %v1539_v30 = vmul.f32 0.03125, %v1538_v29 }
 0xad2   : > { %v1540_v31 = vsub.f32 %v1533_v27, %v1539_v30 }
 0xad4   : > { %v1541_v32 = vmul.f32 %v1540_v31, %v1540_v31  ;;  %v1559_v44 = vmul.f32 %v1802_v43, %v1540_v31 }
 0xad6   : > { %v1542_v33 = vsel %vm747_vm1, %v1541_v32, 0.0 }
 0xad7   : > { %1543 = vadd.xlane.f32.xlu0 %v1542_v33 }
 0xb64   : > { %v1544_v34 = vpop.xlane.xlu0 %1543 }
 0xb65   : > { %v1545_v35 = vmul.f32 0.032258064, %v1544_v34 }
 0xb67   : > { %2004 = vrsqrt.f32 %v1545_v35  ;;  %vm1548_vm12 = vcmp.eq.f32.partialorder %v1545_v35, inf  ;;  %v1551_v39 = vand.u32 2147483648, %v1545_v35  ;;  %vm1550_vm13 = vcmp.eq.f32.partialorder %v1545_v35, 0.0 }
 0xb71   : > { %v2005_v37 = vpop.eup %2004 }
 0xb72   : > { %v1547_v38 = vmul.f32 %v2005_v37, %v1545_v35 }
 0xb74   : > { %v1549_v40 = vsel %vm1548_vm12, %v1545_v35, %v1547_v38 }
 0xb75   : > { %v1552_v41 = vsel %vm1550_vm13, %v1551_v39, %v1549_v40 }
 0xb76   : > { %v1560_v42 = vadd.f32 1e-06, %v1552_v41 }
 0xb78   : > { %2006 = vrcp.f32 %v1560_v42 }
 0xb82   : > { %v2007_v1 = vpop.eup %2006 }
 0xb83   : > { %v1562_v46 = vmul.f32 %v2007_v1, %v1559_v44 }
 0xb85   : > { %v1569_v36 = vadd.f32 %v1803_v45, %v1562_v46 }
 0xb87   : > { %1570 = vst.msk [vmem:[%s2252_s1] sm:$0xff] %vm747_vm1, %v1569_v36 }
 0xb88 PF: > { %s2507_s18 = sld [smem:[#allocation5_spill]]  ;;  %s2508_s21 = sld [smem:[#allocation3_spill]] }
 0xb89   : > { %s2509_s22 = sld [smem:[#allocation4_spill]]  ;;  %s2510_s23 = sld [smem:[#allocation6_spill]] }
 0xb8a   : > { %s2511_s24 = sld [smem:[#allocation7_spill]] }
 0xb8e   : > { %s26_s25 = sadd.s32 1, %s2507_s18  }
 0xb8f   : > { %p23_p9 = scmp.ge.s32.totalorder %s26_s25, 6  }
 0xb91   :  { %25 = sbr.rel (!%p23_p9) target bundleno = 12 (0xc), region = 161 }

// kernel: encoder_decoder_forward.3
= control target key start
LH: loop header
LB: loop body
LE: loop exit
PB: predicated region body
PF: predicated region fallthrough
CT: control target
= control target key end

     0   :  { %s4239_s0 = inlined_call_operand.vmem [shape: f32[2,8,32], index: 0, kind: input, shape index: {}]   ;;  %s4240_s1 = inlined_call_operand.vmem [shape: f32[2,8,32], index: 1, kind: input, shape index: {}]   ;;  %s4241_s2 = inlined_call_operand.vmem [shape: f32[2,8,8], index: 2, kind: input, shape index: {}]   ;;  %s4242_s3 = inlined_call_operand.vmem [shape: f32[2,1,8], index: 3, kind: input, shape index: {}]   ;;  %s4243_s4 = inlined_call_operand.vmem [shape: f32[2,1,32], index: 4, kind: input, shape index: {}]   ;;  %s4244_s5 = inlined_call_operand.vmem [shape: f32[2,1,32], index: 5, kind: input, shape index: {}]   ;;  %s4245_s6 = inlined_call_operand.vmem [shape: f32[2,32,96], index: 6, kind: input, shape index: {}]   ;;  %s4246_s7 = inlined_call_operand.vmem [shape: f32[2,1,96], index: 7, kind: input, shape index: {}]   ;;  %s4247_s8 = inlined_call_operand.vmem [shape: f32[2,32,32], index: 8, kind: input, shape index: {}]   ;;  %s4248_s9 = inlined_call_operand.vmem [shape: f32[2,1,32], index: 9, kind: input, shape index: {}]   ;;  %s4249_s10 = inlined_call_operand.vmem [shape: f32[2,1,32], index: 10, kind: input, shape index: {}]   ;;  %s4250_s11 = inlined_call_operand.vmem [shape: f32[2,1,32], index: 11, kind: input, shape index: {}]   ;;  %s4251_s12 = inlined_call_operand.vmem [shape: f32[2,32,32], index: 12, kind: input, shape index: {}]   ;;  %s4252_s13 = inlined_call_operand.vmem [shape: f32[2,1,32], index: 13, kind: input, shape index: {}]   ;;  %s4253_s14 = inlined_call_operand.vmem [shape: f32[2,32,64], index: 14, kind: input, shape index: {}]   ;;  %s4254_s15 = inlined_call_operand.vmem [shape: f32[2,1,64], index: 15, kind: input, shape index: {}]   ;;  %s4255_s16 = inlined_call_operand.vmem [shape: f32[2,32,32], index: 16, kind: input, shape index: {}]   ;;  %s4256_s17 = inlined_call_operand.vmem [shape: f32[2,1,32], index: 17, kind: input, shape index: {}]   ;;  %s4257_s18 = inlined_call_operand.vmem [shape: f32[2,1,32], index: 18, kind: input, shape index: {}]   ;;  %s4258_s19 = inlined_call_operand.vmem [shape: f32[2,1,32], index: 19, kind: input, shape index: {}]   ;;  %s4259_s20 = inlined_call_operand.vmem [shape: f32[2,32,64], index: 20, kind: input, shape index: {}]   ;;  %s4260_s21 = inlined_call_operand.vmem [shape: f32[2,1,64], index: 21, kind: input, shape index: {}]   ;;  %s4261_s22 = inlined_call_operand.vmem [shape: f32[2,64,32], index: 22, kind: input, shape index: {}]   ;;  %s4262_s23 = inlined_call_operand.vmem [shape: f32[2,1,32], index: 23, kind: input, shape index: {}]   ;;  %s4263_s24 = inlined_call_operand.vmem [shape: f32[1,32], index: 24, kind: input, shape index: {}]   ;;  %s4264_s25 = inlined_call_operand.vmem [shape: f32[1,32], index: 25, kind: input, shape index: {}]   ;;  %s4265_s26 = inlined_call_operand.hbm [shape: f32[2,8,32], index: 26, kind: output, shape index: {}]  }
   0x1   :  { %4285 = sst [smem:[#allocation21_spill]] %s4239_s0 }
   0x2   :  { %4286 = sst [smem:[#allocation22_spill]] %s4240_s1 }
   0x3   :  { %4287 = sst [smem:[#allocation23_spill]] %s4241_s2 }
   0x4   :  { %4288 = sst [smem:[#allocation24_spill]] %s4242_s3 }
   0x5   :  { %4289 = sst [smem:[#allocation25_spill]] %s4243_s4 }
   0x6   :  { %4290 = sst [smem:[#allocation26_spill]] %s4244_s5 }
   0x7   :  { %4291 = sst [smem:[#allocation27_spill]] %s4245_s6 }
   0x8   :  { %4292 = sst [smem:[#allocation28_spill]] %s4246_s7 }
   0x9   :  { %4293 = sst [smem:[#allocation29_spill]] %s4247_s8 }
   0xa   :  { %4294 = sst [smem:[#allocation30_spill]] %s4248_s9 }
   0xb   :  { %4295 = sst [smem:[#allocation31_spill]] %s4249_s10 }
   0xc   :  { %4296 = sst [smem:[#allocation32_spill]] %s4251_s12 }
   0xd   :  { %4297 = sst [smem:[#allocation33_spill]] %s4252_s13 }
   0xe   :  { %4298 = sst [smem:[#allocation34_spill]] %s4253_s14 }
   0xf   :  { %4299 = sst [smem:[#allocation35_spill]] %s4255_s16 }
  0x10   :  { %4300 = sst [smem:[#allocation36_spill]] %s4256_s17 }
  0x11   :  { %4301 = sst [smem:[#allocation37_spill]] %s4257_s18 }
  0x12   :  { %4302 = sst [smem:[#allocation38_spill]] %s4258_s19 }
  0x13   :  { %4303 = sst [smem:[#allocation39_spill]] %s4259_s20 }
  0x14   :  { %4304 = sst [smem:[#allocation40_spill]] %s4260_s21 }
  0x15   :  { %4305 = sst [smem:[#allocation41_spill]] %s4261_s22 }
  0x16   :  { %4306 = sst [smem:[#allocation42_spill]] %s4262_s23 }
  0x17   :  { %4307 = sst [smem:[#allocation43_spill]] %s4263_s24 }
  0x18   :  { %4308 = sst [smem:[#allocation44_spill]] %s4264_s25 }
  0x19   :  { %4309 = sst [smem:[#allocation45_spill]] %s4265_s26 }
  0x1a   :  { %31 = vsyncpa [#allocation3], 0 }
  0x1b   :  { %33 = vsyncpa [#allocation3 + $0x1], 0  ;;  %s3661_s27 = smov 0   ;;  %s3663_s3 = smov 0  }
  0x1c   :  { %s3665_s7 = smov 0   ;;  %s3667_s28 = smov 0  }
  0x1d   :  { %s3669_s8 = smov 0   ;;  %s3671_s4 = smov 0  }
  0x1e   :  { %s3673_s29 = smov 0   ;;  %s3675_s0 = smov 0  }
  0x1f LB: > { %4310 = sst [smem:[#allocation5_spill]] %s3479_s27  ;;  %s2991_s9 = sadd.s32 4294967295, %s3507_s0   ;;  %s3507_s0 = sphi %s3675_s0, %s39_s0   ;;  %s3503_s29 = sphi %s3673_s29, %s4398_s29   ;;  %s3499_s4 = sphi %s3671_s4, %s4397_s4   ;;  %s3495_s8 = sphi %s3669_s8, %s4396_s8   ;;  %s3491_s28 = sphi %s3667_s28, %s4395_s28   ;;  %s3487_s7 = sphi %s3665_s7, %s4394_s7   ;;  %s3483_s3 = sphi %s3663_s3, %s4393_s3   ;;  %s3479_s27 = sphi %s3661_s27, %s4392_s27  }
  0x20   : > { %4311 = sst [smem:[#allocation6_spill]] %s3483_s3  ;;  %s2992_s30 = sadd.s32 4294967294, %s3507_s0  }
  0x21   : > { %4312 = sst [smem:[#allocation7_spill]] %s3487_s7  ;;  %s48_s2 = sadd.s32 1, %s3499_s4 }
  0x22   : > { %4313 = sst [smem:[#allocation8_spill]] %s3491_s28  ;;  %p49_p0 = scmp.ge.s32.totalorder %s48_s2, 2 }
  0x23   : > { %4314 = sst [smem:[#allocation9_spill]] %s3495_s8  ;;  %s51_s5 = sadd.s32 1, %s3503_s29 }
  0x24   : > { %4315 = sst [smem:[#allocation10_spill]] %s3499_s4  ;;  %p734_p1 = scmp.ne.s32.totalorder %s3487_s7, %s3483_s3 }
  0x25   : > { %4316 = sst [smem:[#allocation11_spill]] %s3503_s29  ;;  %p735_p2 = scmp.eq.s32.totalorder %s2991_s9, 3 }
  0x26   : > { %4317 = sst [smem:[#allocation12_spill]] %s3507_s0  ;;  %s4400_s2 = smov (%p49_p0, %s48_s2), 0 }
  0x27   : > { %4318 = sst [smem:[#allocation13_spill]] %s4400_s2  ;;  %s4402_s5 = smov (!%p49_p0, %s51_s5), %s3503_s29 }
  0x28   : > { %p3710_p3 = por %p735_p2, %p734_p1  ;;  %p740_p4 = scmp.ne.s32.totalorder %s3483_s3, %s3479_s27 }
  0x29   : > { %p53_p5 = scmp.ge.s32.totalorder %s4402_s5, 2  ;;  %p741_p6 = scmp.eq.s32.totalorder %s2992_s30, 3 }
  0x2a   : > { %s4319_s10 = scalar_select %p3710_p3, 1, 0 }
  0x2b   : > { %p2995_p7 = scmp.ge.s32.totalorder %s3507_s0, 1  ;;  %p926_p8 = scmp.lt.s32.totalorder %s3507_s0, 5 }
  0x2c   : > { %4320 = sst [smem:[#allocation14_spill]] %s4319_s10  ;;  %s4404_s5 = smov (%p53_p5, %s4402_s5), 0 }
  0x2d   : > { %4321 = sst [smem:[#allocation15_spill]] %s4404_s5  ;;  %p3720_p9 = por %p741_p6, %p740_p4 }
  0x2e   : > { %p927_p10 = pnand %p2995_p7, %p926_p8  ;;  %s721_s1 = ssub.s32 %s3503_s29, %s4404_s5 }
  0x2f   : > { %s4322_s6 = scalar_select %p3720_p9, 1, 0 }
  0x30   : > { %s724_s9 = sadd.s32 1, %s3487_s7  ;;  %p722_p11 = scmp.eq.s32.totalorder %s721_s1, 0 }
  0x31   : > { %4323 = sst [smem:[#allocation16_spill]] %s4322_s6  ;;  %930 = sbr.rel (%p927_p10) target bundleno = 4801 (0x12c1), region = 124 }
  0x32   : > { %s3728_s2 = scalar_select %p722_p11, %s3487_s7, %s724_s9  }
  0x34   : > { %4324 = sst [smem:[#allocation17_spill]] %s3728_s2 }
  0x38   : > { %s4269_s30 = sand.u32 1, %s3483_s3   ;;  %p1080_p12 = scmp.lt.s32.totalorder %s3495_s8, 1 }
  0x39   : > { %s3734_s4 = sshll.u32 %s4269_s30, 3  ;;  %p1095_p13 = scmp.lt.s32.totalorder %s3491_s28, 1 }
  0x3a   : > { %s3738_s6 = scalar_select %p1080_p12, %s3495_s8, 1 }
  0x3b   : > { %s3741_s1 = scalar_select %p1095_p13, %s3491_s28, 1 }
  0x3c   : > { %4325 = sst [smem:[#allocation18_spill]] %s3738_s6  ;;  %s3744_s9 = sshll.u32 %s3738_s6, 3 }
  0x3d   : > { %4326 = sst [smem:[#allocation19_spill]] %s3744_s9  ;;  %s4328_s0 = sld [smem:[#allocation21_spill]] }
  0x3e   : > { %s3060_s7 = sshll.u32 %s3741_s1, 5  ;;  %s4333_s3 = sld [smem:[#allocation27_spill]] }
  0x3f   : > { %s4335_s30 = sld [smem:[#allocation29_spill]]  ;;  %s4338_s12 = sld [smem:[#allocation32_spill]] }
  0x40   : > { %s4340_s14 = sld [smem:[#allocation34_spill]]  ;;  %s4341_s16 = sld [smem:[#allocation35_spill]] }
  0x41   : > { %s4345_s23 = sld [smem:[#allocation38_spill]]  ;;  %s4346_s19 = sld [smem:[#allocation39_spill]] }
  0x42   : > { %s3066_s13 = sshll.u32 %s3741_s1, 6  ;;  %s4349_s10 = sld [smem:[#allocation41_spill]] }
  0x43   : > { %s1083_s26 = scalar_lea.vmem %s4328_s0, %s3744_s9  ;;  %s4350_s2 = sld [smem:[#allocation8_spill]] }
  0x44   : > { %s3774_s8 = scalar_lea.vmem %s4333_s3, %s3060_s7  ;;  %s4348_s3 = sld [smem:[#allocation42_spill]] }
  0x45   : > { %s3783_s25 = scalar_lea.vmem %s4335_s30, %s3060_s7  ;;  %s3800_s21 = scalar_lea.vmem %s4338_s12, %s3060_s7 }
  0x46   : > { %s3809_s29 = scalar_lea.vmem %s4340_s14, %s3060_s7  ;;  %s3818_s24 = scalar_lea.vmem %s4341_s16, %s3060_s7 }
  0x47   : > { %4342 = sst [smem:[#allocation20_spill]] %s3818_s24  ;;  %s1152_s12 = scalar_lea.vmem %s4345_s23, %s3741_s1 }
  0x48   : > { %s3835_s0 = scalar_lea.vmem %s4346_s19, %s3060_s7  ;;  %s4347_s16 = sld [smem:[#allocation40_spill]] }
  0x49   : > { %s3849_s18 = scalar_lea.vmem %s4349_s10, %s3066_s13  ;;  %s3852_s23 = scalar_lea.vmem [#allocation2], %s3734_s4 }
  0x4a   : > { %s1168_s17 = scalar_lea.vmem %s4348_s3, %s3741_s1  ;;  %p3014_p0 = scmp.ne.s32.totalorder %s4350_s2, 0 }
  0x4b   : > { %v1174_v0 = vld [vmem:[%s1083_s26] sm:$0xff] (!%p3014_p0)  ;;  %vm1175_vm0 = vcmask (!%p3014_p0), 261120  }
  0x4c   : > { %1173 = sbr.rel (%p3014_p0) target bundleno = 83 (0x53), region = 128  ;;  %1176 = vst.msk [vmem:[%s3852_s23] sm:$0xff] (!%p3014_p0), %vm1175_vm0, %v1174_v0 }
  0x4e   : > { %s1160_s24 = scalar_lea.vmem %s4347_s16, %s3741_s1 }
  0x53 PF: > { %v3857_v1 = vld [vmem:[%s3852_s23] sm:$0xff]  ;;  %vm1183_vm1 = vcmask 261120   ;;  %v1222_v10 = vld [vmem:[%s3774_s8 + $0x10] sm:$0xff]  ;;  %v3509_v11 = vmov 0.0   ;;  %v1223_v13 = vld [vmem:[%s3774_s8 + $0x18] sm:$0xff]  ;;  %vm3510_vm2 = vmmov 0  }
  0x54   : > { %v1184_v2 = vsel %vm1183_vm1, %v3857_v1, 0.0  ;;  %v1220_v8 = vld [vmem:[%s3774_s8] sm:$0xff]  ;;  %v1221_v9 = vld [vmem:[%s3774_s8 + $0x8] sm:$0xff]  ;;  %3122 = vmatprep.subr.bf16.mxu1 %v3509_v11  ;;  %3126 = vmatprep.mubr.msk.bf16.mxu1 %vm3510_vm2, %v3509_v11  ;;  %v1226_v14 = vpack.c.bf16 %v1223_v13, %v1222_v10  ;;  %s4351_s16 = sld [smem:[#allocation25_spill]]  ;;  %s4353_s8 = sld [smem:[#allocation26_spill]]  ;;  %vm1290_vm5 = vcmask 64512  }
  0x55   : > { %1185 = vadd.xlane.f32.xlu0 %v1184_v2  ;;  %v1225_v12 = vpack.c.bf16 %v1221_v9, %v1220_v8  ;;  %3136 = vmatprep.subr.bf16.mxu0 %v3509_v11  ;;  %s4355_s27 = sld [smem:[#allocation28_spill]]  ;;  %s3511_s20 = smov 96   ;;  %vm1354_vm6 = vcmask 1043456   ;;  %vm1742_vm7 = vcmask 130048   ;;  %vm1744_vm8 = vcmask 195584  }
  0x56   : > { %3138 = vmatprep.mubr.msk.bf16.mxu0 %vm3510_vm2, %v3509_v11  ;;  %s3512_s9 = smov 120   ;;  %s3513_s28 = smov 88   ;;  %vm2585_vm13 = vcmask 523264  }
  0x57   : > { %3123 = vmatpush3.bf16.msra.mxu1 %v1225_v12  ;;  %s3514_s22 = smov 80   ;;  %s3515_s5 = smov 112  }
  0x58   : > { %3124 = vmatprep.subr.bf16.mxu1 %v3509_v11  ;;  %s3516_s30 = smov 72   ;;  %s3517_s2 = smov 104  }
  0x59   : > { %s4357_s13 = sld [smem:[#allocation19_spill]]  ;;  %s3518_s7 = smov 64  }
  0x5a   : > { %s4352_s26 = scalar_lea.vmem %s4351_s16, %s3741_s1  ;;  %s4354_s10 = scalar_lea.vmem %s4353_s8, %s3741_s1 }
  0x5b   : > { %3125 = vmatpush3.bf16.msra.mxu1 %v1226_v14  ;;  %v3015_v23 = vld [vmem:[%s4352_s26] ss:$0 sm:$0xff]  ;;  %s4356_s19 = scalar_lea.vmem %s4355_s27, %s3741_s1  ;;  %s4358_s26 = sld [smem:[#allocation23_spill]] }
  0x5c   : > { %3130 = vmatprep.subr.bf16.mxu1 %v3509_v11  ;;  %v3016_v26 = vld [vmem:[%s4354_s10] ss:$0 sm:$0xff]  ;;  %s3519_s8 = smov 56   ;;  %s3520_s10 = smov 48  }
  0x5d   : > { %v3017_v30 = vld [vmem:[%s4356_s19] ss:$0 sm:$0xff]  ;;  %s3521_s3 = smov 40   ;;  %s3522_s6 = smov 8  }
  0x5e   : > { %s3523_s27 = smov 16   ;;  %s3524_s19 = smov 24  }
  0x5f   : > { %s4360_s16 = sld [smem:[#allocation30_spill]] }
  0x61   : > { %s4359_s4 = scalar_lea.vmem %s4358_s26, %s4357_s13 }
  0x62   : > { %v1179_v50 = vld [vmem:[%s4359_s4] sm:$0xff] }
  0x63   : > { %v3019_v51 = vadd.f32 -1.0, %v1179_v50 }
  0x65   : > { %v1286_v52 = vmul.f32 1e+09, %v3019_v51  ;;  %s4361_s26 = scalar_lea.vmem %s4360_s16, %s3741_s1  ;;  %s4366_s16 = scalar_lea.vmem %s4250_s11, %s3741_s1 }
  0xe2   : > { %v1186_v3 = vpop.xlane.xlu0 %1185 }
  0xe3   : > { %v1188_v4 = vmul.f32 0.03125, %v1186_v3 }
  0xe5   : > { %v1189_v5 = vsub.f32 %v3857_v1, %v1188_v4 }
  0xe7   : > { %v1190_v6 = vmul.f32 %v1189_v5, %v1189_v5  ;;  %v1209_v24 = vmul.f32 %v3015_v23, %v1189_v5 }
  0xe9   : > { %v1191_v7 = vsel %vm1183_vm1, %v1190_v6, 0.0 }
  0xea   : > { %1192 = vadd.xlane.f32.xlu0 %v1191_v7 }
 0x177   : > { %v1193_v15 = vpop.xlane.xlu0 %1192 }
 0x178   : > { %v1195_v16 = vmul.f32 0.032258064, %v1193_v15 }
 0x17a   : > { %3365 = vrsqrt.f32 %v1195_v16  ;;  %vm1198_vm3 = vcmp.eq.f32.partialorder %v1195_v16, inf  ;;  %v1201_v19 = vand.u32 2147483648, %v1195_v16  ;;  %vm1200_vm4 = vcmp.eq.f32.partialorder %v1195_v16, 0.0 }
 0x184   : > { %v3366_v17 = vpop.eup %3365 }
 0x185   : > { %v1197_v18 = vmul.f32 %v3366_v17, %v1195_v16 }
 0x187   : > { %v1199_v20 = vsel %vm1198_vm3, %v1195_v16, %v1197_v18 }
 0x188   : > { %v1202_v21 = vsel %vm1200_vm4, %v1201_v19, %v1199_v20 }
 0x189   : > { %v1210_v22 = vadd.f32 1e-06, %v1202_v21 }
 0x18b   : > { %3367 = vrcp.f32 %v1210_v22 }
 0x195   : > { %v3368_v25 = vpop.eup %3367 }
 0x196   : > { %v1212_v27 = vmul.f32 %v3368_v25, %v1209_v24 }
 0x198   : > { %v1219_v28 = vadd.f32 %v3016_v26, %v1212_v27 }
 0x19a   : > { %v1224_v29 = vpack.c.bf16 %v1219_v28, %v1219_v28 }
 0x19c   : > { %3127 = vmatmul.mubr.msk.bf16.vlgmr.msra.gmra.mrb[0].mxu1 %vm1183_vm1, %v1224_v29 }
 0x19d   : > { %3132 = vmatprep.mubr.msk.bf16.mxu1 %vm3510_vm2, %v3509_v11 }
 0x26f   : > { %v1271_v31 = vpop.f32.mrb[0].mxu1 }
 0x270   : > { %v1272_v32 = vadd.f32 %v3017_v30, %v1271_v31  ;;  %v3128_v33 = vpop.f32.mrb[1].mxu1 }
 0x271   : > { %v1274_v34 = vpop.f32.mrb[2].mxu1 }
 0x272   : > { %v1282_v35 = vmul.f32 0.35355338, %v1272_v32  ;;  %v3893_v36 = vpack.c.bf16 %v1272_v32, %v1272_v32  ;;  %v3129_v37 = vpop.f32.mrb[3].mxu1 }
 0x274   : > { %v1283_v38 = vpack.c.bf16 %v1282_v35, %v1282_v35  ;;  %1288 = vrot.lane.b32.xlu1 %v3893_v36, %s3511_s20 }
 0x276   : > { %1399 = vrot.lane.b32.xlu0 %v1283_v38, %s3512_s9 }
 0x278   : > { %1401 = vrot.lane.b32.xlu1 %v3893_v36, %s3513_s28 }
 0x27c   : > { %1511 = vrot.lane.b32.xlu1 %v3893_v36, %s3514_s22 }
 0x280   : > { %1509 = vrot.lane.b32.xlu1 %v1283_v38, %s3515_s5 }
 0x284   : > { %1621 = vrot.lane.b32.xlu1 %v3893_v36, %s3516_s30 }
 0x288   : > { %1619 = vrot.lane.b32.xlu1 %v1283_v38, %s3517_s2 }
 0x2e6   : > { %v1289_v39 = vpop.permute.xlu1 %1288 }
 0x2e7   : > { %v1295_v40 = vsel %vm1290_vm5, %v1289_v39, 0 }
 0x2e8   : > { %3131 = vmatpush3.bf16.xpose.msra.mxu1 %v1295_v40  ;;  %v1400_v44 = vpop.permute.xlu0 %1399 }
 0x2e9   : > { %3142 = vmatprep.subr.bf16.mxu1 %v3509_v11 }
 0x2ea   : > { %v1402_v41 = vpop.permute.xlu1 %1401 }
 0x2eb   : > { %v1407_v42 = vsel %vm1290_vm5, %v1402_v41, 0 }
 0x2ee   : > { %v1512_v43 = vpop.permute.xlu1 %1511 }
 0x2ef   : > { %3133 = vmatmul.mubr.msk.bf16.vlgmr.msra.gmra.mrb[4].mxu1 %vm1290_vm5, %v1283_v38  ;;  %v1517_v46 = vsel %vm1290_vm5, %v1512_v43, 0 }
 0x2f0   : > { %3143 = vmatpush3.bf16.xpose.msra.mxu1 %v1407_v42  ;;  %3144 = vmatprep.mubr.msk.bf16.mxu1 %vm3510_vm2, %v3509_v11 }
 0x2f1   : > { %3154 = vmatprep.subr.bf16.mxu1 %v3509_v11 }
 0x2f2   : > { %v1510_v45 = vpop.permute.xlu1 %1509 }
 0x2f6   : > { %v1622_v47 = vpop.permute.xlu1 %1621 }
 0x2f7   : > { %3145 = vmatmul.mubr.msk.bf16.vlgmr.msra.gmra.mrb[8].mxu1 %vm1290_vm5, %v1400_v44  ;;  %v1627_v48 = vsel %vm1290_vm5, %v1622_v47, 0 }
 0x2f8   : > { %3155 = vmatpush3.bf16.xpose.msra.mxu1 %v1517_v46  ;;  %3156 = vmatprep.mubr.msk.bf16.mxu1 %vm3510_vm2, %v3509_v11 }
 0x2f9   : > { %3166 = vmatprep.subr.bf16.mxu1 %v3509_v11 }
 0x2fa   : > { %v1620_v49 = vpop.permute.xlu1 %1619 }
 0x2ff   : > { %3157 = vmatmul.mubr.msk.bf16.vlgmr.msra.gmra.mrb[12].mxu1 %vm1290_vm5, %v1510_v45 }
 0x300   : > { %3167 = vmatpush3.bf16.xpose.msra.mxu1 %v1627_v48  ;;  %3168 = vmatprep.mubr.msk.bf16.mxu1 %vm3510_vm2, %v3509_v11 }
 0x301   : > { %3178 = vmatprep.subr.bf16.mxu1 %v3509_v11 }
 0x307   : > { %3169 = vmatmul.mubr.msk.bf16.vlgmr.msra.gmra.mrb[16].mxu1 %vm1290_vm5, %v1620_v49 }
 0x308   : > { %3182 = vmatprep.mubr.msk.bf16.mxu1 %vm3510_vm2, %v3509_v11 }
 0x3c2   : > { %v1331_v53 = vpop.f32.mrb[4].mxu1 }
 0x3c3   : > { %v1332_v54 = vadd.f32 %v1331_v53, %v1286_v52  ;;  %v3134_v55 = vpop.f32.mrb[5].mxu1 }
 0x3c4   : > { %v1334_v56 = vpop.f32.mrb[6].mxu1 }
 0x3c5   : > { %v3135_v57 = vpop.f32.mrb[7].mxu1  ;;  %v1337_v58 = vsel %vm1290_vm5, %v1332_v54, -inf }
 0x3c6   : > { %1338 = vmax.xlane.f32.xlu1 %v1337_v58 }
 0x3ca   : > { %v1443_v59 = vpop.f32.mrb[8].mxu1 }
 0x3cb   : > { %v1444_v60 = vadd.f32 %v1443_v59, %v1286_v52  ;;  %v3146_v61 = vpop.f32.mrb[9].mxu1 }
 0x3cc   : > { %v1446_v62 = vpop.f32.mrb[10].mxu1 }
 0x3cd   : > { %v3147_v63 = vpop.f32.mrb[11].mxu1  ;;  %v1449_v0 = vsel %vm1290_vm5, %v1444_v60, -inf }
 0x3ce   : > { %1450 = vmax.xlane.f32.xlu0 %v1449_v0 }
 0x3d2   : > { %v1553_v2 = vpop.f32.mrb[12].mxu1 }
 0x3d3   : > { %v1554_v3 = vadd.f32 %v1553_v2, %v1286_v52  ;;  %v3158_v4 = vpop.f32.mrb[13].mxu1 }
 0x3d4   : > { %v1556_v5 = vpop.f32.mrb[14].mxu1  ;;  %v1277_v4 = vld [vmem:[%s3783_s25] sm:$0xff] }
 0x3d5   : > { %v3159_v6 = vpop.f32.mrb[15].mxu1  ;;  %v1559_v7 = vsel %vm1290_vm5, %v1554_v3, -inf  ;;  %v1278_v5 = vld [vmem:[%s3783_s25 + $0x8] sm:$0xff] }
 0x3d6   : > { %1560 = vmax.xlane.f32.xlu1 %v1559_v7  ;;  %v1747_v6 = vpack.c.bf16 %v1278_v5, %v1277_v4  ;;  %v1279_v7 = vld [vmem:[%s3783_s25 + $0x10] sm:$0xff] }
 0x3d8   : > { %3179 = vmatpush3.bf16.msra.mxu1 %v1747_v6 }
 0x3d9   : > { %3180 = vmatprep.subr.bf16.mxu1 %v3509_v11 }
 0x3da   : > { %v1663_v8 = vpop.f32.mrb[16].mxu1 }
 0x3db   : > { %v1664_v9 = vadd.f32 %v1663_v8, %v1286_v52  ;;  %v3170_v10 = vpop.f32.mrb[17].mxu1  ;;  %v1280_v8 = vld [vmem:[%s3783_s25 + $0x18] sm:$0xff] }
 0x3dc   : > { %v1666_v12 = vpop.f32.mrb[18].mxu1 }
 0x3dd   : > { %v3171_v13 = vpop.f32.mrb[19].mxu1  ;;  %v1669_v14 = vsel %vm1290_vm5, %v1664_v9, -inf }
 0x3de   : > { %1670 = vmax.xlane.f32.xlu0 %v1669_v14 }
 0x453   : > { %v1339_v15 = vpop.xlane.xlu1 %1338 }
 0x454   : > { %v1340_v16 = vsub.f32 %v1332_v54, %v1339_v15 }
 0x456   : > { %v1341_v17 = vmul.f32 1.442695, %v1340_v16 }
 0x458   : > { %3369 = vpow2.f32 %v1341_v17 }
 0x45b   : > { %v1451_v18 = vpop.xlane.xlu0 %1450 }
 0x45c   : > { %v1452_v19 = vsub.f32 %v1444_v60, %v1451_v18 }
 0x45e   : > { %v1453_v20 = vmul.f32 1.442695, %v1452_v19 }
 0x460   : > { %3371 = vpow2.f32 %v1453_v20 }
 0x462   : > { %v3370_v21 = vpop.eup %3369 }
 0x463   : > { %v1343_v22 = vsel %vm1290_vm5, %v3370_v21, 0.0  ;;  %v1561_v30 = vpop.xlane.xlu1 %1560 }
 0x464   : > { %1344 = vadd.xlane.f32.xlu1 %v1343_v22  ;;  %v1562_v31 = vsub.f32 %v1554_v3, %v1561_v30 }
 0x466   : > { %v1563_v32 = vmul.f32 1.442695, %v1562_v31 }
 0x46a   : > { %v3372_v23 = vpop.eup %3371 }
 0x46b   : > { %v1671_v24 = vpop.xlane.xlu0 %1670  ;;  %v1455_v25 = vsel %vm1290_vm5, %v3372_v23, 0.0 }
 0x46c   : > { %v1672_v26 = vsub.f32 %v1664_v9, %v1671_v24  ;;  %1456 = vadd.xlane.f32.xlu0 %v1455_v25  ;;  %v1748_v9 = vpack.c.bf16 %v1280_v8, %v1279_v7 }
 0x46e   : > { %v1673_v27 = vmul.f32 1.442695, %v1672_v26  ;;  %3181 = vmatpush3.bf16.msra.mxu1 %v1748_v9  ;;  %v3028_v26 = vld [vmem:[%s4361_s26] ss:$0 sm:$0xff] }
 0x46f   : > { %3194 = vmatprep.subr.bf16.mxu1 %v3509_v11 }
 0x470   : > { %3373 = vpow2.f32 %v1673_v27 }
 0x471   : > { %3375 = vpow2.f32 %v1563_v32 }
 0x475   : > { %1349 = vrot.lane.b32.xlu1 %v3893_v36, %s3518_s7  ;;  %s4367_s7 = scalar_lea.vmem %s4254_s15, %s3741_s1 }
 0x476   : > { %v3034_v4 = vld [vmem:[%s4367_s7] ss:$0 sm:$0xff] }
 0x47a   : > { %v3374_v28 = vpop.eup %3373 }
 0x47b   : > { %v1675_v29 = vsel %vm1290_vm5, %v3374_v28, 0.0  ;;  %v3376_v33 = vpop.eup %3375 }
 0x47c   : > { %1676 = vadd.xlane.f32.xlu0 %v1675_v29  ;;  %v1565_v34 = vsel %vm1290_vm5, %v3376_v33, 0.0 }
 0x492   : > { %1461 = vrot.lane.b32.xlu0 %v3893_v36, %s3519_s8  ;;  %s4362_s8 = sld [smem:[#allocation22_spill]] }
 0x499   : > { %1566 = vadd.xlane.f32.xlu1 %v1565_v34 }
 0x4aa   : > { %1571 = vrot.lane.b32.xlu1 %v3893_v36, %s3520_s10  ;;  %s4363_s10 = scalar_lea.vmem %s4362_s8, %s4357_s13  ;;  %s4364_s13 = sld [smem:[#allocation31_spill]] }
 0x4ae   : > { %1681 = vrot.lane.b32.xlu1 %v3893_v36, %s3521_s3 }
 0x4b0   : > { %s4365_s3 = scalar_lea.vmem %s4364_s13, %s3741_s1  ;;  %s4371_s13 = sld [smem:[#allocation24_spill]] }
 0x4f1   : > { %v1345_v35 = vpop.xlane.xlu1 %1344 }
 0x4f2   : > { %3377 = vrcp.f32 %v1345_v35 }
 0x4f5   : > { %v1350_v37 = vpop.permute.xlu1 %1349 }
 0x4f6   : > { %v1356_v38 = vsel %vm1354_vm6, %v1350_v37, 0 }
 0x4f7   : > { %3137 = vmatpush3.bf16.msra.mxu0 %v1356_v38 }
 0x4f8   : > { %3148 = vmatprep.subr.bf16.mxu0 %v3509_v11 }
 0x4f9   : > { %v1457_v40 = vpop.xlane.xlu0 %1456 }
 0x4fa   : > { %3379 = vrcp.f32 %v1457_v40  ;;  %v1892_v40 = vld [vmem:[%s3809_s29] sm:$0xff] }
 0x4fc   : > { %v3378_v39 = vpop.eup %3377 }
 0x4fd   : > { %v1347_v41 = vmul.f32 %v3378_v39, %v3370_v21 }
 0x4ff   : > { %v1348_v42 = vpack.c.bf16 %v1347_v41, %v1347_v41 }
 0x501   : > { %3139 = vmatmul.mubr.msk.bf16.vlgmr.msra.gmra.mrb[0].mxu0 %vm1290_vm5, %v1348_v42  ;;  %v1894_v42 = vld [vmem:[%s3809_s29 + $0x10] sm:$0xff] }
 0x502   : > { %3150 = vmatprep.mubr.msk.bf16.mxu0 %vm3510_vm2, %v3509_v11 }
 0x504   : > { %v3380_v36 = vpop.eup %3379 }
 0x505   : > { %v1459_v44 = vmul.f32 %v3380_v36, %v3372_v23  ;;  %v1895_v36 = vld [vmem:[%s3809_s29 + $0x18] sm:$0xff] }
 0x507   : > { %v1460_v47 = vpack.c.bf16 %v1459_v44, %v1459_v44  ;;  %v1836_v44 = vld [vmem:[%s3800_s21 + $0x8] sm:$0xff] }
 0x509   : > { %v1677_v43 = vpop.xlane.xlu0 %1676 }
 0x50d   : > { %v1462_v45 = vpop.permute.xlu0 %1461 }
 0x50e   : > { %v1467_v46 = vsel %vm1354_vm6, %v1462_v45, 0  ;;  %v1837_v45 = vld [vmem:[%s3800_s21 + $0x10] sm:$0xff] }
 0x50f   : > { %3149 = vmatpush3.bf16.msra.mxu0 %v1467_v46  ;;  %v1898_v46 = vpack.c.bf16 %v1895_v36, %v1894_v42 }
 0x510   : > { %3160 = vmatprep.subr.bf16.mxu0 %v3509_v11 }
 0x512   : > { %3151 = vmatmul.mubr.msk.bf16.vlgmr.msra.gmra.mrb[4].mxu0 %vm1290_vm5, %v1460_v47  ;;  %v1178_v47 = vld [vmem:[%s4363_s10] sm:$0xff] }
 0x513   : > { %3162 = vmatprep.mubr.msk.bf16.mxu0 %vm3510_vm2, %v3509_v11 }
 0x526   : > { %v1567_v48 = vpop.xlane.xlu1 %1566 }
 0x527   : > { %3381 = vrcp.f32 %v1567_v48 }
 0x528   : > { %3383 = vrcp.f32 %v1677_v43  ;;  %v1835_v43 = vld [vmem:[%s3800_s21] sm:$0xff] }
 0x529   : > { %v1840_v48 = vpack.c.bf16 %v1836_v44, %v1835_v43 }
 0x52a   : > { %v1572_v49 = vpop.permute.xlu1 %1571 }
 0x52b   : > { %v1577_v50 = vsel %vm1354_vm6, %v1572_v49, 0  ;;  %v1838_v49 = vld [vmem:[%s3800_s21 + $0x18] sm:$0xff]  ;;  %s4368_s21 = sld [smem:[#allocation33_spill]] }
 0x52c   : > { %3161 = vmatpush3.bf16.msra.mxu0 %v1577_v50  ;;  %v1841_v50 = vpack.c.bf16 %v1838_v49, %v1837_v45 }
 0x52d   : > { %3172 = vmatprep.subr.bf16.mxu0 %v3509_v11 }
 0x52e   : > { %v1682_v53 = vpop.permute.xlu1 %1681 }
 0x52f   : > { %v1687_v56 = vsel %vm1354_vm6, %v1682_v53, 0 }
 0x531   : > { %v3382_v51 = vpop.eup %3381 }
 0x532   : > { %v1569_v52 = vmul.f32 %v3382_v51, %v3376_v33  ;;  %v3384_v55 = vpop.eup %3383  ;;  %v1896_v51 = vpack.c.bf16 %v1178_v47, %v1178_v47 }
 0x533   : > { %v1679_v57 = vmul.f32 %v3384_v55, %v3374_v28 }
 0x534   : > { %v1570_v54 = vpack.c.bf16 %v1569_v52, %v1569_v52 }
 0x535   : > { %v1680_v58 = vpack.c.bf16 %v1679_v57, %v1679_v57 }
 0x536   : > { %3163 = vmatmul.mubr.msk.bf16.vlgmr.msra.gmra.mrb[8].mxu0 %vm1290_vm5, %v1570_v54 }
 0x537   : > { %3173 = vmatpush3.bf16.msra.mxu0 %v1687_v56  ;;  %3174 = vmatprep.mubr.msk.bf16.mxu0 %vm3510_vm2, %v3509_v11 }
 0x538   : > { %3186 = vmatprep.subr.bf16.mxu0 %v3509_v11 }
 0x53e   : > { %3175 = vmatmul.mubr.msk.bf16.vlgmr.msra.gmra.mrb[12].mxu0 %vm1290_vm5, %v1680_v58 }
 0x53f   : > { %3190 = vmatprep.mubr.msk.bf16.mxu0 %vm3510_vm2, %v3509_v11  ;;  %3187 = vmatpush3.bf16.msra.mxu0 %v1840_v48 }
 0x540   : > { %3188 = vmatprep.subr.bf16.mxu0 %v3509_v11 }
 0x543   : > { %3189 = vmatpush3.bf16.msra.mxu0 %v1841_v50 }
 0x544   : > { %3202 = vmatprep.subr.bf16.mxu0 %v3509_v11 }
 0x5d4   : > { %v1392_v59 = vpop.f32.mrb[0].mxu0 }
 0x5d5   : > { %v3140_v60 = vpop.f32.mrb[1].mxu0 }
 0x5d6   : > { %v1395_v61 = vpop.f32.mrb[2].mxu0  ;;  %v3030_v60 = vld [vmem:[%s4365_s3] ss:$0 sm:$0xff] }
 0x5d7   : > { %v3141_v62 = vpop.f32.mrb[3].mxu0 }
 0x5e5   : > { %v1503_v63 = vpop.f32.mrb[4].mxu0 }
 0x5e6   : > { %1730 = vrot.lane.b32.xlu0 %v1503_v63, %s3522_s6  ;;  %v3152_v0 = vpop.f32.mrb[5].mxu0  ;;  %v3031_v63 = vld [vmem:[%s4366_s16] ss:$0 sm:$0xff] }
 0x5e7   : > { %v1506_v2 = vpop.f32.mrb[6].mxu0 }
 0x5e8   : > { %v3153_v3 = vpop.f32.mrb[7].mxu0 }
 0x609   : > { %v1613_v10 = vpop.f32.mrb[8].mxu0 }
 0x60a   : > { %1734 = vrot.lane.b32.xlu1 %v1613_v10, %s3523_s27  ;;  %v3164_v12 = vpop.f32.mrb[9].mxu0 }
 0x60b   : > { %v1616_v13 = vpop.f32.mrb[10].mxu0 }
 0x60c   : > { %v3165_v14 = vpop.f32.mrb[11].mxu0 }
 0x611   : > { %v1723_v15 = vpop.f32.mrb[12].mxu0 }
 0x612   : > { %1738 = vrot.lane.b32.xlu0 %v1723_v15, %s3524_s19  ;;  %v3176_v16 = vpop.f32.mrb[13].mxu0 }
 0x613   : > { %v1726_v17 = vpop.f32.mrb[14].mxu0 }
 0x614   : > { %v3177_v18 = vpop.f32.mrb[15].mxu0 }
 0x658   : > { %v1731_v19 = vpop.permute.xlu0 %1730 }
 0x659   : > { %v1741_v21 = vsel %vm1290_vm5, %v1392_v59, %v1731_v19 }
 0x67c   : > { %v1735_v20 = vpop.permute.xlu1 %1734 }
 0x67d   : > { %v1743_v22 = vsel %vm1742_vm7, %v1741_v21, %v1735_v20 }
 0x684   : > { %v1739_v23 = vpop.permute.xlu0 %1738 }
 0x685   : > { %v1745_v24 = vsel %vm1744_vm8, %v1743_v22, %v1739_v23 }
 0x686   : > { %v1746_v25 = vpack.c.bf16 %v1745_v24, %v1745_v24 }
 0x688   : > { %3183 = vmatmul.mubr.msk.bf16.vlgmr.msra.gmra.mrb[20].mxu1 %vm1183_vm1, %v1746_v25 }
 0x689   : > { %3198 = vmatprep.mubr.msk.bf16.mxu1 %vm3510_vm2, %v3509_v11 }
 0x75b   : > { %v1792_v27 = vpop.f32.mrb[20].mxu1 }
 0x75c   : > { %v1793_v28 = vadd.f32 %v3028_v26, %v1792_v27  ;;  %v3184_v29 = vpop.f32.mrb[21].mxu1 }
 0x75d   : > { %v1795_v30 = vpop.f32.mrb[22].mxu1 }
 0x75e   : > { %v3984_v31 = vadd.f32 %v1793_v28, %v3857_v1  ;;  %v3185_v32 = vpop.f32.mrb[23].mxu1  ;;  %v1893_v1 = vld [vmem:[%s3809_s29 + $0x8] sm:$0xff]  ;;  %s4369_s29 = scalar_lea.vmem %s4368_s21, %s3741_s1  ;;  %v1960_v30 = vlaneseq }
 0x75f   : > { %v1897_v41 = vpack.c.bf16 %v1893_v1, %v1892_v40  ;;  %v3032_v13 = vld [vmem:[%s4369_s29] ss:$0 sm:$0xff] }
 0x760   : > { %v1801_v33 = vsel %vm1183_vm1, %v3984_v31, 0.0 }
 0x761   : > { %1802 = vadd.xlane.f32.xlu1 %v1801_v33  ;;  %3195 = vmatpush3.bf16.msra.mxu1 %v1897_v41 }
 0x762   : > { %3196 = vmatprep.subr.bf16.mxu1 %v3509_v11 }
 0x765   : > { %3197 = vmatpush3.bf16.msra.mxu1 %v1898_v46 }
 0x766   : > { %3208 = vmatprep.subr.bf16.mxu1 %v3509_v11 }
 0x768   : > { %3199 = vmatmul.mubr.msk.bf16.vlgmr.msra.gmra.mrb[24].mxu1 %vm1183_vm1, %v1896_v51 }
 0x769   : > { %3210 = vmatprep.mubr.msk.bf16.mxu1 %vm3510_vm2, %v3509_v11 }
 0x7ee   : > { %v1803_v34 = vpop.xlane.xlu1 %1802 }
 0x7ef   : > { %v1804_v35 = vmul.f32 0.03125, %v1803_v34  ;;  %v1961_v34 = vshrl.u32 %v1960_v30, 7 }
 0x7f1   : > { %v1805_v37 = vsub.f32 %v3984_v31, %v1804_v35 }
 0x7f3   : > { %v1806_v38 = vmul.f32 %v1805_v37, %v1805_v37  ;;  %v1824_v61 = vmul.f32 %v3030_v60, %v1805_v37  ;;  %v1962_v37 = vsub.s32 0, %v1961_v34 }
 0x7f5   : > { %v1807_v39 = vsel %vm1183_vm1, %v1806_v38, 0.0 }
 0x7f6   : > { %1808 = vadd.xlane.f32.xlu0 %v1807_v39 }
 0x83b   : > { %v1943_v5 = vpop.f32.mrb[24].mxu1 }
 0x83c   : > { %v1944_v6 = vadd.f32 %v3034_v4, %v1943_v5  ;;  %v3200_v7 = vpop.f32.mrb[25].mxu1 }
 0x83d   : > { %v1946_v8 = vpop.f32.mrb[26].mxu1 }
 0x83e   : > { %v4028_v9 = vpack.c.bf16 %v1944_v6, %v1944_v6  ;;  %v3201_v10 = vpop.f32.mrb[27].mxu1 }
 0x840   : > { %2075 = vrot.lane.b32.xlu0 %v4028_v9, %s3512_s9  ;;  %v1969_v12 = vsel %vm1290_vm5, %v4028_v9, 0 }
 0x883   : > { %v1809_v52 = vpop.xlane.xlu0 %1808 }
 0x884   : > { %v1810_v53 = vmul.f32 0.032258064, %v1809_v52 }
 0x886   : > { %3385 = vrsqrt.f32 %v1810_v53  ;;  %vm1813_vm9 = vcmp.eq.f32.partialorder %v1810_v53, inf  ;;  %v1816_v56 = vand.u32 2147483648, %v1810_v53  ;;  %vm1815_vm10 = vcmp.eq.f32.partialorder %v1810_v53, 0.0 }
 0x890   : > { %v3386_v54 = vpop.eup %3385 }
 0x891   : > { %v1812_v55 = vmul.f32 %v3386_v54, %v1810_v53 }
 0x893   : > { %v1814_v57 = vsel %vm1813_vm9, %v1810_v53, %v1812_v55 }
 0x894   : > { %v1817_v58 = vsel %vm1815_vm10, %v1816_v56, %v1814_v57 }
 0x895   : > { %v1825_v59 = vadd.f32 1e-06, %v1817_v58 }
 0x897   : > { %3387 = vrcp.f32 %v1825_v59 }
 0x8a1   : > { %v3388_v62 = vpop.eup %3387 }
 0x8a2   : > { %v1827_v0 = vmul.f32 %v3388_v62, %v1824_v61 }
 0x8a4   : > { %v1834_v2 = vadd.f32 %v3031_v63, %v1827_v0 }
 0x8a6   : > { %v1839_v3 = vpack.c.bf16 %v1834_v2, %v1834_v2 }
 0x8a8   : > { %3191 = vmatmul.mubr.msk.bf16.vlgmr.msra.gmra.mrb[16].mxu0 %vm1183_vm1, %v1839_v3 }
 0x8a9   : > { %3204 = vmatprep.mubr.msk.bf16.mxu0 %vm3510_vm2, %v3509_v11  ;;  %3203 = vmatpush3.bf16.xpose.msra.mxu0 %v1969_v12 }
 0x8aa   : > { %3214 = vmatprep.subr.bf16.mxu0 %v3509_v11 }
 0x8b2   : > { %v2076_v20 = vpop.permute.xlu0 %2075 }
 0x8b3   : > { %v2081_v22 = vsel %vm1290_vm5, %v2076_v20, 0 }
 0x97b   : > { %v1886_v14 = vpop.f32.mrb[16].mxu0 }
 0x97c   : > { %v1887_v15 = vadd.f32 %v3032_v13, %v1886_v14  ;;  %v3192_v16 = vpop.f32.mrb[17].mxu0 }
 0x97d   : > { %v1889_v17 = vpop.f32.mrb[18].mxu0 }
 0x97e   : > { %v1954_v18 = vmul.f32 0.35355338, %v1887_v15  ;;  %v3193_v19 = vpop.f32.mrb[19].mxu0 }
 0x980   : > { %v1955_v21 = vpack.c.bf16 %v1954_v18, %v1954_v18 }
 0x982   : > { %2073 = vrot.lane.b32.xlu1 %v1955_v21, %s3512_s9  ;;  %2183 = vrot.lane.b32.xlu0 %v1955_v21, %s3515_s5  ;;  %s4370_s9 = sld [smem:[#allocation18_spill]] }
 0x983   : > { %3205 = vmatmul.mubr.msk.bf16.vlgmr.msra.gmra.mrb[20].mxu0 %vm1290_vm5, %v1955_v21 }
 0x984   : > { %3215 = vmatpush3.bf16.xpose.msra.mxu0 %v2081_v22  ;;  %3216 = vmatprep.mubr.msk.bf16.mxu0 %vm3510_vm2, %v3509_v11 }
 0x985   : > { %3226 = vmatprep.subr.bf16.mxu0 %v3509_v11 }
 0x986   : > { %2185 = vrot.lane.b32.xlu1 %v4028_v9, %s3515_s5  ;;  %2293 = vrot.lane.b32.xlu0 %v1955_v21, %s3517_s2 }
 0x988   : > { %s4372_s3 = scalar_lea.vmem %s4371_s13, %s4370_s9 }
 0x989   : > { %v1180_v32 = vld [vmem:[%s4372_s3] sm:$0x1] }
 0x98a   : > { %2295 = vrot.lane.b32.xlu1 %v4028_v9, %s3517_s2  ;;  %v3036_v33 = vadd.f32 -1.0, %v1180_v32 }
 0x98c   : > { %v1958_v35 = vmul.f32 1e+09, %v3036_v33 }
 0x98e   : > { %v1963_v38 = vrot.slane %v1958_v35, %v1962_v37 }
 0x9f4   : > { %v2074_v23 = vpop.permute.xlu1 %2073  ;;  %v2184_v27 = vpop.permute.xlu0 %2183 }
 0x9f5   : > { %3217 = vmatmul.mubr.msk.bf16.vlgmr.msra.gmra.mrb[24].mxu0 %vm1290_vm5, %v2074_v23 }
 0x9f6   : > { %3228 = vmatprep.mubr.msk.bf16.mxu0 %vm3510_vm2, %v3509_v11 }
 0x9f8   : > { %v2186_v24 = vpop.permute.xlu1 %2185  ;;  %v2294_v29 = vpop.permute.xlu0 %2293 }
 0x9f9   : > { %v2191_v25 = vsel %vm1290_vm5, %v2186_v24, 0 }
 0x9fa   : > { %3227 = vmatpush3.bf16.xpose.msra.mxu0 %v2191_v25 }
 0x9fb   : > { %3238 = vmatprep.subr.bf16.mxu0 %v3509_v11 }
 0x9fc   : > { %v2296_v26 = vpop.permute.xlu1 %2295 }
 0x9fd   : > { %v2301_v28 = vsel %vm1290_vm5, %v2296_v26, 0 }
 0xa01   : > { %3229 = vmatmul.mubr.msk.bf16.vlgmr.msra.gmra.mrb[28].mxu0 %vm1290_vm5, %v2184_v27 }
 0xa02   : > { %3239 = vmatpush3.bf16.xpose.msra.mxu0 %v2301_v28  ;;  %3240 = vmatprep.mubr.msk.bf16.mxu0 %vm3510_vm2, %v3509_v11 }
 0xa03   : > { %3250 = vmatprep.subr.bf16.mxu0 %v3509_v11 }
 0xa09   : > { %3241 = vmatmul.mubr.msk.bf16.vlgmr.msra.gmra.mrb[32].mxu0 %vm1290_vm5, %v2294_v29 }
 0xa0a   : > { %3254 = vmatprep.mubr.msk.bf16.mxu0 %vm3510_vm2, %v3509_v11 }
 0xa56   : > { %v2005_v39 = vpop.f32.mrb[20].mxu0 }
 0xa57   : > { %v2006_v40 = vadd.f32 %v2005_v39, %v1963_v38  ;;  %v3206_v1 = vpop.f32.mrb[21].mxu0 }
 0xa58   : > { %v2008_v41 = vpop.f32.mrb[22].mxu0 }
 0xa59   : > { %v3207_v42 = vpop.f32.mrb[23].mxu0  ;;  %v2011_v36 = vsel %vm1290_vm5, %v2006_v40, -inf }
 0xa5a   : > { %2012 = vmax.xlane.f32.xlu1 %v2011_v36 }
 0xac8   : > { %v2117_v43 = vpop.f32.mrb[24].mxu0 }
 0xac9   : > { %v2118_v44 = vadd.f32 %v2117_v43, %v1963_v38  ;;  %v3218_v45 = vpop.f32.mrb[25].mxu0 }
 0xaca   : > { %v2120_v46 = vpop.f32.mrb[26].mxu0 }
 0xacb   : > { %v3219_v47 = vpop.f32.mrb[27].mxu0  ;;  %v2123_v48 = vsel %vm1290_vm5, %v2118_v44, -inf }
 0xacc   : > { %2124 = vmax.xlane.f32.xlu0 %v2123_v48 }
 0xad4   : > { %v2227_v49 = vpop.f32.mrb[28].mxu0 }
 0xad5   : > { %v2228_v50 = vadd.f32 %v2227_v49, %v1963_v38  ;;  %v3230_v51 = vpop.f32.mrb[29].mxu0 }
 0xad6   : > { %v2230_v52 = vpop.f32.mrb[30].mxu0 }
 0xad7   : > { %v3231_v53 = vpop.f32.mrb[31].mxu0  ;;  %v2233_v54 = vsel %vm1290_vm5, %v2228_v50, -inf }
 0xad8   : > { %2234 = vmax.xlane.f32.xlu0 %v2233_v54 }
 0xadc   : > { %v2337_v55 = vpop.f32.mrb[32].mxu0 }
 0xadd   : > { %v2338_v56 = vadd.f32 %v2337_v55, %v1963_v38  ;;  %v3242_v57 = vpop.f32.mrb[33].mxu0 }
 0xade   : > { %v2340_v58 = vpop.f32.mrb[34].mxu0 }
 0xadf   : > { %v3243_v59 = vpop.f32.mrb[35].mxu0  ;;  %v2343_v60 = vsel %vm1290_vm5, %v2338_v56, -inf }
 0xae0   : > { %2344 = vmax.xlane.f32.xlu1 %v2343_v60 }
 0xae7   : > { %v2013_v61 = vpop.xlane.xlu1 %2012 }
 0xae8   : > { %v2014_v62 = vsub.f32 %v2006_v40, %v2013_v61 }
 0xaea   : > { %v2015_v63 = vmul.f32 1.442695, %v2014_v62 }
 0xaec   : > { %3389 = vpow2.f32 %v2015_v63 }
 0xaf6   : > { %v3390_v0 = vpop.eup %3389 }
 0xaf7   : > { %v2017_v2 = vsel %vm1290_vm5, %v3390_v0, 0.0 }
 0xaf8   : > { %2018 = vadd.xlane.f32.xlu0 %v2017_v2 }
 0xb59   : > { %v2125_v3 = vpop.xlane.xlu0 %2124 }
 0xb5a   : > { %v2126_v4 = vsub.f32 %v2118_v44, %v2125_v3 }
 0xb5c   : > { %v2127_v5 = vmul.f32 1.442695, %v2126_v4 }
 0xb5e   : > { %3391 = vpow2.f32 %v2127_v5 }
 0xb65   : > { %v2235_v6 = vpop.xlane.xlu0 %2234 }
 0xb66   : > { %v2236_v7 = vsub.f32 %v2228_v50, %v2235_v6 }
 0xb68   : > { %v3392_v8 = vpop.eup %3391  ;;  %v2237_v10 = vmul.f32 1.442695, %v2236_v7 }
 0xb69   : > { %v2129_v12 = vsel %vm1290_vm5, %v3392_v8, 0.0 }
 0xb6a   : > { %3393 = vpow2.f32 %v2237_v10  ;;  %2130 = vadd.xlane.f32.xlu1 %v2129_v12 }
 0xb6d   : > { %v2345_v15 = vpop.xlane.xlu1 %2344 }
 0xb6e   : > { %v2346_v16 = vsub.f32 %v2338_v56, %v2345_v15 }
 0xb70   : > { %v2347_v17 = vmul.f32 1.442695, %v2346_v16 }
 0xb72   : > { %3395 = vpow2.f32 %v2347_v17 }
 0xb74   : > { %v3394_v13 = vpop.eup %3393 }
 0xb75   : > { %v2239_v14 = vsel %vm1290_vm5, %v3394_v13, 0.0 }
 0xb76   : > { %2240 = vadd.xlane.f32.xlu0 %v2239_v14 }
 0xb7b   : > { %2135 = vrot.lane.b32.xlu1 %v4028_v9, %s3513_s28 }
 0xb7c   : > { %v3396_v18 = vpop.eup %3395 }
 0xb7d   : > { %v2349_v19 = vsel %vm1290_vm5, %v3396_v18, 0.0 }
 0xb85   : > { %v2019_v20 = vpop.xlane.xlu0 %2018 }
 0xb86   : > { %3397 = vrcp.f32 %v2019_v20 }
 0xb8c   : > { %2024 = vrot.lane.b32.xlu0 %v4028_v9, %s3511_s20  ;;  %s4373_s20 = sld [smem:[#allocation20_spill]] }
 0xb90   : > { %2355 = vrot.lane.b32.xlu0 %v4028_v9, %s3516_s30  ;;  %v3398_v22 = vpop.eup %3397  ;;  %s4374_s30 = sld [smem:[#allocation36_spill]] }
 0xb91   : > { %v2021_v24 = vmul.f32 %v3398_v22, %v3390_v0 }
 0xb92   : > { %v1949_v51 = vld [vmem:[%s4373_s20] sm:$0xff]  ;;  %v1950_v52 = vld [vmem:[%s4373_s20 + $0x8] sm:$0xff]  ;;  %v1951_v54 = vld [vmem:[%s4373_s20 + $0x10] sm:$0xff] }
 0xb93   : > { %v2022_v28 = vpack.c.bf16 %v2021_v24, %v2021_v24  ;;  %v2419_v53 = vpack.c.bf16 %v1950_v52, %v1949_v51  ;;  %v1952_v55 = vld [vmem:[%s4373_s20 + $0x18] sm:$0xff]  ;;  %v2507_v24 = vld [vmem:[%s3835_s0] sm:$0xff]  ;;  %v2518_v52 = vld [vmem:[%s3849_s18 + $0x30] sm:$0xff] }
 0xb94   : > { %v2420_v56 = vpack.c.bf16 %v1952_v55, %v1951_v54  ;;  %v3049_v55 = vld [vmem:[%s1160_s24] ss:$0 sm:$0xff]  ;;  %s4381_s24 = sld [smem:[#allocation8_spill]] }
 0xb95   : > { %3251 = vmatpush3.bf16.msra.mxu0 %v2419_v53  ;;  %v2519_v53 = vld [vmem:[%s3849_s18 + $0x38] sm:$0xff] }
 0xb96   : > { %3252 = vmatprep.subr.bf16.mxu0 %v3509_v11  ;;  %v2578_v54 = vpack.c.bf16 %v2519_v53, %v2518_v52 }
 0xb99   : > { %3253 = vmatpush3.bf16.msra.mxu0 %v2420_v56 }
 0xb9a   : > { %3266 = vmatprep.subr.bf16.mxu0 %v3509_v11  ;;  %p3053_p1 = scmp.ne.s32.totalorder %s4381_s24, 1 }
 0xb9b   : > { %s4382_s21 = sld [smem:[#allocation43_spill]] (!%p3053_p1)  ;;  %s4383_s5 = sld [smem:[#allocation44_spill]] (!%p3053_p1) }
 0xb9f   : > { %2350 = vadd.xlane.f32.xlu1 %v2349_v19 }
 0xbb0   : > { %2245 = vrot.lane.b32.xlu1 %v4028_v9, %s3514_s22 }
 0xbf7   : > { %v2131_v21 = vpop.xlane.xlu1 %2130 }
 0xbf8   : > { %3399 = vrcp.f32 %v2131_v21 }
 0xbfb   : > { %v2136_v27 = vpop.permute.xlu1 %2135 }
 0xbfc   : > { %v2141_v30 = vsel %vm1354_vm6, %v2136_v27, 0  ;;  %v2510_v27 = vld [vmem:[%s3835_s0 + $0x18] sm:$0xff] }
 0xc02   : > { %v3400_v29 = vpop.eup %3399 }
 0xc03   : > { %v2241_v23 = vpop.xlane.xlu0 %2240  ;;  %v2133_v9 = vmul.f32 %v3400_v29, %v3392_v8  ;;  %v2512_v29 = vld [vmem:[%s3849_s18] sm:$0xff] }
 0xc04   : > { %3401 = vrcp.f32 %v2241_v23 }
 0xc05   : > { %v2134_v32 = vpack.c.bf16 %v2133_v9, %v2133_v9  ;;  %v2514_v9 = vld [vmem:[%s3849_s18 + $0x10] sm:$0xff] }
 0xc07   : > { %v2025_v25 = vpop.permute.xlu0 %2024 }
 0xc08   : > { %v2030_v26 = vsel %vm1354_vm6, %v2025_v25, 0  ;;  %v2509_v25 = vld [vmem:[%s3835_s0 + $0x10] sm:$0xff] }
 0xc09   : > { %3209 = vmatpush3.bf16.msra.mxu1 %v2030_v26 }
 0xc0a   : > { %3220 = vmatprep.subr.bf16.mxu1 %v3509_v11 }
 0xc0b   : > { %v2356_v39 = vpop.permute.xlu0 %2355 }
 0xc0c   : > { %3211 = vmatmul.mubr.msk.bf16.vlgmr.msra.gmra.mrb[28].mxu1 %vm1290_vm5, %v2022_v28  ;;  %v2361_v1 = vsel %vm1354_vm6, %v2356_v39, 0  ;;  %v2523_v28 = vpack.c.bf16 %v2510_v27, %v2509_v25  ;;  %v3055_v25 = vld [vmem:[%s4383_s5] ss:$0 sm:$0xff] (!%p3053_p1) }
 0xc0d   : > { %3221 = vmatpush3.bf16.msra.mxu1 %v2141_v30  ;;  %3222 = vmatprep.mubr.msk.bf16.mxu1 %vm3510_vm2, %v3509_v11  ;;  %v2513_v30 = vld [vmem:[%s3849_s18 + $0x8] sm:$0xff] }
 0xc0e   : > { %3232 = vmatprep.subr.bf16.mxu1 %v3509_v11  ;;  %v3402_v33 = vpop.eup %3401 }
 0xc0f   : > { %v2243_v35 = vmul.f32 %v3402_v33, %v3394_v13  ;;  %v2515_v33 = vld [vmem:[%s3849_s18 + $0x18] sm:$0xff] }
 0xc11   : > { %v2244_v40 = vpack.c.bf16 %v2243_v35, %v2243_v35 }
 0xc14   : > { %3223 = vmatmul.mubr.msk.bf16.vlgmr.msra.gmra.mrb[32].mxu1 %vm1290_vm5, %v2134_v32  ;;  %v2575_v32 = vpack.c.bf16 %v2513_v30, %v2512_v29 }
 0xc15   : > { %3234 = vmatprep.mubr.msk.bf16.mxu1 %vm3510_vm2, %v3509_v11 }
 0xc2c   : > { %v2351_v34 = vpop.xlane.xlu1 %2350 }
 0xc2d   : > { %3403 = vrcp.f32 %v2351_v34  ;;  %v2576_v34 = vpack.c.bf16 %v2515_v33, %v2514_v9 }
 0xc30   : > { %v2246_v37 = vpop.permute.xlu1 %2245 }
 0xc31   : > { %v2251_v38 = vsel %vm1354_vm6, %v2246_v37, 0 }
 0xc32   : > { %3233 = vmatpush3.bf16.msra.mxu1 %v2251_v38 }
 0xc33   : > { %3244 = vmatprep.subr.bf16.mxu1 %v3509_v11 }
 0xc35   : > { %3235 = vmatmul.mubr.msk.bf16.vlgmr.msra.gmra.mrb[36].mxu1 %vm1290_vm5, %v2244_v40 }
 0xc36   : > { %3245 = vmatpush3.bf16.msra.mxu1 %v2361_v1  ;;  %3246 = vmatprep.mubr.msk.bf16.mxu1 %vm3510_vm2, %v3509_v11 }
 0xc37   : > { %v3404_v41 = vpop.eup %3403  ;;  %3258 = vmatprep.subr.bf16.mxu1 %v3509_v11 }
 0xc38   : > { %v2353_v42 = vmul.f32 %v3404_v41, %v3396_v18 }
 0xc3a   : > { %v2354_v36 = vpack.c.bf16 %v2353_v42, %v2353_v42 }
 0xc3d   : > { %3247 = vmatmul.mubr.msk.bf16.vlgmr.msra.gmra.mrb[40].mxu1 %vm1290_vm5, %v2354_v36 }
 0xc3e   : > { %3262 = vmatprep.mubr.msk.bf16.mxu1 %vm3510_vm2, %v3509_v11 }
 0xcdf   : > { %v2066_v43 = vpop.f32.mrb[28].mxu1 }
 0xce0   : > { %v3212_v44 = vpop.f32.mrb[29].mxu1 }
 0xce1   : > { %v2069_v45 = vpop.f32.mrb[30].mxu1 }
 0xce2   : > { %v3213_v46 = vpop.f32.mrb[31].mxu1  ;;  %v3048_v45 = vld [vmem:[%s1152_s12] ss:$0 sm:$0xff] }
 0xce7   : > { %v2177_v47 = vpop.f32.mrb[32].mxu1 }
 0xce8   : > { %2404 = vrot.lane.b32.xlu1 %v2177_v47, %s3522_s6  ;;  %v3224_v48 = vpop.f32.mrb[33].mxu1  ;;  %s4375_s6 = scalar_lea.vmem %s4374_s30, %s3741_s1 }
 0xce9   : > { %v2180_v49 = vpop.f32.mrb[34].mxu1  ;;  %v3045_v10 = vld [vmem:[%s4375_s6] ss:$0 sm:$0xff] }
 0xcea   : > { %v3225_v50 = vpop.f32.mrb[35].mxu1  ;;  %v2516_v49 = vld [vmem:[%s3849_s18 + $0x20] sm:$0xff] }
 0xceb   : > { %v2517_v50 = vld [vmem:[%s3849_s18 + $0x28] sm:$0xff] }
 0xcec   : > { %v2577_v51 = vpack.c.bf16 %v2517_v50, %v2516_v49 }
 0xd08   : > { %v2287_v57 = vpop.f32.mrb[36].mxu1 }
 0xd09   : > { %2408 = vrot.lane.b32.xlu0 %v2287_v57, %s3523_s27  ;;  %v3236_v58 = vpop.f32.mrb[37].mxu1 }
 0xd0a   : > { %v2290_v59 = vpop.f32.mrb[38].mxu1 }
 0xd0b   : > { %v3237_v60 = vpop.f32.mrb[39].mxu1 }
 0xd10   : > { %v2397_v61 = vpop.f32.mrb[40].mxu1 }
 0xd11   : > { %2412 = vrot.lane.b32.xlu1 %v2397_v61, %s3524_s19  ;;  %v3248_v62 = vpop.f32.mrb[41].mxu1  ;;  %s4376_s19 = sld [smem:[#allocation37_spill]] }
 0xd12   : > { %v2400_v63 = vpop.f32.mrb[42].mxu1 }
 0xd13   : > { %v3249_v0 = vpop.f32.mrb[43].mxu1 }
 0xd17   : > { %s4377_s25 = scalar_lea.vmem %s4376_s19, %s3741_s1 }
 0xd18   : > { %v3047_v36 = vld [vmem:[%s4377_s25] ss:$0 sm:$0xff] }
 0xd5a   : > { %v2405_v2 = vpop.permute.xlu1 %2404 }
 0xd5b   : > { %v2415_v4 = vsel %vm1290_vm5, %v2066_v43, %v2405_v2 }
 0xd7b   : > { %v2409_v3 = vpop.permute.xlu0 %2408 }
 0xd7c   : > { %v2416_v5 = vsel %vm1742_vm7, %v2415_v4, %v2409_v3 }
 0xd83   : > { %v2413_v6 = vpop.permute.xlu1 %2412 }
 0xd84   : > { %v2417_v7 = vsel %vm1744_vm8, %v2416_v5, %v2413_v6 }
 0xd85   : > { %v2418_v8 = vpack.c.bf16 %v2417_v7, %v2417_v7 }
 0xd87   : > { %3255 = vmatmul.mubr.msk.bf16.vlgmr.msra.gmra.mrb[36].mxu0 %vm1183_vm1, %v2418_v8 }
 0xd88   : > { %3274 = vmatprep.mubr.msk.bf16.mxu0 %vm3510_vm2, %v3509_v11  ;;  %3267 = vmatpush3.bf16.msra.mxu0 %v2575_v32 }
 0xd89   : > { %3268 = vmatprep.subr.bf16.mxu0 %v3509_v11 }
 0xd8c   : > { %3269 = vmatpush3.bf16.msra.mxu0 %v2576_v34 }
 0xd8d   : > { %3270 = vmatprep.subr.bf16.mxu0 %v3509_v11 }
 0xd90   : > { %3271 = vmatpush3.bf16.msra.mxu0 %v2577_v51 }
 0xd91   : > { %3272 = vmatprep.subr.bf16.mxu0 %v3509_v11 }
 0xd94   : > { %3273 = vmatpush3.bf16.msra.mxu0 %v2578_v54 }
 0xe5a   : > { %v2464_v12 = vpop.f32.mrb[36].mxu0 }
 0xe5b   : > { %v2465_v13 = vadd.f32 %v3045_v10, %v2464_v12  ;;  %v3256_v14 = vpop.f32.mrb[37].mxu0 }
 0xe5c   : > { %v2467_v15 = vpop.f32.mrb[38].mxu0 }
 0xe5d   : > { %v4127_v16 = vadd.f32 %v2465_v13, %v3984_v31  ;;  %v3257_v17 = vpop.f32.mrb[39].mxu0  ;;  %v2508_v31 = vld [vmem:[%s3835_s0 + $0x8] sm:$0xff] }
 0xe5e   : > { %v2522_v26 = vpack.c.bf16 %v2508_v31, %v2507_v24 }
 0xe5f   : > { %v2473_v18 = vsel %vm1183_vm1, %v4127_v16, 0.0 }
 0xe60   : > { %2474 = vadd.xlane.f32.xlu0 %v2473_v18  ;;  %3259 = vmatpush3.bf16.msra.mxu1 %v2522_v26 }
 0xe61   : > { %3260 = vmatprep.subr.bf16.mxu1 %v3509_v11  ;;  %v3051_v11 = vld [vmem:[%s1168_s17] ss:$0 sm:$0xff] }
 0xe64   : > { %3261 = vmatpush3.bf16.msra.mxu1 %v2523_v28 }
 0xeed   : > { %v2475_v19 = vpop.xlane.xlu0 %2474 }
 0xeee   : > { %v2476_v20 = vmul.f32 0.03125, %v2475_v19 }
 0xef0   : > { %v2477_v21 = vsub.f32 %v4127_v16, %v2476_v20 }
 0xef2   : > { %v2478_v22 = vmul.f32 %v2477_v21, %v2477_v21  ;;  %v2496_v43 = vmul.f32 %v3047_v36, %v2477_v21 }
 0xef4   : > { %v2479_v23 = vsel %vm1183_vm1, %v2478_v22, 0.0 }
 0xef5   : > { %2480 = vadd.xlane.f32.xlu1 %v2479_v23  ;;  %v3054_v23 = vld [vmem:[%s4382_s21] ss:$0 sm:$0xff] (!%p3053_p1) }
 0xf82   : > { %v2481_v35 = vpop.xlane.xlu1 %2480 }
 0xf83   : > { %v2482_v37 = vmul.f32 0.032258064, %v2481_v35 }
 0xf85   : > { %3405 = vrsqrt.f32 %v2482_v37  ;;  %vm2485_vm11 = vcmp.eq.f32.partialorder %v2482_v37, inf  ;;  %v2488_v40 = vand.u32 2147483648, %v2482_v37  ;;  %vm2487_vm12 = vcmp.eq.f32.partialorder %v2482_v37, 0.0 }
 0xf8f   : > { %v3406_v38 = vpop.eup %3405 }
 0xf90   : > { %v2484_v39 = vmul.f32 %v3406_v38, %v2482_v37 }
 0xf92   : > { %v2486_v1 = vsel %vm2485_vm11, %v2482_v37, %v2484_v39 }
 0xf93   : > { %v2489_v41 = vsel %vm2487_vm12, %v2488_v40, %v2486_v1 }
 0xf94   : > { %v2497_v42 = vadd.f32 1e-06, %v2489_v41 }
 0xf96   : > { %3407 = vrcp.f32 %v2497_v42 }
 0xfa0   : > { %v3408_v44 = vpop.eup %3407 }
 0xfa1   : > { %v2499_v46 = vmul.f32 %v3408_v44, %v2496_v43 }
 0xfa3   : > { %v2506_v47 = vadd.f32 %v3048_v45, %v2499_v46 }
 0xfa5   : > { %v2521_v48 = vpack.c.bf16 %v2506_v47, %v2506_v47 }
 0xfa7   : > { %3263 = vmatmul.mubr.msk.bf16.vlgmr.msra.gmra.mrb[44].mxu1 %vm1183_vm1, %v2521_v48 }
0x107a   : > { %v2567_v56 = vpop.f32.mrb[44].mxu1 }
0x107b   : > { %v2568_v57 = vadd.f32 %v3049_v55, %v2567_v56  ;;  %v3264_v58 = vpop.f32.mrb[45].mxu1 }
0x107c   : > { %v2570_v59 = vpop.f32.mrb[46].mxu1 }
0x107d   : > { %v2573_v60 = vmax.f32 %v2568_v57, 0.0  ;;  %v3265_v61 = vpop.f32.mrb[47].mxu1 }
0x107f   : > { %v2574_v62 = vpack.c.bf16 %v2573_v60, %v2573_v60 }
0x1081   : > { %3275 = vmatmul.mubr.msk.bf16.vlgmr.msra.gmra.mrb[40].mxu0 %vm2585_vm13, %v2574_v62 }
0x1153   : > { %2634 = sbr.rel (%p3053_p1) target bundleno = 4776 (0x12a8), region = 132 }
0x1154   : > { %v2623_v63 = vpop.f32.mrb[40].mxu0 }
0x1155   : > { %v2624_v0 = vadd.f32 %v3051_v11, %v2623_v63  ;;  %v3276_v2 = vpop.f32.mrb[41].mxu0 }
0x1156   : > { %v2626_v3 = vpop.f32.mrb[42].mxu0 }
0x1157   : > { %v2629_v4 = vadd.f32 %v2624_v0, %v4127_v16  ;;  %v3277_v5 = vpop.f32.mrb[43].mxu0 }
0x1159   : > { %2630 = vst.msk [vmem:[%s3852_s23] sm:$0xff] %vm1183_vm1, %v2629_v4 }
0x1160   : > { %v2635_v6 = vld [vmem:[%s3852_s23] sm:$0xff] }
0x1161   : > { %v2638_v7 = vsel %vm1183_vm1, %v2635_v6, 0.0 }
0x1162   : > { %2639 = vadd.xlane.f32.xlu0 %v2638_v7 }
0x11ef   : > { %v2640_v8 = vpop.xlane.xlu0 %2639 }
0x11f0   : > { %v2641_v10 = vmul.f32 0.03125, %v2640_v8 }
0x11f2   : > { %v2642_v12 = vsub.f32 %v2635_v6, %v2641_v10 }
0x11f4   : > { %v2643_v13 = vmul.f32 %v2642_v12, %v2642_v12  ;;  %v2661_v24 = vmul.f32 %v3054_v23, %v2642_v12 }
0x11f6   : > { %v2644_v14 = vsel %vm1183_vm1, %v2643_v13, 0.0 }
0x11f7   : > { %2645 = vadd.xlane.f32.xlu0 %v2644_v14 }
0x1284   : > { %v2646_v15 = vpop.xlane.xlu0 %2645 }
0x1285   : > { %v2647_v16 = vmul.f32 0.032258064, %v2646_v15 }
0x1287   : > { %3409 = vrsqrt.f32 %v2647_v16  ;;  %vm2650_vm14 = vcmp.eq.f32.partialorder %v2647_v16, inf  ;;  %v2653_v19 = vand.u32 2147483648, %v2647_v16  ;;  %vm2652_vm15 = vcmp.eq.f32.partialorder %v2647_v16, 0.0 }
0x1291   : > { %v3410_v17 = vpop.eup %3409 }
0x1292   : > { %v2649_v18 = vmul.f32 %v3410_v17, %v2647_v16 }
0x1294   : > { %v2651_v20 = vsel %vm2650_vm14, %v2647_v16, %v2649_v18 }
0x1295   : > { %v2654_v21 = vsel %vm2652_vm15, %v2653_v19, %v2651_v20 }
0x1296   : > { %v2662_v22 = vadd.f32 1e-06, %v2654_v21 }
0x1298   : > { %3411 = vrcp.f32 %v2662_v22 }
0x12a2   : > { %v3412_v31 = vpop.eup %3411 }
0x12a3   : > { %v2664_v26 = vmul.f32 %v3412_v31, %v2661_v24 }
0x12a5   : > { %v2671_v27 = vadd.f32 %v3055_v25, %v2664_v26 }
0x12a7   : > { %2672 = vst.msk [vmem:[%s3852_s23] sm:$0xff] %vm1183_vm1, %v2671_v27 }
0x12a8 PF: > { %s4384_s2 = sld [smem:[#allocation9_spill]]  ;;  %s4385_s13 = sld [smem:[#allocation6_spill]] }
0x12a9   : > { %s4387_s30 = sld [smem:[#allocation45_spill]]  ;;  %s2687_s0 = sshll.u32 %s3852_s23, 4  ;;  %s2688_s0 = int_to_ptr.vmem [resolvable:$true] %s2687_s0 }
0x12aa   : > { %s3413_s25 = scalar_lea.vmem %s2688_s0, 128  ;;  %s3525_s14 = smov [#allocation2]  }
0x12ab   : > { %p3414_p2 = scmp.ne.s32.totalorder %s2688_s0, %s3413_s25  ;;  %s3417_s16 = sshll.u32 %s3525_s14, 4  ;;  %s3418_s16 = int_to_ptr.vmem [resolvable:$false] %s3417_s16 }
0x12ac   : > { %s3419_s26 = scalar_lea.vmem %s3418_s16, 256  ;;  %p3420_p6 = scmp.lt.s32.totalorder %s2688_s0, %s3418_s16 }
0x12ad   : > { %p3415_p4 = pnand %p3414_p2, %p3710_p3  ;;  %p3421_p7 = scmp.lt.s32.totalorder %s3419_s26, %s3413_s25 }
0x12ae   : > { %s3057_s20 = sshll.u32 %s4384_s2, 7  ;;  %s4388_s27 = sand.u32 1, %s4385_s13  }
0x12af   : > { %s4189_s6 = scalar_lea.hbm %s4387_s30, %s3057_s20  ;;  %s2674_s19 = scalar_lea.sflag [#allocation3], %s4388_s27 }
0x12b0   : > { %p3416_p5 = pneg %p3415_p4  ;;  %p3422_p8 = por %p3421_p7, %p3420_p6 }
0x12b2   : > { %p3423_p10 = pnand %p3422_p8, %p3416_p5 }
0x12b4   : > { %3426 = shalt.err (!%p3423_p10)
}
0x12b5   : > { %s3427_s23 = scalar_lea.hbm %s4189_s6, 128  ;;  %s3431_s8 = scalar_lea.hbm %s4387_s30, 256 }
0x12b6   : > { %p3428_p11 = scmp.ne.s32.totalorder %s4189_s6, %s3427_s23  ;;  %p3432_p0 = scmp.lt.u32.totalorder %s4189_s6, %s4387_s30 }
0x12b7   : > { %p3433_p1 = scmp.lt.u32.totalorder %s3431_s8, %s3427_s23  ;;  %p3435_p4 = scmp.lt.u32.totalorder %s3427_s23, %s4189_s6 }
0x12b8   : > { %p3429_p12 = pnand %p3428_p11, %p3710_p3 }
0x12b9   : > { %p3434_p2 = por %p3433_p1, %p3432_p0 }
0x12ba   : > { %p3430_p13 = pneg %p3429_p12 }
0x12bb   : > { %p3436_p5 = por %p3435_p4, %p3434_p2 }
0x12bd   : > { %p3437_p6 = pnand %p3436_p5, %p3430_p13 }
0x12bf   : > { %3440 = shalt.err (!%p3437_p6)
}
0x12c0   : > { %3278 = dma.vmem_to_hbm [thread:$0]  (%p3710_p3), %s2688_s0, 128, %s4189_s6, %s2674_s19  }
0x12c1 PF: > { %s4389_s18 = sld [smem:[#allocation12_spill]]  ;;  %s4390_s24 = sld [smem:[#allocation5_spill]] }
0x12c7   : > { %p3284_p7 = scmp.ge.s32.totalorder %s4389_s18, 2  ;;  %s2699_s1 = sand.u32 1, %s4390_s24  }
0x12c8   : > { %s2700_s21 = scalar_lea.sflag [#allocation3], %s2699_s1 }
0x12c9   : > { %p3281_p8 = pnand %p3284_p7, %p3720_p9 }
0x12cb   : > { %3474 = dma.done.wait (!%p3281_p8), %s2700_s21, 128  }
0x12cc   : > { %3476 = vsyncadd (!%p3281_p8), %s2700_s21, 4294967168  ;;  %s39_s0 = sadd.s32 1, %s4389_s18   ;;  %s4392_s27 = sld [smem:[#allocation6_spill]] }
0x12cd   : > { %p36_p10 = scmp.ge.s32.totalorder %s39_s0, 6   ;;  %s4393_s3 = sld [smem:[#allocation7_spill]] }
0x12ce   : > { %s4394_s7 = sld [smem:[#allocation17_spill]]  ;;  %s4395_s28 = sld [smem:[#allocation10_spill]] }
0x12cf   : > { %s4396_s8 = sld [smem:[#allocation11_spill]]  ;;  %s4397_s4 = sld [smem:[#allocation13_spill]] }
0x12d0   : > { %s4398_s29 = sld [smem:[#allocation15_spill]]  ;;  %38 = sbr.rel (!%p36_p10) target bundleno = 31 (0x1f), region = 236 }
0x12d7   :  { %2705 = vsyncpa [#allocation3], 1 }
0x12d8   :  { %2707 = vsyncpa [#allocation3 + $0x1], 1 }

</bundles_post_ra>
